<compile_context>
chip_gen: v7x
topology: tpu7x:2x2x1
jax: 0.10.0
libtpu: 0.0.40
codegen_flags: <defaults>
</compile_context>

<pallas_src>
import functools
import math

import jax
import jax.numpy as jnp
from jax.experimental import pallas as pl
from jax.experimental.pallas import tpu as pltpu

BN_EPS = 1e-5
LANE = 128
_LSTM_UNROLL_LIMIT = 32

# Graceful fallback if this JAX build lacks BlockSpec(pipeline_mode=...).
try:
    _probe = pl.Buffered(1)
    pl.BlockSpec((8, 128), lambda i: (0, 0), pipeline_mode=_probe)
    _RESIDENT_KW = {"pipeline_mode": _probe}
except Exception:  # pragma: no cover
    _RESIDENT_KW = {}


def _sigmoid(z):
    return 1.0 / (1.0 + jnp.exp(-z))


def _resident_spec(a):
    """VMEM-resident input (constant block index), single-buffered."""
    return pl.BlockSpec(a.shape, lambda *_: (0,) * a.ndim, **_RESIDENT_KW)


def _pad2d(a, rows, cols):
    return jnp.zeros((rows, cols), a.dtype).at[:a.shape[0], :a.shape[1]].set(a)


def _pick_lstm_block(n):
    """Batch tile for the LSTM kernel (full batch when small, else a multiple of 16)."""
    if n <= 128:
        return n
    for bb in range(128, 15, -16):
        if n % bb == 0:
            return bb
    return n


def _pick_attn_block(n, seq_len, dh, budget_bytes=12 * 1024 * 1024):
    """Largest batch tile whose live VMEM footprint fits a conservative budget
    (safe for v5e/v6e/v7x default scoped VMEM); scores/probs grow ~T^2."""
    def footprint(bb):
        return (2 * bb * seq_len * dh * 2          # hs tile (bf16, double-buffered)
                + 2 * bb * seq_len * LANE * 4      # padded f32 output tile
                + 2 * bb * seq_len * seq_len * 4   # scores + probs
                + 4 * bb * seq_len * LANE * 4)     # ctx / h1 / h2 / h3
    divisors = [d for d in range(1, n + 1) if n % d == 0]
    for bb in sorted(divisors, reverse=True):
        if footprint(bb) <= budget_bytes:
            return bb
    return 1


# ---------------------------------------------------------------------------
# Kernel 1: one LSTM layer (forward + backward directions fused).
# x is time-major (T, nb, I); h/c are carried in vregs; the hoisted gate
# pre-activations live in a VMEM scratch and are read per step.
# ---------------------------------------------------------------------------
def _lstm_layer_kernel(x_ref, w_ih_ref, w_hh_ref, b_ref, hs_ref, gx_ref, *,
                       hidden, num_dirs):
    seq_len, nb, in_dim = x_ref.shape
    h4 = 4 * hidden

    # Hoisted input projection: one large MXU matmul for every timestep.
    x2 = x_ref[...].reshape(seq_len * nb, in_dim)
    gx = jnp.dot(x2, w_ih_ref[...], preferred_element_type=jnp.float32) + b_ref[...]
    gx_ref[...] = gx.reshape(seq_len, nb, num_dirs * h4)

    w_hh_f = w_hh_ref[0]
    w_hh_b = w_hh_ref[1] if num_dirs == 2 else None

    def cell(gates, c):
        i = _sigmoid(gates[:, 0 * hidden:1 * hidden])
        f = _sigmoid(gates[:, 1 * hidden:2 * hidden])
        g = jnp.tanh(gates[:, 2 * hidden:3 * hidden])
        o = _sigmoid(gates[:, 3 * hidden:4 * hidden])
        c_new = f * c + i * g
        return o * jnp.tanh(c_new), c_new

    def step(t, carry):
        h_f, c_f, h_b, c_b = carry
        g_f = gx_ref[t, :, :h4] + jnp.dot(
            h_f.astype(jnp.bfloat16), w_hh_f, preferred_element_type=jnp.float32)
        h_f, c_f = cell(g_f, c_f)
        hs_ref[t, :, :hidden] = h_f.astype(hs_ref.dtype)
        if num_dirs == 2:
            tb = seq_len - 1 - t
            g_b = gx_ref[tb, :, h4:] + jnp.dot(
                h_b.astype(jnp.bfloat16), w_hh_b, preferred_element_type=jnp.float32)
            h_b, c_b = cell(g_b, c_b)
            hs_ref[tb, :, hidden:] = h_b.astype(hs_ref.dtype)
        return h_f, c_f, h_b, c_b

    z = jnp.zeros((nb, hidden), jnp.float32)
    carry = (z, z, z, z)
    if seq_len <= _LSTM_UNROLL_LIMIT:
        for t in range(seq_len):
            carry = step(t, carry)
    else:
        jax.lax.fori_loop(0, seq_len, step, carry, unroll=4)


def lstm_layer(x_tm, w_ih, w_hh, b, *, block_n=None):
    """One (direction-fused) LSTM layer.  x_tm: (T, N, I) bf16 time-major.
    Returns hs (T, N, num_dirs * H) bf16 (fwd in cols :H, bwd in cols H:)."""
    seq_len, n, in_dim = x_tm.shape
    num_dirs, hidden, _ = w_hh.shape
    if block_n is None:
        block_n = _pick_lstm_block(n)
    assert n % block_n == 0
    out_dim = num_dirs * hidden
    kernel = functools.partial(_lstm_layer_kernel, hidden=hidden, num_dirs=num_dirs)
    return pl.pallas_call(
        kernel,
        out_shape=jax.ShapeDtypeStruct((seq_len, n, out_dim), jnp.bfloat16),
        grid=(n // block_n,),
        in_specs=[pl.BlockSpec((seq_len, block_n, in_dim), lambda i: (0, i, 0)),
                  _resident_spec(w_ih), _resident_spec(w_hh), _resident_spec(b)],
        out_specs=pl.BlockSpec((seq_len, block_n, out_dim), lambda i: (0, i, 0)),
        scratch_shapes=[pltpu.VMEM((seq_len, block_n, num_dirs * 4 * hidden),
                                   jnp.float32)],
        compiler_params=pltpu.CompilerParams(
            dimension_semantics=("parallel",)),
    )(x_tm, w_ih, w_hh, b)


# ---------------------------------------------------------------------------
# Kernel 2: self-attention + fc1/BN/fc2/fc3/fc4 head, gridded over the batch.
# ---------------------------------------------------------------------------
def attn_mlp_kernel(hs_ref, w1c_ref, w1h_ref, b1_ref, bns_ref, bnb_ref,
                    w2_ref, b2_ref, w3_ref, b3_ref, w4_ref, b4_ref, o_ref):
    hs = hs_ref[...]                                        # (BB, T, DH) bf16
    bb, seq_len, dh = hs.shape
    npad = b1_ref.shape[-1]

    # dot-product self-attention: softmax(hs @ hs^T) @ hs  (per sample)
    scores = jnp.einsum("btd,bsd->bts", hs, hs,
                        preferred_element_type=jnp.float32)
    scores = scores - jnp.max(scores, axis=-1, keepdims=True)
    p = jnp.exp(scores)
    p = p * pl.reciprocal(jnp.sum(p, axis=-1, keepdims=True), approx=True)
    ctx = jnp.einsum("bts,bsd->btd", p.astype(hs.dtype), hs,
                     preferred_element_type=jnp.float32)

    hs2 = hs.reshape(bb * seq_len, dh)
    ctx2 = ctx.reshape(bb * seq_len, dh).astype(hs.dtype)

    # fc1 over concat([ctx, hs], -1): concat folded into two matmuls (padded to 128).
    h1 = (jnp.dot(ctx2, w1c_ref[...], preferred_element_type=jnp.float32)
          + jnp.dot(hs2, w1h_ref[...], preferred_element_type=jnp.float32)
          + b1_ref[...])
    h1 = jnp.maximum(h1, 0.0)
    # dropout1: identity (eval mode).
    # TODO(synk): training-mode dropout masks / batch-stat BatchNorm not implemented.

    # Eval BatchNorm1d(50) + the module's reshape(N,50,T) channel remap, folded
    # into a (T, 128) affine broadcast over the batch tile (padding: scale=shift=0).
    h1 = (h1.reshape(bb, seq_len, npad) * bns_ref[...][None, :, :]
          + bnb_ref[...][None, :, :]).reshape(bb * seq_len, npad)

    # fc2 + ReLU (dropout2 identity), fc3 + ReLU, fc4 — all 128-lane padded.
    h2 = jnp.maximum(jnp.dot(h1.astype(hs.dtype), w2_ref[...],
                             preferred_element_type=jnp.float32) + b2_ref[...], 0.0)
    h3 = jnp.maximum(jnp.dot(h2.astype(hs.dtype), w3_ref[...],
                             preferred_element_type=jnp.float32) + b3_ref[...], 0.0)
    out = jnp.dot(h3.astype(hs.dtype), w4_ref[...],
                  preferred_element_type=jnp.float32) + b4_ref[...]
    o_ref[...] = out.reshape(bb, seq_len, npad).astype(o_ref.dtype)


def attn_mlp_forward(hs, w1c, w1h, b1, bn_scale, bn_shift, w2, b2, w3, b3, w4, b4,
                     *, block_batch=None, vmem_limit_bytes=None):
    n, seq_len, dh = hs.shape
    ncp = w4.shape[1]
    if block_batch is None:
        block_batch = _pick_attn_block(n, seq_len, dh)
    assert n % block_batch == 0

    batch_map = lambda i: (i, 0, 0)
    weights = (w1c, w1h, b1, bn_scale, bn_shift, w2, b2, w3, b3, w4, b4)

    rows = n * seq_len
    flops = 2 * (n * seq_len * seq_len * dh * 2       # attention matmuls
                 + rows * dh * LANE * 2               # fc1 (two halves)
                 + rows * LANE * LANE * 3)            # fc2/fc3/fc4 (padded)
    bytes_accessed = (int(hs.size) * 2 + rows * ncp * 4
                      + sum(int(w.size) * w.dtype.itemsize for w in weights))

    return pl.pallas_call(
        attn_mlp_kernel,
        out_shape=jax.ShapeDtypeStruct((n, seq_len, ncp), jnp.float32),
        grid=(n // block_batch,),
        in_specs=[pl.BlockSpec((block_batch, seq_len, dh), batch_map)]
                 + [_resident_spec(w) for w in weights],
        out_specs=pl.BlockSpec((block_batch, seq_len, ncp), batch_map),
        compiler_params=pltpu.CompilerParams(
            dimension_semantics=("parallel",),
            vmem_limit_bytes=vmem_limit_bytes),
        cost_estimate=pl.CostEstimate(
            flops=flops,
            transcendentals=n * seq_len * seq_len,
            bytes_accessed=bytes_accessed),
    )(hs, *weights)


# ---------------------------------------------------------------------------
# Full model wrapper (eval-mode forward).
# ---------------------------------------------------------------------------
def attention_rnn_forward(x, params, *, block_batch=None, lstm_block_n=None,
                          vmem_limit_bytes=None):
    """x: (N, T, input_size) float32 -> (N, T, num_classes)."""
    n, seq_len, _ = x.shape
    w1, b1 = params["fc1"]
    gamma, beta, mean, var = params["bn1"]
    w2, b2 = params["fc2"]
    w3, b3 = params["fc3"]
    w4, b4 = params["fc4"]
    n_fc1 = w1.shape[1]
    num_classes = w4.shape[1]

    # ---- LSTM stack: one direction-fused Pallas call per layer ----
    layer_in = jnp.transpose(x, (1, 0, 2)).astype(jnp.bfloat16)   # (T, N, I)
    for layer_dirs in params["lstm"]:
        w_ih = jnp.concatenate([p["w_ih"] for p in layer_dirs], axis=1)
        w_hh = jnp.stack([p["w_hh"] for p in layer_dirs], axis=0)
        bias = jnp.concatenate([p["b_ih"] + p["b_hh"] for p in layer_dirs], axis=1)
        layer_in = lstm_layer(layer_in, w_ih.astype(jnp.bfloat16),
                              w_hh.astype(jnp.bfloat16), bias,
                              block_n=lstm_block_n)
    hs = jnp.transpose(layer_in, (1, 0, 2))                        # (N, T, DH) bf16
    dh = hs.shape[-1]

    # ---- trace-time folds for the attention/MLP kernel (all padded to 128) ----
    w1c = _pad2d(w1[:dh], dh, LANE).astype(jnp.bfloat16)           # ctx half of fc1
    w1h = _pad2d(w1[dh:], dh, LANE).astype(jnp.bfloat16)           # hs half of fc1
    b1p = _pad2d(b1, 1, LANE)
    # eval BN -> per-channel affine, remapped through reshape(N, 50, T):
    # channel of element (t, f) is (t*50 + f) // T.
    scale = gamma * jax.lax.rsqrt(var + BN_EPS)
    shift = beta - mean * scale
    chan = (jnp.arange(seq_len)[:, None] * n_fc1
            + jnp.arange(n_fc1)[None, :]) // seq_len               # (T, 50)
    bn_scale = _pad2d(scale[chan], seq_len, LANE)
    bn_shift = _pad2d(shift[chan], seq_len, LANE)
    w2p = _pad2d(w2, LANE, LANE).astype(jnp.bfloat16)
    b2p = _pad2d(b2, 1, LANE)
    w3p = _pad2d(w3, LANE, LANE).astype(jnp.bfloat16)
    b3p = _pad2d(b3, 1, LANE)
    ncp = ((num_classes + LANE - 1) // LANE) * LANE
    w4p = _pad2d(w4, LANE, ncp).astype(jnp.bfloat16)
    b4p = _pad2d(b4, 1, ncp)

    out = attn_mlp_forward(hs, w1c, w1h, b1p, bn_scale, bn_shift,
                           w2p, b2p, w3p, b3p, w4p, b4p,
                           block_batch=block_batch,
                           vmem_limit_bytes=vmem_limit_bytes)
    return out[:, :, :num_classes]


# ---------------------------------------------------------------------------
# Params (PyTorch-style defaults; Linear/LSTM weights stored transposed (in,out))
# ---------------------------------------------------------------------------
def init_params(key, *, input_size, hidden_size, num_layers, num_classes,
                bidirectional=True):
    num_dir = 2 if bidirectional else 1
    h = hidden_size
    keys = list(jax.random.split(key, 4 * num_layers * num_dir + 16))
    ki = iter(keys)

    def uni(shape, bound):
        return jax.random.uniform(next(ki), shape, jnp.float32, -bound, bound)

    lstm = []
    in_size = input_size
    kb = 1.0 / math.sqrt(h)
    for _ in range(num_layers):
        dirs = []
        for _ in range(num_dir):
            dirs.append({"w_ih": uni((in_size, 4 * h), kb),
                         "w_hh": uni((h, 4 * h), kb),
                         "b_ih": uni((1, 4 * h), kb),
                         "b_hh": uni((1, 4 * h), kb)})
        lstm.append(dirs)
        in_size = num_dir * h

    def linear(fan_in, fan_out):
        bound = 1.0 / math.sqrt(fan_in)
        return uni((fan_in, fan_out), bound), uni((1, fan_out), bound)

    fc1 = linear(2 * num_dir * h, 50)
    fc2 = linear(50, 25)
    fc3 = linear(25, 10)
    fc4 = linear(10, num_classes)

    bkeys = jax.random.split(next(ki), 4)
    gamma = 1.0 + 0.1 * jax.random.normal(bkeys[0], (50,), jnp.float32)
    beta = 0.1 * jax.random.normal(bkeys[1], (50,), jnp.float32)
    mean = 0.1 * jax.random.normal(bkeys[2], (50,), jnp.float32)
    var = jax.random.uniform(bkeys[3], (50,), jnp.float32, 0.5, 1.5)

    return {"lstm": lstm, "fc1": fc1, "bn1": (gamma, beta, mean, var),
            "fc2": fc2, "fc3": fc3, "fc4": fc4}


# ---------------------------------------------------------------------------
# Pure-jnp reference mirroring the PyTorch module step by step (eval mode),
# using the same bf16-operand / f32-accumulate matmul policy as the kernels so
# the comparison isolates structural correctness from MXU precision policy.
# ---------------------------------------------------------------------------
def reference_forward(x, params):
    n, seq_len, _ = x.shape
    gamma, beta, mean, var = params["bn1"]
    w1, b1 = params["fc1"]
    w2, b2 = params["fc2"]
    w3, b3 = params["fc3"]
    w4, b4 = params["fc4"]
    n_fc1 = w1.shape[1]
    bf = lambda a: a.astype(jnp.bfloat16)
    mm = lambda a, b: jnp.dot(bf(a), bf(b), preferred_element_type=jnp.float32)

    def run_dir(x_tm, p, reverse):
        hidden = p["w_hh"].shape[0]
        b = p["b_ih"] + p["b_hh"]
        h = jnp.zeros((x_tm.shape[1], hidden), jnp.float32)
        c = jnp.zeros_like(h)
        hs = [None] * x_tm.shape[0]
        order = (range(x_tm.shape[0] - 1, -1, -1) if reverse
                 else range(x_tm.shape[0]))
        for t in order:
            gates = mm(x_tm[t], p["w_ih"]) + mm(h, p["w_hh"]) + b
            i = _sigmoid(gates[:, :hidden])
            f = _sigmoid(gates[:, hidden:2 * hidden])
            g = jnp.tanh(gates[:, 2 * hidden:3 * hidden])
            o = _sigmoid(gates[:, 3 * hidden:])
            c = f * c + i * g
            h = o * jnp.tanh(c)
            hs[t] = h
        return jnp.stack(hs, axis=0)

    layer_in = jnp.transpose(x, (1, 0, 2))
    for layer_dirs in params["lstm"]:
        outs = [run_dir(layer_in, p, reverse=(d == 1))
                for d, p in enumerate(layer_dirs)]
        layer_in = outs[0] if len(outs) == 1 else jnp.concatenate(outs, axis=-1)
    hs = jnp.transpose(layer_in, (1, 0, 2))                 # (N, T, D*H)

    hs_b = bf(hs)
    scores = jnp.einsum("btd,bsd->bts", hs_b, hs_b,
                        preferred_element_type=jnp.float32)
    p_att = jax.nn.softmax(scores, axis=-1)
    ctx = jnp.einsum("bts,bsd->btd", bf(p_att), hs_b,
                     preferred_element_type=jnp.float32)
    feat = jnp.concatenate([ctx, hs], axis=-1)

    h1 = jnp.maximum(mm(feat, w1) + b1, 0.0)
    h1r = h1.reshape(n, n_fc1, seq_len)                      # module's reshape
    h1r = ((h1r - mean[None, :, None])
           * (gamma / jnp.sqrt(var + BN_EPS))[None, :, None]
           + beta[None, :, None])
    h1 = h1r.reshape(n, seq_len, n_fc1)
    h2 = jnp.maximum(mm(h1, w2) + b2, 0.0)
    h3 = jnp.maximum(mm(h2, w3) + b3, 0.0)
    return mm(h3, w4) + b4


if __name__ == "__main__":
    input_size, hidden_size, num_layers, num_classes = 16, 32, 2, 5
    batch, seq_len = 8, 8

    key = jax.random.PRNGKey(0)
    kx, kp = jax.random.split(key)
    x = jax.random.normal(kx, (batch, seq_len, input_size), jnp.float32)
    params = init_params(kp, input_size=input_size, hidden_size=hidden_size,
                         num_layers=num_layers, num_classes=num_classes,
                         bidirectional=True)

    fwd = jax.jit(attention_rnn_forward)
    out = jax.block_until_ready(fwd(x, params))

    ref = reference_forward(x, params)
    assert out.shape == (batch, seq_len, num_classes)
    err = jnp.max(jnp.abs(out - ref))
    # bf16 MXU operands (f32 accumulate) in both kernel and reference; remaining
    # differences are accumulation order, folded BN rounding and approx reciprocal.
    assert jnp.allclose(out, ref, atol=2e-2, rtol=2e-2), f"max abs err {err}"
    print("KERNEL_OK")
</pallas_src>

<mosaic_0001>
module attributes {stable_mosaic.version = 11 : i64} {
  func.func @_lstm_layer_kernel(%arg0: i32, %arg1: memref<8x8x16xbf16, #tpu.memory_space<vmem>>, %arg2: memref<16x256xbf16, #tpu.memory_space<vmem>>, %arg3: memref<2x32x128xbf16, #tpu.memory_space<vmem>>, %arg4: memref<1x256xf32, #tpu.memory_space<vmem>>, %arg5: memref<8x8x64xbf16, #tpu.memory_space<vmem>>, %arg6: memref<8x8x256xf32, #tpu.memory_space<vmem>>) attributes {dimension_semantics = [#tpu.dimension_semantics<parallel>], iteration_bounds = array<i64: 1>, scalar_prefetch = 0 : i64, scratch_operands = 1 : i64, tpu.core_type = #tpu.core_type<tc>, window_params = [{transform_indices = @transform_0, window_bounds = array<i64: 8, 8, 16>}, {pipeline_mode = #tpu.pipeline_mode<synchronous>, transform_indices = @transform_1, window_bounds = array<i64: 16, 256>}, {pipeline_mode = #tpu.pipeline_mode<synchronous>, transform_indices = @transform_2, window_bounds = array<i64: 2, 32, 128>}, {pipeline_mode = #tpu.pipeline_mode<synchronous>, transform_indices = @transform_3, window_bounds = array<i64: 1, 256>}, {transform_indices = @transform_4, window_bounds = array<i64: 8, 8, 64>}]} {
    %c0 = arith.constant 0 : index
    %c0_0 = arith.constant 0 : index
    %c0_1 = arith.constant 0 : index
    %0 = vector.load %arg1[%c0, %c0_0, %c0_1] : memref<8x8x16xbf16, #tpu.memory_space<vmem>>, vector<8x8x16xbf16>
    %1 = vector.shape_cast %0 : vector<8x8x16xbf16> to vector<64x16xbf16>
    %c0_2 = arith.constant 0 : index
    %c0_3 = arith.constant 0 : index
    %2 = vector.load %arg2[%c0_2, %c0_3] : memref<16x256xbf16, #tpu.memory_space<vmem>>, vector<16x256xbf16>
    %cst = arith.constant dense<0.000000e+00> : vector<64x256xf32>
    %3 = tpu.matmul %1, %2, %cst {dimension_numbers = #tpu.dot_dimension_numbers<[1], [0], [0], [1], [0, 0, 1, 1], [], []>} : vector<64x16xbf16>, vector<16x256xbf16>, vector<64x256xf32> -> vector<64x256xf32>
    %c0_4 = arith.constant 0 : index
    %c0_5 = arith.constant 0 : index
    %4 = vector.load %arg4[%c0_4, %c0_5] : memref<1x256xf32, #tpu.memory_space<vmem>>, vector<1x256xf32>
    %5 = vector.broadcast %4 : vector<1x256xf32> to vector<64x256xf32>
    %6 = arith.addf %3, %5 : vector<64x256xf32>
    %7 = vector.shape_cast %6 : vector<64x256xf32> to vector<8x8x256xf32>
    %c0_6 = arith.constant 0 : index
    %c0_7 = arith.constant 0 : index
    %c0_8 = arith.constant 0 : index
    %8 = vector.load %arg6[%c0_6, %c0_7, %c0_8] : memref<8x8x256xf32, #tpu.memory_space<vmem>>, vector<8x8x256xf32>
    tpu.vector_store %arg6[%c0_6, %c0_7, %c0_8], %7 {strides = array<i32>} : memref<8x8x256xf32, #tpu.memory_space<vmem>>, vector<8x8x256xf32>,
    %c0_9 = arith.constant 0 : index
    %c0_10 = arith.constant 0 : index
    %c0_11 = arith.constant 0 : index
    %9 = vector.load %arg3[%c0_9, %c0_10, %c0_11] : memref<2x32x128xbf16, #tpu.memory_space<vmem>>, vector<1x32x128xbf16>
    %10 = vector.shape_cast %9 : vector<1x32x128xbf16> to vector<32x128xbf16>
    %c1 = arith.constant 1 : index
    %c0_12 = arith.constant 0 : index
    %c0_13 = arith.constant 0 : index
    %11 = vector.load %arg3[%c1, %c0_12, %c0_13] : memref<2x32x128xbf16, #tpu.memory_space<vmem>>, vector<1x32x128xbf16>
    %12 = vector.shape_cast %11 : vector<1x32x128xbf16> to vector<32x128xbf16>
    %cst_14 = arith.constant 0.000000e+00 : f32
    %13 = vector.broadcast %cst_14 : f32 to vector<8x32xf32>
    %c0_15 = arith.constant 0 : index
    %c0_16 = arith.constant 0 : index
    %c0_17 = arith.constant 0 : index
    %14 = vector.load %arg6[%c0_15, %c0_16, %c0_17] : memref<8x8x256xf32, #tpu.memory_space<vmem>>, vector<1x8x128xf32>
    %15 = vector.shape_cast %14 : vector<1x8x128xf32> to vector<8x128xf32>
    %16 = arith.truncf %13 : vector<8x32xf32> to vector<8x32xbf16>
    %cst_18 = arith.constant dense<0.000000e+00> : vector<8x128xf32>
    %17 = tpu.matmul %16, %10, %cst_18 {dimension_numbers = #tpu.dot_dimension_numbers<[1], [0], [0], [1], [0, 0, 1, 1], [], []>} : vector<8x32xbf16>, vector<32x128xbf16>, vector<8x128xf32> -> vector<8x128xf32>
    %18 = arith.addf %15, %17 : vector<8x128xf32>
    %19 = vector.extract_strided_slice %18 {offsets = [0, 0], sizes = [8, 32], strides = [1, 1]} : vector<8x128xf32> to vector<8x32xf32>
    %cst_19 = arith.constant 0.000000e+00 : f32
    %20 = vector.broadcast %cst_19 : f32 to vector<8x32xf32>
    %21 = arith.subf %20, %19 : vector<8x32xf32>
    %22 = math.exp %21 : vector<8x32xf32>
    %cst_20 = arith.constant 1.000000e+00 : f32
    %23 = vector.broadcast %cst_20 : f32 to vector<8x32xf32>
    %24 = arith.addf %23, %22 : vector<8x32xf32>
    %cst_21 = arith.constant 1.000000e+00 : f32
    %25 = vector.broadcast %cst_21 : f32 to vector<8x32xf32>
    %26 = arith.divf %25, %24 : vector<8x32xf32>
    %27 = vector.extract_strided_slice %18 {offsets = [0, 32], sizes = [8, 32], strides = [1, 1]} : vector<8x128xf32> to vector<8x32xf32>
    %cst_22 = arith.constant 0.000000e+00 : f32
    %28 = vector.broadcast %cst_22 : f32 to vector<8x32xf32>
    %29 = arith.subf %28, %27 : vector<8x32xf32>
    %30 = math.exp %29 : vector<8x32xf32>
    %cst_23 = arith.constant 1.000000e+00 : f32
    %31 = vector.broadcast %cst_23 : f32 to vector<8x32xf32>
    %32 = arith.addf %31, %30 : vector<8x32xf32>
    %cst_24 = arith.constant 1.000000e+00 : f32
    %33 = vector.broadcast %cst_24 : f32 to vector<8x32xf32>
    %34 = arith.divf %33, %32 : vector<8x32xf32>
    %35 = vector.extract_strided_slice %18 {offsets = [0, 64], sizes = [8, 32], strides = [1, 1]} : vector<8x128xf32> to vector<8x32xf32>
    %36 = math.tanh %35 : vector<8x32xf32>
    %37 = vector.extract_strided_slice %18 {offsets = [0, 96], sizes = [8, 32], strides = [1, 1]} : vector<8x128xf32> to vector<8x32xf32>
    %cst_25 = arith.constant 0.000000e+00 : f32
    %38 = vector.broadcast %cst_25 : f32 to vector<8x32xf32>
    %39 = arith.subf %38, %37 : vector<8x32xf32>
    %40 = math.exp %39 : vector<8x32xf32>
    %cst_26 = arith.constant 1.000000e+00 : f32
    %41 = vector.broadcast %cst_26 : f32 to vector<8x32xf32>
    %42 = arith.addf %41, %40 : vector<8x32xf32>
    %cst_27 = arith.constant 1.000000e+00 : f32
    %43 = vector.broadcast %cst_27 : f32 to vector<8x32xf32>
    %44 = arith.divf %43, %42 : vector<8x32xf32>
    %45 = arith.mulf %34, %13 : vector<8x32xf32>
    %46 = arith.mulf %26, %36 : vector<8x32xf32>
    %47 = arith.addf %45, %46 : vector<8x32xf32>
    %48 = math.tanh %47 : vector<8x32xf32>
    %49 = arith.mulf %44, %48 : vector<8x32xf32>
    %50 = arith.truncf %49 : vector<8x32xf32> to vector<8x32xbf16>
    %c0_28 = arith.constant 0 : index
    %c0_29 = arith.constant 0 : index
    %c0_30 = arith.constant 0 : index
    %51 = vector.load %arg5[%c0_28, %c0_29, %c0_30] : memref<8x8x64xbf16, #tpu.memory_space<vmem>>, vector<1x8x32xbf16>
    %52 = vector.shape_cast %51 : vector<1x8x32xbf16> to vector<8x32xbf16>
    %53 = vector.shape_cast %50 : vector<8x32xbf16> to vector<1x8x32xbf16>
    tpu.vector_store %arg5[%c0_28, %c0_29, %c0_30], %53 {strides = array<i32>} : memref<8x8x64xbf16, #tpu.memory_space<vmem>>, vector<1x8x32xbf16>,
    %c7 = arith.constant 7 : index
    %c0_31 = arith.constant 0 : index
    %c128 = arith.constant 128 : index
    %54 = vector.load %arg6[%c7, %c0_31, %c128] : memref<8x8x256xf32, #tpu.memory_space<vmem>>, vector<1x8x128xf32>
    %55 = vector.shape_cast %54 : vector<1x8x128xf32> to vector<8x128xf32>
    %56 = arith.truncf %13 : vector<8x32xf32> to vector<8x32xbf16>
    %cst_32 = arith.constant dense<0.000000e+00> : vector<8x128xf32>
    %57 = tpu.matmul %56, %12, %cst_32 {dimension_numbers = #tpu.dot_dimension_numbers<[1], [0], [0], [1], [0, 0, 1, 1], [], []>} : vector<8x32xbf16>, vector<32x128xbf16>, vector<8x128xf32> -> vector<8x128xf32>
    %58 = arith.addf %55, %57 : vector<8x128xf32>
    %59 = vector.extract_strided_slice %58 {offsets = [0, 0], sizes = [8, 32], strides = [1, 1]} : vector<8x128xf32> to vector<8x32xf32>
    %cst_33 = arith.constant 0.000000e+00 : f32
    %60 = vector.broadcast %cst_33 : f32 to vector<8x32xf32>
    %61 = arith.subf %60, %59 : vector<8x32xf32>
    %62 = math.exp %61 : vector<8x32xf32>
    %cst_34 = arith.constant 1.000000e+00 : f32
    %63 = vector.broadcast %cst_34 : f32 to vector<8x32xf32>
    %64 = arith.addf %63, %62 : vector<8x32xf32>
    %cst_35 = arith.constant 1.000000e+00 : f32
    %65 = vector.broadcast %cst_35 : f32 to vector<8x32xf32>
    %66 = arith.divf %65, %64 : vector<8x32xf32>
    %67 = vector.extract_strided_slice %58 {offsets = [0, 32], sizes = [8, 32], strides = [1, 1]} : vector<8x128xf32> to vector<8x32xf32>
    %cst_36 = arith.constant 0.000000e+00 : f32
    %68 = vector.broadcast %cst_36 : f32 to vector<8x32xf32>
    %69 = arith.subf %68, %67 : vector<8x32xf32>
    %70 = math.exp %69 : vector<8x32xf32>
    %cst_37 = arith.constant 1.000000e+00 : f32
    %71 = vector.broadcast %cst_37 : f32 to vector<8x32xf32>
    %72 = arith.addf %71, %70 : vector<8x32xf32>
    %cst_38 = arith.constant 1.000000e+00 : f32
    %73 = vector.broadcast %cst_38 : f32 to vector<8x32xf32>
    %74 = arith.divf %73, %72 : vector<8x32xf32>
    %75 = vector.extract_strided_slice %58 {offsets = [0, 64], sizes = [8, 32], strides = [1, 1]} : vector<8x128xf32> to vector<8x32xf32>
    %76 = math.tanh %75 : vector<8x32xf32>
    %77 = vector.extract_strided_slice %58 {offsets = [0, 96], sizes = [8, 32], strides = [1, 1]} : vector<8x128xf32> to vector<8x32xf32>
    %cst_39 = arith.constant 0.000000e+00 : f32
    %78 = vector.broadcast %cst_39 : f32 to vector<8x32xf32>
    %79 = arith.subf %78, %77 : vector<8x32xf32>
    %80 = math.exp %79 : vector<8x32xf32>
    %cst_40 = arith.constant 1.000000e+00 : f32
    %81 = vector.broadcast %cst_40 : f32 to vector<8x32xf32>
    %82 = arith.addf %81, %80 : vector<8x32xf32>
    %cst_41 = arith.constant 1.000000e+00 : f32
    %83 = vector.broadcast %cst_41 : f32 to vector<8x32xf32>
    %84 = arith.divf %83, %82 : vector<8x32xf32>
    %85 = arith.mulf %74, %13 : vector<8x32xf32>
    %86 = arith.mulf %66, %76 : vector<8x32xf32>
    %87 = arith.addf %85, %86 : vector<8x32xf32>
    %88 = math.tanh %87 : vector<8x32xf32>
    %89 = arith.mulf %84, %88 : vector<8x32xf32>
    %90 = arith.truncf %89 : vector<8x32xf32> to vector<8x32xbf16>
    %c7_42 = arith.constant 7 : index
    %c0_43 = arith.constant 0 : index
    %c32 = arith.constant 32 : index
    %91 = vector.load %arg5[%c7_42, %c0_43, %c32] : memref<8x8x64xbf16, #tpu.memory_space<vmem>>, vector<1x8x32xbf16>
    %92 = vector.shape_cast %91 : vector<1x8x32xbf16> to vector<8x32xbf16>
    %93 = vector.shape_cast %90 : vector<8x32xbf16> to vector<1x8x32xbf16>
    tpu.vector_store %arg5[%c7_42, %c0_43, %c32], %93 {strides = array<i32>} : memref<8x8x64xbf16, #tpu.memory_space<vmem>>, vector<1x8x32xbf16>,
    %c1_44 = arith.constant 1 : index
    %c0_45 = arith.constant 0 : index
    %c0_46 = arith.constant 0 : index
    %94 = vector.load %arg6[%c1_44, %c0_45, %c0_46] : memref<8x8x256xf32, #tpu.memory_space<vmem>>, vector<1x8x128xf32>
    %95 = vector.shape_cast %94 : vector<1x8x128xf32> to vector<8x128xf32>
    %96 = arith.truncf %49 : vector<8x32xf32> to vector<8x32xbf16>
    %cst_47 = arith.constant dense<0.000000e+00> : vector<8x128xf32>
    %97 = tpu.matmul %96, %10, %cst_47 {dimension_numbers = #tpu.dot_dimension_numbers<[1], [0], [0], [1], [0, 0, 1, 1], [], []>} : vector<8x32xbf16>, vector<32x128xbf16>, vector<8x128xf32> -> vector<8x128xf32>
    %98 = arith.addf %95, %97 : vector<8x128xf32>
    %99 = vector.extract_strided_slice %98 {offsets = [0, 0], sizes = [8, 32], strides = [1, 1]} : vector<8x128xf32> to vector<8x32xf32>
    %cst_48 = arith.constant 0.000000e+00 : f32
    %100 = vector.broadcast %cst_48 : f32 to vector<8x32xf32>
    %101 = arith.subf %100, %99 : vector<8x32xf32>
    %102 = math.exp %101 : vector<8x32xf32>
    %cst_49 = arith.constant 1.000000e+00 : f32
    %103 = vector.broadcast %cst_49 : f32 to vector<8x32xf32>
    %104 = arith.addf %103, %102 : vector<8x32xf32>
    %cst_50 = arith.constant 1.000000e+00 : f32
    %105 = vector.broadcast %cst_50 : f32 to vector<8x32xf32>
    %106 = arith.divf %105, %104 : vector<8x32xf32>
    %107 = vector.extract_strided_slice %98 {offsets = [0, 32], sizes = [8, 32], strides = [1, 1]} : vector<8x128xf32> to vector<8x32xf32>
    %cst_51 = arith.constant 0.000000e+00 : f32
    %108 = vector.broadcast %cst_51 : f32 to vector<8x32xf32>
    %109 = arith.subf %108, %107 : vector<8x32xf32>
    %110 = math.exp %109 : vector<8x32xf32>
    %cst_52 = arith.constant 1.000000e+00 : f32
    %111 = vector.broadcast %cst_52 : f32 to vector<8x32xf32>
    %112 = arith.addf %111, %110 : vector<8x32xf32>
    %cst_53 = arith.constant 1.000000e+00 : f32
    %113 = vector.broadcast %cst_53 : f32 to vector<8x32xf32>
    %114 = arith.divf %113, %112 : vector<8x32xf32>
    %115 = vector.extract_strided_slice %98 {offsets = [0, 64], sizes = [8, 32], strides = [1, 1]} : vector<8x128xf32> to vector<8x32xf32>
    %116 = math.tanh %115 : vector<8x32xf32>
    %117 = vector.extract_strided_slice %98 {offsets = [0, 96], sizes = [8, 32], strides = [1, 1]} : vector<8x128xf32> to vector<8x32xf32>
    %cst_54 = arith.constant 0.000000e+00 : f32
    %118 = vector.broadcast %cst_54 : f32 to vector<8x32xf32>
    %119 = arith.subf %118, %117 : vector<8x32xf32>
    %120 = math.exp %119 : vector<8x32xf32>
    %cst_55 = arith.constant 1.000000e+00 : f32
    %121 = vector.broadcast %cst_55 : f32 to vector<8x32xf32>
    %122 = arith.addf %121, %120 : vector<8x32xf32>
    %cst_56 = arith.constant 1.000000e+00 : f32
    %123 = vector.broadcast %cst_56 : f32 to vector<8x32xf32>
    %124 = arith.divf %123, %122 : vector<8x32xf32>
    %125 = arith.mulf %114, %47 : vector<8x32xf32>
    %126 = arith.mulf %106, %116 : vector<8x32xf32>
    %127 = arith.addf %125, %126 : vector<8x32xf32>
    %128 = math.tanh %127 : vector<8x32xf32>
    %129 = arith.mulf %124, %128 : vector<8x32xf32>
    %130 = arith.truncf %129 : vector<8x32xf32> to vector<8x32xbf16>
    %c1_57 = arith.constant 1 : index
    %c0_58 = arith.constant 0 : index
    %c0_59 = arith.constant 0 : index
    %131 = vector.load %arg5[%c1_57, %c0_58, %c0_59] : memref<8x8x64xbf16, #tpu.memory_space<vmem>>, vector<1x8x32xbf16>
    %132 = vector.shape_cast %131 : vector<1x8x32xbf16> to vector<8x32xbf16>
    %133 = vector.shape_cast %130 : vector<8x32xbf16> to vector<1x8x32xbf16>
    tpu.vector_store %arg5[%c1_57, %c0_58, %c0_59], %133 {strides = array<i32>} : memref<8x8x64xbf16, #tpu.memory_space<vmem>>, vector<1x8x32xbf16>,
    %c6 = arith.constant 6 : index
    %c0_60 = arith.constant 0 : index
    %c128_61 = arith.constant 128 : index
    %134 = vector.load %arg6[%c6, %c0_60, %c128_61] : memref<8x8x256xf32, #tpu.memory_space<vmem>>, vector<1x8x128xf32>
    %135 = vector.shape_cast %134 : vector<1x8x128xf32> to vector<8x128xf32>
    %136 = arith.truncf %89 : vector<8x32xf32> to vector<8x32xbf16>
    %cst_62 = arith.constant dense<0.000000e+00> : vector<8x128xf32>
    %137 = tpu.matmul %136, %12, %cst_62 {dimension_numbers = #tpu.dot_dimension_numbers<[1], [0], [0], [1], [0, 0, 1, 1], [], []>} : vector<8x32xbf16>, vector<32x128xbf16>, vector<8x128xf32> -> vector<8x128xf32>
    %138 = arith.addf %135, %137 : vector<8x128xf32>
    %139 = vector.extract_strided_slice %138 {offsets = [0, 0], sizes = [8, 32], strides = [1, 1]} : vector<8x128xf32> to vector<8x32xf32>
    %cst_63 = arith.constant 0.000000e+00 : f32
    %140 = vector.broadcast %cst_63 : f32 to vector<8x32xf32>
    %141 = arith.subf %140, %139 : vector<8x32xf32>
    %142 = math.exp %141 : vector<8x32xf32>
    %cst_64 = arith.constant 1.000000e+00 : f32
    %143 = vector.broadcast %cst_64 : f32 to vector<8x32xf32>
    %144 = arith.addf %143, %142 : vector<8x32xf32>
    %cst_65 = arith.constant 1.000000e+00 : f32
    %145 = vector.broadcast %cst_65 : f32 to vector<8x32xf32>
    %146 = arith.divf %145, %144 : vector<8x32xf32>
    %147 = vector.extract_strided_slice %138 {offsets = [0, 32], sizes = [8, 32], strides = [1, 1]} : vector<8x128xf32> to vector<8x32xf32>
    %cst_66 = arith.constant 0.000000e+00 : f32
    %148 = vector.broadcast %cst_66 : f32 to vector<8x32xf32>
    %149 = arith.subf %148, %147 : vector<8x32xf32>
    %150 = math.exp %149 : vector<8x32xf32>
    %cst_67 = arith.constant 1.000000e+00 : f32
    %151 = vector.broadcast %cst_67 : f32 to vector<8x32xf32>
    %152 = arith.addf %151, %150 : vector<8x32xf32>
    %cst_68 = arith.constant 1.000000e+00 : f32
    %153 = vector.broadcast %cst_68 : f32 to vector<8x32xf32>
    %154 = arith.divf %153, %152 : vector<8x32xf32>
    %155 = vector.extract_strided_slice %138 {offsets = [0, 64], sizes = [8, 32], strides = [1, 1]} : vector<8x128xf32> to vector<8x32xf32>
    %156 = math.tanh %155 : vector<8x32xf32>
    %157 = vector.extract_strided_slice %138 {offsets = [0, 96], sizes = [8, 32], strides = [1, 1]} : vector<8x128xf32> to vector<8x32xf32>
    %cst_69 = arith.constant 0.000000e+00 : f32
    %158 = vector.broadcast %cst_69 : f32 to vector<8x32xf32>
    %159 = arith.subf %158, %157 : vector<8x32xf32>
    %160 = math.exp %159 : vector<8x32xf32>
    %cst_70 = arith.constant 1.000000e+00 : f32
    %161 = vector.broadcast %cst_70 : f32 to vector<8x32xf32>
    %162 = arith.addf %161, %160 : vector<8x32xf32>
    %cst_71 = arith.constant 1.000000e+00 : f32
    %163 = vector.broadcast %cst_71 : f32 to vector<8x32xf32>
    %164 = arith.divf %163, %162 : vector<8x32xf32>
    %165 = arith.mulf %154, %87 : vector<8x32xf32>
    %166 = arith.mulf %146, %156 : vector<8x32xf32>
    %167 = arith.addf %165, %166 : vector<8x32xf32>
    %168 = math.tanh %167 : vector<8x32xf32>
    %169 = arith.mulf %164, %168 : vector<8x32xf32>
    %170 = arith.truncf %169 : vector<8x32xf32> to vector<8x32xbf16>
    %c6_72 = arith.constant 6 : index
    %c0_73 = arith.constant 0 : index
    %c32_74 = arith.constant 32 : index
    %171 = vector.load %arg5[%c6_72, %c0_73, %c32_74] : memref<8x8x64xbf16, #tpu.memory_space<vmem>>, vector<1x8x32xbf16>
    %172 = vector.shape_cast %171 : vector<1x8x32xbf16> to vector<8x32xbf16>
    %173 = vector.shape_cast %170 : vector<8x32xbf16> to vector<1x8x32xbf16>
    tpu.vector_store %arg5[%c6_72, %c0_73, %c32_74], %173 {strides = array<i32>} : memref<8x8x64xbf16, #tpu.memory_space<vmem>>, vector<1x8x32xbf16>,
    %c2 = arith.constant 2 : index
    %c0_75 = arith.constant 0 : index
    %c0_76 = arith.constant 0 : index
    %174 = vector.load %arg6[%c2, %c0_75, %c0_76] : memref<8x8x256xf32, #tpu.memory_space<vmem>>, vector<1x8x128xf32>
    %175 = vector.shape_cast %174 : vector<1x8x128xf32> to vector<8x128xf32>
    %176 = arith.truncf %129 : vector<8x32xf32> to vector<8x32xbf16>
    %cst_77 = arith.constant dense<0.000000e+00> : vector<8x128xf32>
    %177 = tpu.matmul %176, %10, %cst_77 {dimension_numbers = #tpu.dot_dimension_numbers<[1], [0], [0], [1], [0, 0, 1, 1], [], []>} : vector<8x32xbf16>, vector<32x128xbf16>, vector<8x128xf32> -> vector<8x128xf32>
    %178 = arith.addf %175, %177 : vector<8x128xf32>
    %179 = vector.extract_strided_slice %178 {offsets = [0, 0], sizes = [8, 32], strides = [1, 1]} : vector<8x128xf32> to vector<8x32xf32>
    %cst_78 = arith.constant 0.000000e+00 : f32
    %180 = vector.broadcast %cst_78 : f32 to vector<8x32xf32>
    %181 = arith.subf %180, %179 : vector<8x32xf32>
    %182 = math.exp %181 : vector<8x32xf32>
    %cst_79 = arith.constant 1.000000e+00 : f32
    %183 = vector.broadcast %cst_79 : f32 to vector<8x32xf32>
    %184 = arith.addf %183, %182 : vector<8x32xf32>
    %cst_80 = arith.constant 1.000000e+00 : f32
    %185 = vector.broadcast %cst_80 : f32 to vector<8x32xf32>
    %186 = arith.divf %185, %184 : vector<8x32xf32>
    %187 = vector.extract_strided_slice %178 {offsets = [0, 32], sizes = [8, 32], strides = [1, 1]} : vector<8x128xf32> to vector<8x32xf32>
    %cst_81 = arith.constant 0.000000e+00 : f32
    %188 = vector.broadcast %cst_81 : f32 to vector<8x32xf32>
    %189 = arith.subf %188, %187 : vector<8x32xf32>
    %190 = math.exp %189 : vector<8x32xf32>
    %cst_82 = arith.constant 1.000000e+00 : f32
    %191 = vector.broadcast %cst_82 : f32 to vector<8x32xf32>
    %192 = arith.addf %191, %190 : vector<8x32xf32>
    %cst_83 = arith.constant 1.000000e+00 : f32
    %193 = vector.broadcast %cst_83 : f32 to vector<8x32xf32>
    %194 = arith.divf %193, %192 : vector<8x32xf32>
    %195 = vector.extract_strided_slice %178 {offsets = [0, 64], sizes = [8, 32], strides = [1, 1]} : vector<8x128xf32> to vector<8x32xf32>
    %196 = math.tanh %195 : vector<8x32xf32>
    %197 = vector.extract_strided_slice %178 {offsets = [0, 96], sizes = [8, 32], strides = [1, 1]} : vector<8x128xf32> to vector<8x32xf32>
    %cst_84 = arith.constant 0.000000e+00 : f32
    %198 = vector.broadcast %cst_84 : f32 to vector<8x32xf32>
    %199 = arith.subf %198, %197 : vector<8x32xf32>
    %200 = math.exp %199 : vector<8x32xf32>
    %cst_85 = arith.constant 1.000000e+00 : f32
    %201 = vector.broadcast %cst_85 : f32 to vector<8x32xf32>
    %202 = arith.addf %201, %200 : vector<8x32xf32>
    %cst_86 = arith.constant 1.000000e+00 : f32
    %203 = vector.broadcast %cst_86 : f32 to vector<8x32xf32>
    %204 = arith.divf %203, %202 : vector<8x32xf32>
    %205 = arith.mulf %194, %127 : vector<8x32xf32>
    %206 = arith.mulf %186, %196 : vector<8x32xf32>
    %207 = arith.addf %205, %206 : vector<8x32xf32>
    %208 = math.tanh %207 : vector<8x32xf32>
    %209 = arith.mulf %204, %208 : vector<8x32xf32>
    %210 = arith.truncf %209 : vector<8x32xf32> to vector<8x32xbf16>
    %c2_87 = arith.constant 2 : index
    %c0_88 = arith.constant 0 : index
    %c0_89 = arith.constant 0 : index
    %211 = vector.load %arg5[%c2_87, %c0_88, %c0_89] : memref<8x8x64xbf16, #tpu.memory_space<vmem>>, vector<1x8x32xbf16>
    %212 = vector.shape_cast %211 : vector<1x8x32xbf16> to vector<8x32xbf16>
    %213 = vector.shape_cast %210 : vector<8x32xbf16> to vector<1x8x32xbf16>
    tpu.vector_store %arg5[%c2_87, %c0_88, %c0_89], %213 {strides = array<i32>} : memref<8x8x64xbf16, #tpu.memory_space<vmem>>, vector<1x8x32xbf16>,
    %c5 = arith.constant 5 : index
    %c0_90 = arith.constant 0 : index
    %c128_91 = arith.constant 128 : index
    %214 = vector.load %arg6[%c5, %c0_90, %c128_91] : memref<8x8x256xf32, #tpu.memory_space<vmem>>, vector<1x8x128xf32>
    %215 = vector.shape_cast %214 : vector<1x8x128xf32> to vector<8x128xf32>
    %216 = arith.truncf %169 : vector<8x32xf32> to vector<8x32xbf16>
    %cst_92 = arith.constant dense<0.000000e+00> : vector<8x128xf32>
    %217 = tpu.matmul %216, %12, %cst_92 {dimension_numbers = #tpu.dot_dimension_numbers<[1], [0], [0], [1], [0, 0, 1, 1], [], []>} : vector<8x32xbf16>, vector<32x128xbf16>, vector<8x128xf32> -> vector<8x128xf32>
    %218 = arith.addf %215, %217 : vector<8x128xf32>
    %219 = vector.extract_strided_slice %218 {offsets = [0, 0], sizes = [8, 32], strides = [1, 1]} : vector<8x128xf32> to vector<8x32xf32>
    %cst_93 = arith.constant 0.000000e+00 : f32
    %220 = vector.broadcast %cst_93 : f32 to vector<8x32xf32>
    %221 = arith.subf %220, %219 : vector<8x32xf32>
    %222 = math.exp %221 : vector<8x32xf32>
    %cst_94 = arith.constant 1.000000e+00 : f32
    %223 = vector.broadcast %cst_94 : f32 to vector<8x32xf32>
    %224 = arith.addf %223, %222 : vector<8x32xf32>
    %cst_95 = arith.constant 1.000000e+00 : f32
    %225 = vector.broadcast %cst_95 : f32 to vector<8x32xf32>
    %226 = arith.divf %225, %224 : vector<8x32xf32>
    %227 = vector.extract_strided_slice %218 {offsets = [0, 32], sizes = [8, 32], strides = [1, 1]} : vector<8x128xf32> to vector<8x32xf32>
    %cst_96 = arith.constant 0.000000e+00 : f32
    %228 = vector.broadcast %cst_96 : f32 to vector<8x32xf32>
    %229 = arith.subf %228, %227 : vector<8x32xf32>
    %230 = math.exp %229 : vector<8x32xf32>
    %cst_97 = arith.constant 1.000000e+00 : f32
    %231 = vector.broadcast %cst_97 : f32 to vector<8x32xf32>
    %232 = arith.addf %231, %230 : vector<8x32xf32>
    %cst_98 = arith.constant 1.000000e+00 : f32
    %233 = vector.broadcast %cst_98 : f32 to vector<8x32xf32>
    %234 = arith.divf %233, %232 : vector<8x32xf32>
    %235 = vector.extract_strided_slice %218 {offsets = [0, 64], sizes = [8, 32], strides = [1, 1]} : vector<8x128xf32> to vector<8x32xf32>
    %236 = math.tanh %235 : vector<8x32xf32>
    %237 = vector.extract_strided_slice %218 {offsets = [0, 96], sizes = [8, 32], strides = [1, 1]} : vector<8x128xf32> to vector<8x32xf32>
    %cst_99 = arith.constant 0.000000e+00 : f32
    %238 = vector.broadcast %cst_99 : f32 to vector<8x32xf32>
    %239 = arith.subf %238, %237 : vector<8x32xf32>
    %240 = math.exp %239 : vector<8x32xf32>
    %cst_100 = arith.constant 1.000000e+00 : f32
    %241 = vector.broadcast %cst_100 : f32 to vector<8x32xf32>
    %242 = arith.addf %241, %240 : vector<8x32xf32>
    %cst_101 = arith.constant 1.000000e+00 : f32
    %243 = vector.broadcast %cst_101 : f32 to vector<8x32xf32>
    %244 = arith.divf %243, %242 : vector<8x32xf32>
    %245 = arith.mulf %234, %167 : vector<8x32xf32>
    %246 = arith.mulf %226, %236 : vector<8x32xf32>
    %247 = arith.addf %245, %246 : vector<8x32xf32>
    %248 = math.tanh %247 : vector<8x32xf32>
    %249 = arith.mulf %244, %248 : vector<8x32xf32>
    %250 = arith.truncf %249 : vector<8x32xf32> to vector<8x32xbf16>
    %c5_102 = arith.constant 5 : index
    %c0_103 = arith.constant 0 : index
    %c32_104 = arith.constant 32 : index
    %251 = vector.load %arg5[%c5_102, %c0_103, %c32_104] : memref<8x8x64xbf16, #tpu.memory_space<vmem>>, vector<1x8x32xbf16>
    %252 = vector.shape_cast %251 : vector<1x8x32xbf16> to vector<8x32xbf16>
    %253 = vector.shape_cast %250 : vector<8x32xbf16> to vector<1x8x32xbf16>
    tpu.vector_store %arg5[%c5_102, %c0_103, %c32_104], %253 {strides = array<i32>} : memref<8x8x64xbf16, #tpu.memory_space<vmem>>, vector<1x8x32xbf16>,
    %c3 = arith.constant 3 : index
    %c0_105 = arith.constant 0 : index
    %c0_106 = arith.constant 0 : index
    %254 = vector.load %arg6[%c3, %c0_105, %c0_106] : memref<8x8x256xf32, #tpu.memory_space<vmem>>, vector<1x8x128xf32>
    %255 = vector.shape_cast %254 : vector<1x8x128xf32> to vector<8x128xf32>
    %256 = arith.truncf %209 : vector<8x32xf32> to vector<8x32xbf16>
    %cst_107 = arith.constant dense<0.000000e+00> : vector<8x128xf32>
    %257 = tpu.matmul %256, %10, %cst_107 {dimension_numbers = #tpu.dot_dimension_numbers<[1], [0], [0], [1], [0, 0, 1, 1], [], []>} : vector<8x32xbf16>, vector<32x128xbf16>, vector<8x128xf32> -> vector<8x128xf32>
    %258 = arith.addf %255, %257 : vector<8x128xf32>
    %259 = vector.extract_strided_slice %258 {offsets = [0, 0], sizes = [8, 32], strides = [1, 1]} : vector<8x128xf32> to vector<8x32xf32>
    %cst_108 = arith.constant 0.000000e+00 : f32
    %260 = vector.broadcast %cst_108 : f32 to vector<8x32xf32>
    %261 = arith.subf %260, %259 : vector<8x32xf32>
    %262 = math.exp %261 : vector<8x32xf32>
    %cst_109 = arith.constant 1.000000e+00 : f32
    %263 = vector.broadcast %cst_109 : f32 to vector<8x32xf32>
    %264 = arith.addf %263, %262 : vector<8x32xf32>
    %cst_110 = arith.constant 1.000000e+00 : f32
    %265 = vector.broadcast %cst_110 : f32 to vector<8x32xf32>
    %266 = arith.divf %265, %264 : vector<8x32xf32>
    %267 = vector.extract_strided_slice %258 {offsets = [0, 32], sizes = [8, 32], strides = [1, 1]} : vector<8x128xf32> to vector<8x32xf32>
    %cst_111 = arith.constant 0.000000e+00 : f32
    %268 = vector.broadcast %cst_111 : f32 to vector<8x32xf32>
    %269 = arith.subf %268, %267 : vector<8x32xf32>
    %270 = math.exp %269 : vector<8x32xf32>
    %cst_112 = arith.constant 1.000000e+00 : f32
    %271 = vector.broadcast %cst_112 : f32 to vector<8x32xf32>
    %272 = arith.addf %271, %270 : vector<8x32xf32>
    %cst_113 = arith.constant 1.000000e+00 : f32
    %273 = vector.broadcast %cst_113 : f32 to vector<8x32xf32>
    %274 = arith.divf %273, %272 : vector<8x32xf32>
    %275 = vector.extract_strided_slice %258 {offsets = [0, 64], sizes = [8, 32], strides = [1, 1]} : vector<8x128xf32> to vector<8x32xf32>
    %276 = math.tanh %275 : vector<8x32xf32>
    %277 = vector.extract_strided_slice %258 {offsets = [0, 96], sizes = [8, 32], strides = [1, 1]} : vector<8x128xf32> to vector<8x32xf32>
    %cst_114 = arith.constant 0.000000e+00 : f32
    %278 = vector.broadcast %cst_114 : f32 to vector<8x32xf32>
    %279 = arith.subf %278, %277 : vector<8x32xf32>
    %280 = math.exp %279 : vector<8x32xf32>
    %cst_115 = arith.constant 1.000000e+00 : f32
    %281 = vector.broadcast %cst_115 : f32 to vector<8x32xf32>
    %282 = arith.addf %281, %280 : vector<8x32xf32>
    %cst_116 = arith.constant 1.000000e+00 : f32
    %283 = vector.broadcast %cst_116 : f32 to vector<8x32xf32>
    %284 = arith.divf %283, %282 : vector<8x32xf32>
    %285 = arith.mulf %274, %207 : vector<8x32xf32>
    %286 = arith.mulf %266, %276 : vector<8x32xf32>
    %287 = arith.addf %285, %286 : vector<8x32xf32>
    %288 = math.tanh %287 : vector<8x32xf32>
    %289 = arith.mulf %284, %288 : vector<8x32xf32>
    %290 = arith.truncf %289 : vector<8x32xf32> to vector<8x32xbf16>
    %c3_117 = arith.constant 3 : index
    %c0_118 = arith.constant 0 : index
    %c0_119 = arith.constant 0 : index
    %291 = vector.load %arg5[%c3_117, %c0_118, %c0_119] : memref<8x8x64xbf16, #tpu.memory_space<vmem>>, vector<1x8x32xbf16>
    %292 = vector.shape_cast %291 : vector<1x8x32xbf16> to vector<8x32xbf16>
    %293 = vector.shape_cast %290 : vector<8x32xbf16> to vector<1x8x32xbf16>
    tpu.vector_store %arg5[%c3_117, %c0_118, %c0_119], %293 {strides = array<i32>} : memref<8x8x64xbf16, #tpu.memory_space<vmem>>, vector<1x8x32xbf16>,
    %c4 = arith.constant 4 : index
    %c0_120 = arith.constant 0 : index
    %c128_121 = arith.constant 128 : index
    %294 = vector.load %arg6[%c4, %c0_120, %c128_121] : memref<8x8x256xf32, #tpu.memory_space<vmem>>, vector<1x8x128xf32>
    %295 = vector.shape_cast %294 : vector<1x8x128xf32> to vector<8x128xf32>
    %296 = arith.truncf %249 : vector<8x32xf32> to vector<8x32xbf16>
    %cst_122 = arith.constant dense<0.000000e+00> : vector<8x128xf32>
    %297 = tpu.matmul %296, %12, %cst_122 {dimension_numbers = #tpu.dot_dimension_numbers<[1], [0], [0], [1], [0, 0, 1, 1], [], []>} : vector<8x32xbf16>, vector<32x128xbf16>, vector<8x128xf32> -> vector<8x128xf32>
    %298 = arith.addf %295, %297 : vector<8x128xf32>
    %299 = vector.extract_strided_slice %298 {offsets = [0, 0], sizes = [8, 32], strides = [1, 1]} : vector<8x128xf32> to vector<8x32xf32>
    %cst_123 = arith.constant 0.000000e+00 : f32
    %300 = vector.broadcast %cst_123 : f32 to vector<8x32xf32>
    %301 = arith.subf %300, %299 : vector<8x32xf32>
    %302 = math.exp %301 : vector<8x32xf32>
    %cst_124 = arith.constant 1.000000e+00 : f32
    %303 = vector.broadcast %cst_124 : f32 to vector<8x32xf32>
    %304 = arith.addf %303, %302 : vector<8x32xf32>
    %cst_125 = arith.constant 1.000000e+00 : f32
    %305 = vector.broadcast %cst_125 : f32 to vector<8x32xf32>
    %306 = arith.divf %305, %304 : vector<8x32xf32>
    %307 = vector.extract_strided_slice %298 {offsets = [0, 32], sizes = [8, 32], strides = [1, 1]} : vector<8x128xf32> to vector<8x32xf32>
    %cst_126 = arith.constant 0.000000e+00 : f32
    %308 = vector.broadcast %cst_126 : f32 to vector<8x32xf32>
    %309 = arith.subf %308, %307 : vector<8x32xf32>
    %310 = math.exp %309 : vector<8x32xf32>
    %cst_127 = arith.constant 1.000000e+00 : f32
    %311 = vector.broadcast %cst_127 : f32 to vector<8x32xf32>
    %312 = arith.addf %311, %310 : vector<8x32xf32>
    %cst_128 = arith.constant 1.000000e+00 : f32
    %313 = vector.broadcast %cst_128 : f32 to vector<8x32xf32>
    %314 = arith.divf %313, %312 : vector<8x32xf32>
    %315 = vector.extract_strided_slice %298 {offsets = [0, 64], sizes = [8, 32], strides = [1, 1]} : vector<8x128xf32> to vector<8x32xf32>
    %316 = math.tanh %315 : vector<8x32xf32>
    %317 = vector.extract_strided_slice %298 {offsets = [0, 96], sizes = [8, 32], strides = [1, 1]} : vector<8x128xf32> to vector<8x32xf32>
    %cst_129 = arith.constant 0.000000e+00 : f32
    %318 = vector.broadcast %cst_129 : f32 to vector<8x32xf32>
    %319 = arith.subf %318, %317 : vector<8x32xf32>
    %320 = math.exp %319 : vector<8x32xf32>
    %cst_130 = arith.constant 1.000000e+00 : f32
    %321 = vector.broadcast %cst_130 : f32 to vector<8x32xf32>
    %322 = arith.addf %321, %320 : vector<8x32xf32>
    %cst_131 = arith.constant 1.000000e+00 : f32
    %323 = vector.broadcast %cst_131 : f32 to vector<8x32xf32>
    %324 = arith.divf %323, %322 : vector<8x32xf32>
    %325 = arith.mulf %314, %247 : vector<8x32xf32>
    %326 = arith.mulf %306, %316 : vector<8x32xf32>
    %327 = arith.addf %325, %326 : vector<8x32xf32>
    %328 = math.tanh %327 : vector<8x32xf32>
    %329 = arith.mulf %324, %328 : vector<8x32xf32>
    %330 = arith.truncf %329 : vector<8x32xf32> to vector<8x32xbf16>
    %c4_132 = arith.constant 4 : index
    %c0_133 = arith.constant 0 : index
    %c32_134 = arith.constant 32 : index
    %331 = vector.load %arg5[%c4_132, %c0_133, %c32_134] : memref<8x8x64xbf16, #tpu.memory_space<vmem>>, vector<1x8x32xbf16>
    %332 = vector.shape_cast %331 : vector<1x8x32xbf16> to vector<8x32xbf16>
    %333 = vector.shape_cast %330 : vector<8x32xbf16> to vector<1x8x32xbf16>
    tpu.vector_store %arg5[%c4_132, %c0_133, %c32_134], %333 {strides = array<i32>} : memref<8x8x64xbf16, #tpu.memory_space<vmem>>, vector<1x8x32xbf16>,
    %c4_135 = arith.constant 4 : index
    %c0_136 = arith.constant 0 : index
    %c0_137 = arith.constant 0 : index
    %334 = vector.load %arg6[%c4_135, %c0_136, %c0_137] : memref<8x8x256xf32, #tpu.memory_space<vmem>>, vector<1x8x128xf32>
    %335 = vector.shape_cast %334 : vector<1x8x128xf32> to vector<8x128xf32>
    %336 = arith.truncf %289 : vector<8x32xf32> to vector<8x32xbf16>
    %cst_138 = arith.constant dense<0.000000e+00> : vector<8x128xf32>
    %337 = tpu.matmul %336, %10, %cst_138 {dimension_numbers = #tpu.dot_dimension_numbers<[1], [0], [0], [1], [0, 0, 1, 1], [], []>} : vector<8x32xbf16>, vector<32x128xbf16>, vector<8x128xf32> -> vector<8x128xf32>
    %338 = arith.addf %335, %337 : vector<8x128xf32>
    %339 = vector.extract_strided_slice %338 {offsets = [0, 0], sizes = [8, 32], strides = [1, 1]} : vector<8x128xf32> to vector<8x32xf32>
    %cst_139 = arith.constant 0.000000e+00 : f32
    %340 = vector.broadcast %cst_139 : f32 to vector<8x32xf32>
    %341 = arith.subf %340, %339 : vector<8x32xf32>
    %342 = math.exp %341 : vector<8x32xf32>
    %cst_140 = arith.constant 1.000000e+00 : f32
    %343 = vector.broadcast %cst_140 : f32 to vector<8x32xf32>
    %344 = arith.addf %343, %342 : vector<8x32xf32>
    %cst_141 = arith.constant 1.000000e+00 : f32
    %345 = vector.broadcast %cst_141 : f32 to vector<8x32xf32>
    %346 = arith.divf %345, %344 : vector<8x32xf32>
    %347 = vector.extract_strided_slice %338 {offsets = [0, 32], sizes = [8, 32], strides = [1, 1]} : vector<8x128xf32> to vector<8x32xf32>
    %cst_142 = arith.constant 0.000000e+00 : f32
    %348 = vector.broadcast %cst_142 : f32 to vector<8x32xf32>
    %349 = arith.subf %348, %347 : vector<8x32xf32>
    %350 = math.exp %349 : vector<8x32xf32>
    %cst_143 = arith.constant 1.000000e+00 : f32
    %351 = vector.broadcast %cst_143 : f32 to vector<8x32xf32>
    %352 = arith.addf %351, %350 : vector<8x32xf32>
    %cst_144 = arith.constant 1.000000e+00 : f32
    %353 = vector.broadcast %cst_144 : f32 to vector<8x32xf32>
    %354 = arith.divf %353, %352 : vector<8x32xf32>
    %355 = vector.extract_strided_slice %338 {offsets = [0, 64], sizes = [8, 32], strides = [1, 1]} : vector<8x128xf32> to vector<8x32xf32>
    %356 = math.tanh %355 : vector<8x32xf32>
    %357 = vector.extract_strided_slice %338 {offsets = [0, 96], sizes = [8, 32], strides = [1, 1]} : vector<8x128xf32> to vector<8x32xf32>
    %cst_145 = arith.constant 0.000000e+00 : f32
    %358 = vector.broadcast %cst_145 : f32 to vector<8x32xf32>
    %359 = arith.subf %358, %357 : vector<8x32xf32>
    %360 = math.exp %359 : vector<8x32xf32>
    %cst_146 = arith.constant 1.000000e+00 : f32
    %361 = vector.broadcast %cst_146 : f32 to vector<8x32xf32>
    %362 = arith.addf %361, %360 : vector<8x32xf32>
    %cst_147 = arith.constant 1.000000e+00 : f32
    %363 = vector.broadcast %cst_147 : f32 to vector<8x32xf32>
    %364 = arith.divf %363, %362 : vector<8x32xf32>
    %365 = arith.mulf %354, %287 : vector<8x32xf32>
    %366 = arith.mulf %346, %356 : vector<8x32xf32>
    %367 = arith.addf %365, %366 : vector<8x32xf32>
    %368 = math.tanh %367 : vector<8x32xf32>
    %369 = arith.mulf %364, %368 : vector<8x32xf32>
    %370 = arith.truncf %369 : vector<8x32xf32> to vector<8x32xbf16>
    %c4_148 = arith.constant 4 : index
    %c0_149 = arith.constant 0 : index
    %c0_150 = arith.constant 0 : index
    %371 = vector.load %arg5[%c4_148, %c0_149, %c0_150] : memref<8x8x64xbf16, #tpu.memory_space<vmem>>, vector<1x8x32xbf16>
    %372 = vector.shape_cast %371 : vector<1x8x32xbf16> to vector<8x32xbf16>
    %373 = vector.shape_cast %370 : vector<8x32xbf16> to vector<1x8x32xbf16>
    tpu.vector_store %arg5[%c4_148, %c0_149, %c0_150], %373 {strides = array<i32>} : memref<8x8x64xbf16, #tpu.memory_space<vmem>>, vector<1x8x32xbf16>,
    %c3_151 = arith.constant 3 : index
    %c0_152 = arith.constant 0 : index
    %c128_153 = arith.constant 128 : index
    %374 = vector.load %arg6[%c3_151, %c0_152, %c128_153] : memref<8x8x256xf32, #tpu.memory_space<vmem>>, vector<1x8x128xf32>
    %375 = vector.shape_cast %374 : vector<1x8x128xf32> to vector<8x128xf32>
    %376 = arith.truncf %329 : vector<8x32xf32> to vector<8x32xbf16>
    %cst_154 = arith.constant dense<0.000000e+00> : vector<8x128xf32>
    %377 = tpu.matmul %376, %12, %cst_154 {dimension_numbers = #tpu.dot_dimension_numbers<[1], [0], [0], [1], [0, 0, 1, 1], [], []>} : vector<8x32xbf16>, vector<32x128xbf16>, vector<8x128xf32> -> vector<8x128xf32>
    %378 = arith.addf %375, %377 : vector<8x128xf32>
    %379 = vector.extract_strided_slice %378 {offsets = [0, 0], sizes = [8, 32], strides = [1, 1]} : vector<8x128xf32> to vector<8x32xf32>
    %cst_155 = arith.constant 0.000000e+00 : f32
    %380 = vector.broadcast %cst_155 : f32 to vector<8x32xf32>
    %381 = arith.subf %380, %379 : vector<8x32xf32>
    %382 = math.exp %381 : vector<8x32xf32>
    %cst_156 = arith.constant 1.000000e+00 : f32
    %383 = vector.broadcast %cst_156 : f32 to vector<8x32xf32>
    %384 = arith.addf %383, %382 : vector<8x32xf32>
    %cst_157 = arith.constant 1.000000e+00 : f32
    %385 = vector.broadcast %cst_157 : f32 to vector<8x32xf32>
    %386 = arith.divf %385, %384 : vector<8x32xf32>
    %387 = vector.extract_strided_slice %378 {offsets = [0, 32], sizes = [8, 32], strides = [1, 1]} : vector<8x128xf32> to vector<8x32xf32>
    %cst_158 = arith.constant 0.000000e+00 : f32
    %388 = vector.broadcast %cst_158 : f32 to vector<8x32xf32>
    %389 = arith.subf %388, %387 : vector<8x32xf32>
    %390 = math.exp %389 : vector<8x32xf32>
    %cst_159 = arith.constant 1.000000e+00 : f32
    %391 = vector.broadcast %cst_159 : f32 to vector<8x32xf32>
    %392 = arith.addf %391, %390 : vector<8x32xf32>
    %cst_160 = arith.constant 1.000000e+00 : f32
    %393 = vector.broadcast %cst_160 : f32 to vector<8x32xf32>
    %394 = arith.divf %393, %392 : vector<8x32xf32>
    %395 = vector.extract_strided_slice %378 {offsets = [0, 64], sizes = [8, 32], strides = [1, 1]} : vector<8x128xf32> to vector<8x32xf32>
    %396 = math.tanh %395 : vector<8x32xf32>
    %397 = vector.extract_strided_slice %378 {offsets = [0, 96], sizes = [8, 32], strides = [1, 1]} : vector<8x128xf32> to vector<8x32xf32>
    %cst_161 = arith.constant 0.000000e+00 : f32
    %398 = vector.broadcast %cst_161 : f32 to vector<8x32xf32>
    %399 = arith.subf %398, %397 : vector<8x32xf32>
    %400 = math.exp %399 : vector<8x32xf32>
    %cst_162 = arith.constant 1.000000e+00 : f32
    %401 = vector.broadcast %cst_162 : f32 to vector<8x32xf32>
    %402 = arith.addf %401, %400 : vector<8x32xf32>
    %cst_163 = arith.constant 1.000000e+00 : f32
    %403 = vector.broadcast %cst_163 : f32 to vector<8x32xf32>
    %404 = arith.divf %403, %402 : vector<8x32xf32>
    %405 = arith.mulf %394, %327 : vector<8x32xf32>
    %406 = arith.mulf %386, %396 : vector<8x32xf32>
    %407 = arith.addf %405, %406 : vector<8x32xf32>
    %408 = math.tanh %407 : vector<8x32xf32>
    %409 = arith.mulf %404, %408 : vector<8x32xf32>
    %410 = arith.truncf %409 : vector<8x32xf32> to vector<8x32xbf16>
    %c3_164 = arith.constant 3 : index
    %c0_165 = arith.constant 0 : index
    %c32_166 = arith.constant 32 : index
    %411 = vector.load %arg5[%c3_164, %c0_165, %c32_166] : memref<8x8x64xbf16, #tpu.memory_space<vmem>>, vector<1x8x32xbf16>
    %412 = vector.shape_cast %411 : vector<1x8x32xbf16> to vector<8x32xbf16>
    %413 = vector.shape_cast %410 : vector<8x32xbf16> to vector<1x8x32xbf16>
    tpu.vector_store %arg5[%c3_164, %c0_165, %c32_166], %413 {strides = array<i32>} : memref<8x8x64xbf16, #tpu.memory_space<vmem>>, vector<1x8x32xbf16>,
    %c5_167 = arith.constant 5 : index
    %c0_168 = arith.constant 0 : index
    %c0_169 = arith.constant 0 : index
    %414 = vector.load %arg6[%c5_167, %c0_168, %c0_169] : memref<8x8x256xf32, #tpu.memory_space<vmem>>, vector<1x8x128xf32>
    %415 = vector.shape_cast %414 : vector<1x8x128xf32> to vector<8x128xf32>
    %416 = arith.truncf %369 : vector<8x32xf32> to vector<8x32xbf16>
    %cst_170 = arith.constant dense<0.000000e+00> : vector<8x128xf32>
    %417 = tpu.matmul %416, %10, %cst_170 {dimension_numbers = #tpu.dot_dimension_numbers<[1], [0], [0], [1], [0, 0, 1, 1], [], []>} : vector<8x32xbf16>, vector<32x128xbf16>, vector<8x128xf32> -> vector<8x128xf32>
    %418 = arith.addf %415, %417 : vector<8x128xf32>
    %419 = vector.extract_strided_slice %418 {offsets = [0, 0], sizes = [8, 32], strides = [1, 1]} : vector<8x128xf32> to vector<8x32xf32>
    %cst_171 = arith.constant 0.000000e+00 : f32
    %420 = vector.broadcast %cst_171 : f32 to vector<8x32xf32>
    %421 = arith.subf %420, %419 : vector<8x32xf32>
    %422 = math.exp %421 : vector<8x32xf32>
    %cst_172 = arith.constant 1.000000e+00 : f32
    %423 = vector.broadcast %cst_172 : f32 to vector<8x32xf32>
    %424 = arith.addf %423, %422 : vector<8x32xf32>
    %cst_173 = arith.constant 1.000000e+00 : f32
    %425 = vector.broadcast %cst_173 : f32 to vector<8x32xf32>
    %426 = arith.divf %425, %424 : vector<8x32xf32>
    %427 = vector.extract_strided_slice %418 {offsets = [0, 32], sizes = [8, 32], strides = [1, 1]} : vector<8x128xf32> to vector<8x32xf32>
    %cst_174 = arith.constant 0.000000e+00 : f32
    %428 = vector.broadcast %cst_174 : f32 to vector<8x32xf32>
    %429 = arith.subf %428, %427 : vector<8x32xf32>
    %430 = math.exp %429 : vector<8x32xf32>
    %cst_175 = arith.constant 1.000000e+00 : f32
    %431 = vector.broadcast %cst_175 : f32 to vector<8x32xf32>
    %432 = arith.addf %431, %430 : vector<8x32xf32>
    %cst_176 = arith.constant 1.000000e+00 : f32
    %433 = vector.broadcast %cst_176 : f32 to vector<8x32xf32>
    %434 = arith.divf %433, %432 : vector<8x32xf32>
    %435 = vector.extract_strided_slice %418 {offsets = [0, 64], sizes = [8, 32], strides = [1, 1]} : vector<8x128xf32> to vector<8x32xf32>
    %436 = math.tanh %435 : vector<8x32xf32>
    %437 = vector.extract_strided_slice %418 {offsets = [0, 96], sizes = [8, 32], strides = [1, 1]} : vector<8x128xf32> to vector<8x32xf32>
    %cst_177 = arith.constant 0.000000e+00 : f32
    %438 = vector.broadcast %cst_177 : f32 to vector<8x32xf32>
    %439 = arith.subf %438, %437 : vector<8x32xf32>
    %440 = math.exp %439 : vector<8x32xf32>
    %cst_178 = arith.constant 1.000000e+00 : f32
    %441 = vector.broadcast %cst_178 : f32 to vector<8x32xf32>
    %442 = arith.addf %441, %440 : vector<8x32xf32>
    %cst_179 = arith.constant 1.000000e+00 : f32
    %443 = vector.broadcast %cst_179 : f32 to vector<8x32xf32>
    %444 = arith.divf %443, %442 : vector<8x32xf32>
    %445 = arith.mulf %434, %367 : vector<8x32xf32>
    %446 = arith.mulf %426, %436 : vector<8x32xf32>
    %447 = arith.addf %445, %446 : vector<8x32xf32>
    %448 = math.tanh %447 : vector<8x32xf32>
    %449 = arith.mulf %444, %448 : vector<8x32xf32>
    %450 = arith.truncf %449 : vector<8x32xf32> to vector<8x32xbf16>
    %c5_180 = arith.constant 5 : index
    %c0_181 = arith.constant 0 : index
    %c0_182 = arith.constant 0 : index
    %451 = vector.load %arg5[%c5_180, %c0_181, %c0_182] : memref<8x8x64xbf16, #tpu.memory_space<vmem>>, vector<1x8x32xbf16>
    %452 = vector.shape_cast %451 : vector<1x8x32xbf16> to vector<8x32xbf16>
    %453 = vector.shape_cast %450 : vector<8x32xbf16> to vector<1x8x32xbf16>
    tpu.vector_store %arg5[%c5_180, %c0_181, %c0_182], %453 {strides = array<i32>} : memref<8x8x64xbf16, #tpu.memory_space<vmem>>, vector<1x8x32xbf16>,
    %c2_183 = arith.constant 2 : index
    %c0_184 = arith.constant 0 : index
    %c128_185 = arith.constant 128 : index
    %454 = vector.load %arg6[%c2_183, %c0_184, %c128_185] : memref<8x8x256xf32, #tpu.memory_space<vmem>>, vector<1x8x128xf32>
    %455 = vector.shape_cast %454 : vector<1x8x128xf32> to vector<8x128xf32>
    %456 = arith.truncf %409 : vector<8x32xf32> to vector<8x32xbf16>
    %cst_186 = arith.constant dense<0.000000e+00> : vector<8x128xf32>
    %457 = tpu.matmul %456, %12, %cst_186 {dimension_numbers = #tpu.dot_dimension_numbers<[1], [0], [0], [1], [0, 0, 1, 1], [], []>} : vector<8x32xbf16>, vector<32x128xbf16>, vector<8x128xf32> -> vector<8x128xf32>
    %458 = arith.addf %455, %457 : vector<8x128xf32>
    %459 = vector.extract_strided_slice %458 {offsets = [0, 0], sizes = [8, 32], strides = [1, 1]} : vector<8x128xf32> to vector<8x32xf32>
    %cst_187 = arith.constant 0.000000e+00 : f32
    %460 = vector.broadcast %cst_187 : f32 to vector<8x32xf32>
    %461 = arith.subf %460, %459 : vector<8x32xf32>
    %462 = math.exp %461 : vector<8x32xf32>
    %cst_188 = arith.constant 1.000000e+00 : f32
    %463 = vector.broadcast %cst_188 : f32 to vector<8x32xf32>
    %464 = arith.addf %463, %462 : vector<8x32xf32>
    %cst_189 = arith.constant 1.000000e+00 : f32
    %465 = vector.broadcast %cst_189 : f32 to vector<8x32xf32>
    %466 = arith.divf %465, %464 : vector<8x32xf32>
    %467 = vector.extract_strided_slice %458 {offsets = [0, 32], sizes = [8, 32], strides = [1, 1]} : vector<8x128xf32> to vector<8x32xf32>
    %cst_190 = arith.constant 0.000000e+00 : f32
    %468 = vector.broadcast %cst_190 : f32 to vector<8x32xf32>
    %469 = arith.subf %468, %467 : vector<8x32xf32>
    %470 = math.exp %469 : vector<8x32xf32>
    %cst_191 = arith.constant 1.000000e+00 : f32
    %471 = vector.broadcast %cst_191 : f32 to vector<8x32xf32>
    %472 = arith.addf %471, %470 : vector<8x32xf32>
    %cst_192 = arith.constant 1.000000e+00 : f32
    %473 = vector.broadcast %cst_192 : f32 to vector<8x32xf32>
    %474 = arith.divf %473, %472 : vector<8x32xf32>
    %475 = vector.extract_strided_slice %458 {offsets = [0, 64], sizes = [8, 32], strides = [1, 1]} : vector<8x128xf32> to vector<8x32xf32>
    %476 = math.tanh %475 : vector<8x32xf32>
    %477 = vector.extract_strided_slice %458 {offsets = [0, 96], sizes = [8, 32], strides = [1, 1]} : vector<8x128xf32> to vector<8x32xf32>
    %cst_193 = arith.constant 0.000000e+00 : f32
    %478 = vector.broadcast %cst_193 : f32 to vector<8x32xf32>
    %479 = arith.subf %478, %477 : vector<8x32xf32>
    %480 = math.exp %479 : vector<8x32xf32>
    %cst_194 = arith.constant 1.000000e+00 : f32
    %481 = vector.broadcast %cst_194 : f32 to vector<8x32xf32>
    %482 = arith.addf %481, %480 : vector<8x32xf32>
    %cst_195 = arith.constant 1.000000e+00 : f32
    %483 = vector.broadcast %cst_195 : f32 to vector<8x32xf32>
    %484 = arith.divf %483, %482 : vector<8x32xf32>
    %485 = arith.mulf %474, %407 : vector<8x32xf32>
    %486 = arith.mulf %466, %476 : vector<8x32xf32>
    %487 = arith.addf %485, %486 : vector<8x32xf32>
    %488 = math.tanh %487 : vector<8x32xf32>
    %489 = arith.mulf %484, %488 : vector<8x32xf32>
    %490 = arith.truncf %489 : vector<8x32xf32> to vector<8x32xbf16>
    %c2_196 = arith.constant 2 : index
    %c0_197 = arith.constant 0 : index
    %c32_198 = arith.constant 32 : index
    %491 = vector.load %arg5[%c2_196, %c0_197, %c32_198] : memref<8x8x64xbf16, #tpu.memory_space<vmem>>, vector<1x8x32xbf16>
    %492 = vector.shape_cast %491 : vector<1x8x32xbf16> to vector<8x32xbf16>
    %493 = vector.shape_cast %490 : vector<8x32xbf16> to vector<1x8x32xbf16>
    tpu.vector_store %arg5[%c2_196, %c0_197, %c32_198], %493 {strides = array<i32>} : memref<8x8x64xbf16, #tpu.memory_space<vmem>>, vector<1x8x32xbf16>,
    %c6_199 = arith.constant 6 : index
    %c0_200 = arith.constant 0 : index
    %c0_201 = arith.constant 0 : index
    %494 = vector.load %arg6[%c6_199, %c0_200, %c0_201] : memref<8x8x256xf32, #tpu.memory_space<vmem>>, vector<1x8x128xf32>
    %495 = vector.shape_cast %494 : vector<1x8x128xf32> to vector<8x128xf32>
    %496 = arith.truncf %449 : vector<8x32xf32> to vector<8x32xbf16>
    %cst_202 = arith.constant dense<0.000000e+00> : vector<8x128xf32>
    %497 = tpu.matmul %496, %10, %cst_202 {dimension_numbers = #tpu.dot_dimension_numbers<[1], [0], [0], [1], [0, 0, 1, 1], [], []>} : vector<8x32xbf16>, vector<32x128xbf16>, vector<8x128xf32> -> vector<8x128xf32>
    %498 = arith.addf %495, %497 : vector<8x128xf32>
    %499 = vector.extract_strided_slice %498 {offsets = [0, 0], sizes = [8, 32], strides = [1, 1]} : vector<8x128xf32> to vector<8x32xf32>
    %cst_203 = arith.constant 0.000000e+00 : f32
    %500 = vector.broadcast %cst_203 : f32 to vector<8x32xf32>
    %501 = arith.subf %500, %499 : vector<8x32xf32>
    %502 = math.exp %501 : vector<8x32xf32>
    %cst_204 = arith.constant 1.000000e+00 : f32
    %503 = vector.broadcast %cst_204 : f32 to vector<8x32xf32>
    %504 = arith.addf %503, %502 : vector<8x32xf32>
    %cst_205 = arith.constant 1.000000e+00 : f32
    %505 = vector.broadcast %cst_205 : f32 to vector<8x32xf32>
    %506 = arith.divf %505, %504 : vector<8x32xf32>
    %507 = vector.extract_strided_slice %498 {offsets = [0, 32], sizes = [8, 32], strides = [1, 1]} : vector<8x128xf32> to vector<8x32xf32>
    %cst_206 = arith.constant 0.000000e+00 : f32
    %508 = vector.broadcast %cst_206 : f32 to vector<8x32xf32>
    %509 = arith.subf %508, %507 : vector<8x32xf32>
    %510 = math.exp %509 : vector<8x32xf32>
    %cst_207 = arith.constant 1.000000e+00 : f32
    %511 = vector.broadcast %cst_207 : f32 to vector<8x32xf32>
    %512 = arith.addf %511, %510 : vector<8x32xf32>
    %cst_208 = arith.constant 1.000000e+00 : f32
    %513 = vector.broadcast %cst_208 : f32 to vector<8x32xf32>
    %514 = arith.divf %513, %512 : vector<8x32xf32>
    %515 = vector.extract_strided_slice %498 {offsets = [0, 64], sizes = [8, 32], strides = [1, 1]} : vector<8x128xf32> to vector<8x32xf32>
    %516 = math.tanh %515 : vector<8x32xf32>
    %517 = vector.extract_strided_slice %498 {offsets = [0, 96], sizes = [8, 32], strides = [1, 1]} : vector<8x128xf32> to vector<8x32xf32>
    %cst_209 = arith.constant 0.000000e+00 : f32
    %518 = vector.broadcast %cst_209 : f32 to vector<8x32xf32>
    %519 = arith.subf %518, %517 : vector<8x32xf32>
    %520 = math.exp %519 : vector<8x32xf32>
    %cst_210 = arith.constant 1.000000e+00 : f32
    %521 = vector.broadcast %cst_210 : f32 to vector<8x32xf32>
    %522 = arith.addf %521, %520 : vector<8x32xf32>
    %cst_211 = arith.constant 1.000000e+00 : f32
    %523 = vector.broadcast %cst_211 : f32 to vector<8x32xf32>
    %524 = arith.divf %523, %522 : vector<8x32xf32>
    %525 = arith.mulf %514, %447 : vector<8x32xf32>
    %526 = arith.mulf %506, %516 : vector<8x32xf32>
    %527 = arith.addf %525, %526 : vector<8x32xf32>
    %528 = math.tanh %527 : vector<8x32xf32>
    %529 = arith.mulf %524, %528 : vector<8x32xf32>
    %530 = arith.truncf %529 : vector<8x32xf32> to vector<8x32xbf16>
    %c6_212 = arith.constant 6 : index
    %c0_213 = arith.constant 0 : index
    %c0_214 = arith.constant 0 : index
    %531 = vector.load %arg5[%c6_212, %c0_213, %c0_214] : memref<8x8x64xbf16, #tpu.memory_space<vmem>>, vector<1x8x32xbf16>
    %532 = vector.shape_cast %531 : vector<1x8x32xbf16> to vector<8x32xbf16>
    %533 = vector.shape_cast %530 : vector<8x32xbf16> to vector<1x8x32xbf16>
    tpu.vector_store %arg5[%c6_212, %c0_213, %c0_214], %533 {strides = array<i32>} : memref<8x8x64xbf16, #tpu.memory_space<vmem>>, vector<1x8x32xbf16>,
    %c1_215 = arith.constant 1 : index
    %c0_216 = arith.constant 0 : index
    %c128_217 = arith.constant 128 : index
    %534 = vector.load %arg6[%c1_215, %c0_216, %c128_217] : memref<8x8x256xf32, #tpu.memory_space<vmem>>, vector<1x8x128xf32>
    %535 = vector.shape_cast %534 : vector<1x8x128xf32> to vector<8x128xf32>
    %536 = arith.truncf %489 : vector<8x32xf32> to vector<8x32xbf16>
    %cst_218 = arith.constant dense<0.000000e+00> : vector<8x128xf32>
    %537 = tpu.matmul %536, %12, %cst_218 {dimension_numbers = #tpu.dot_dimension_numbers<[1], [0], [0], [1], [0, 0, 1, 1], [], []>} : vector<8x32xbf16>, vector<32x128xbf16>, vector<8x128xf32> -> vector<8x128xf32>
    %538 = arith.addf %535, %537 : vector<8x128xf32>
    %539 = vector.extract_strided_slice %538 {offsets = [0, 0], sizes = [8, 32], strides = [1, 1]} : vector<8x128xf32> to vector<8x32xf32>
    %cst_219 = arith.constant 0.000000e+00 : f32
    %540 = vector.broadcast %cst_219 : f32 to vector<8x32xf32>
    %541 = arith.subf %540, %539 : vector<8x32xf32>
    %542 = math.exp %541 : vector<8x32xf32>
    %cst_220 = arith.constant 1.000000e+00 : f32
    %543 = vector.broadcast %cst_220 : f32 to vector<8x32xf32>
    %544 = arith.addf %543, %542 : vector<8x32xf32>
    %cst_221 = arith.constant 1.000000e+00 : f32
    %545 = vector.broadcast %cst_221 : f32 to vector<8x32xf32>
    %546 = arith.divf %545, %544 : vector<8x32xf32>
    %547 = vector.extract_strided_slice %538 {offsets = [0, 32], sizes = [8, 32], strides = [1, 1]} : vector<8x128xf32> to vector<8x32xf32>
    %cst_222 = arith.constant 0.000000e+00 : f32
    %548 = vector.broadcast %cst_222 : f32 to vector<8x32xf32>
    %549 = arith.subf %548, %547 : vector<8x32xf32>
    %550 = math.exp %549 : vector<8x32xf32>
    %cst_223 = arith.constant 1.000000e+00 : f32
    %551 = vector.broadcast %cst_223 : f32 to vector<8x32xf32>
    %552 = arith.addf %551, %550 : vector<8x32xf32>
    %cst_224 = arith.constant 1.000000e+00 : f32
    %553 = vector.broadcast %cst_224 : f32 to vector<8x32xf32>
    %554 = arith.divf %553, %552 : vector<8x32xf32>
    %555 = vector.extract_strided_slice %538 {offsets = [0, 64], sizes = [8, 32], strides = [1, 1]} : vector<8x128xf32> to vector<8x32xf32>
    %556 = math.tanh %555 : vector<8x32xf32>
    %557 = vector.extract_strided_slice %538 {offsets = [0, 96], sizes = [8, 32], strides = [1, 1]} : vector<8x128xf32> to vector<8x32xf32>
    %cst_225 = arith.constant 0.000000e+00 : f32
    %558 = vector.broadcast %cst_225 : f32 to vector<8x32xf32>
    %559 = arith.subf %558, %557 : vector<8x32xf32>
    %560 = math.exp %559 : vector<8x32xf32>
    %cst_226 = arith.constant 1.000000e+00 : f32
    %561 = vector.broadcast %cst_226 : f32 to vector<8x32xf32>
    %562 = arith.addf %561, %560 : vector<8x32xf32>
    %cst_227 = arith.constant 1.000000e+00 : f32
    %563 = vector.broadcast %cst_227 : f32 to vector<8x32xf32>
    %564 = arith.divf %563, %562 : vector<8x32xf32>
    %565 = arith.mulf %554, %487 : vector<8x32xf32>
    %566 = arith.mulf %546, %556 : vector<8x32xf32>
    %567 = arith.addf %565, %566 : vector<8x32xf32>
    %568 = math.tanh %567 : vector<8x32xf32>
    %569 = arith.mulf %564, %568 : vector<8x32xf32>
    %570 = arith.truncf %569 : vector<8x32xf32> to vector<8x32xbf16>
    %c1_228 = arith.constant 1 : index
    %c0_229 = arith.constant 0 : index
    %c32_230 = arith.constant 32 : index
    %571 = vector.load %arg5[%c1_228, %c0_229, %c32_230] : memref<8x8x64xbf16, #tpu.memory_space<vmem>>, vector<1x8x32xbf16>
    %572 = vector.shape_cast %571 : vector<1x8x32xbf16> to vector<8x32xbf16>
    %573 = vector.shape_cast %570 : vector<8x32xbf16> to vector<1x8x32xbf16>
    tpu.vector_store %arg5[%c1_228, %c0_229, %c32_230], %573 {strides = array<i32>} : memref<8x8x64xbf16, #tpu.memory_space<vmem>>, vector<1x8x32xbf16>,
    %c7_231 = arith.constant 7 : index
    %c0_232 = arith.constant 0 : index
    %c0_233 = arith.constant 0 : index
    %574 = vector.load %arg6[%c7_231, %c0_232, %c0_233] : memref<8x8x256xf32, #tpu.memory_space<vmem>>, vector<1x8x128xf32>
    %575 = vector.shape_cast %574 : vector<1x8x128xf32> to vector<8x128xf32>
    %576 = arith.truncf %529 : vector<8x32xf32> to vector<8x32xbf16>
    %cst_234 = arith.constant dense<0.000000e+00> : vector<8x128xf32>
    %577 = tpu.matmul %576, %10, %cst_234 {dimension_numbers = #tpu.dot_dimension_numbers<[1], [0], [0], [1], [0, 0, 1, 1], [], []>} : vector<8x32xbf16>, vector<32x128xbf16>, vector<8x128xf32> -> vector<8x128xf32>
    %578 = arith.addf %575, %577 : vector<8x128xf32>
    %579 = vector.extract_strided_slice %578 {offsets = [0, 0], sizes = [8, 32], strides = [1, 1]} : vector<8x128xf32> to vector<8x32xf32>
    %cst_235 = arith.constant 0.000000e+00 : f32
    %580 = vector.broadcast %cst_235 : f32 to vector<8x32xf32>
    %581 = arith.subf %580, %579 : vector<8x32xf32>
    %582 = math.exp %581 : vector<8x32xf32>
    %cst_236 = arith.constant 1.000000e+00 : f32
    %583 = vector.broadcast %cst_236 : f32 to vector<8x32xf32>
    %584 = arith.addf %583, %582 : vector<8x32xf32>
    %cst_237 = arith.constant 1.000000e+00 : f32
    %585 = vector.broadcast %cst_237 : f32 to vector<8x32xf32>
    %586 = arith.divf %585, %584 : vector<8x32xf32>
    %587 = vector.extract_strided_slice %578 {offsets = [0, 32], sizes = [8, 32], strides = [1, 1]} : vector<8x128xf32> to vector<8x32xf32>
    %cst_238 = arith.constant 0.000000e+00 : f32
    %588 = vector.broadcast %cst_238 : f32 to vector<8x32xf32>
    %589 = arith.subf %588, %587 : vector<8x32xf32>
    %590 = math.exp %589 : vector<8x32xf32>
    %cst_239 = arith.constant 1.000000e+00 : f32
    %591 = vector.broadcast %cst_239 : f32 to vector<8x32xf32>
    %592 = arith.addf %591, %590 : vector<8x32xf32>
    %cst_240 = arith.constant 1.000000e+00 : f32
    %593 = vector.broadcast %cst_240 : f32 to vector<8x32xf32>
    %594 = arith.divf %593, %592 : vector<8x32xf32>
    %595 = vector.extract_strided_slice %578 {offsets = [0, 64], sizes = [8, 32], strides = [1, 1]} : vector<8x128xf32> to vector<8x32xf32>
    %596 = math.tanh %595 : vector<8x32xf32>
    %597 = vector.extract_strided_slice %578 {offsets = [0, 96], sizes = [8, 32], strides = [1, 1]} : vector<8x128xf32> to vector<8x32xf32>
    %cst_241 = arith.constant 0.000000e+00 : f32
    %598 = vector.broadcast %cst_241 : f32 to vector<8x32xf32>
    %599 = arith.subf %598, %597 : vector<8x32xf32>
    %600 = math.exp %599 : vector<8x32xf32>
    %cst_242 = arith.constant 1.000000e+00 : f32
    %601 = vector.broadcast %cst_242 : f32 to vector<8x32xf32>
    %602 = arith.addf %601, %600 : vector<8x32xf32>
    %cst_243 = arith.constant 1.000000e+00 : f32
    %603 = vector.broadcast %cst_243 : f32 to vector<8x32xf32>
    %604 = arith.divf %603, %602 : vector<8x32xf32>
    %605 = arith.mulf %594, %527 : vector<8x32xf32>
    %606 = arith.mulf %586, %596 : vector<8x32xf32>
    %607 = arith.addf %605, %606 : vector<8x32xf32>
    %608 = math.tanh %607 : vector<8x32xf32>
    %609 = arith.mulf %604, %608 : vector<8x32xf32>
    %610 = arith.truncf %609 : vector<8x32xf32> to vector<8x32xbf16>
    %c7_244 = arith.constant 7 : index
    %c0_245 = arith.constant 0 : index
    %c0_246 = arith.constant 0 : index
    %611 = vector.load %arg5[%c7_244, %c0_245, %c0_246] : memref<8x8x64xbf16, #tpu.memory_space<vmem>>, vector<1x8x32xbf16>
    %612 = vector.shape_cast %611 : vector<1x8x32xbf16> to vector<8x32xbf16>
    %613 = vector.shape_cast %610 : vector<8x32xbf16> to vector<1x8x32xbf16>
    tpu.vector_store %arg5[%c7_244, %c0_245, %c0_246], %613 {strides = array<i32>} : memref<8x8x64xbf16, #tpu.memory_space<vmem>>, vector<1x8x32xbf16>,
    %c0_247 = arith.constant 0 : index
    %c0_248 = arith.constant 0 : index
    %c128_249 = arith.constant 128 : index
    %614 = vector.load %arg6[%c0_247, %c0_248, %c128_249] : memref<8x8x256xf32, #tpu.memory_space<vmem>>, vector<1x8x128xf32>
    %615 = vector.shape_cast %614 : vector<1x8x128xf32> to vector<8x128xf32>
    %616 = arith.truncf %569 : vector<8x32xf32> to vector<8x32xbf16>
    %cst_250 = arith.constant dense<0.000000e+00> : vector<8x128xf32>
    %617 = tpu.matmul %616, %12, %cst_250 {dimension_numbers = #tpu.dot_dimension_numbers<[1], [0], [0], [1], [0, 0, 1, 1], [], []>} : vector<8x32xbf16>, vector<32x128xbf16>, vector<8x128xf32> -> vector<8x128xf32>
    %618 = arith.addf %615, %617 : vector<8x128xf32>
    %619 = vector.extract_strided_slice %618 {offsets = [0, 0], sizes = [8, 32], strides = [1, 1]} : vector<8x128xf32> to vector<8x32xf32>
    %cst_251 = arith.constant 0.000000e+00 : f32
    %620 = vector.broadcast %cst_251 : f32 to vector<8x32xf32>
    %621 = arith.subf %620, %619 : vector<8x32xf32>
    %622 = math.exp %621 : vector<8x32xf32>
    %cst_252 = arith.constant 1.000000e+00 : f32
    %623 = vector.broadcast %cst_252 : f32 to vector<8x32xf32>
    %624 = arith.addf %623, %622 : vector<8x32xf32>
    %cst_253 = arith.constant 1.000000e+00 : f32
    %625 = vector.broadcast %cst_253 : f32 to vector<8x32xf32>
    %626 = arith.divf %625, %624 : vector<8x32xf32>
    %627 = vector.extract_strided_slice %618 {offsets = [0, 32], sizes = [8, 32], strides = [1, 1]} : vector<8x128xf32> to vector<8x32xf32>
    %cst_254 = arith.constant 0.000000e+00 : f32
    %628 = vector.broadcast %cst_254 : f32 to vector<8x32xf32>
    %629 = arith.subf %628, %627 : vector<8x32xf32>
    %630 = math.exp %629 : vector<8x32xf32>
    %cst_255 = arith.constant 1.000000e+00 : f32
    %631 = vector.broadcast %cst_255 : f32 to vector<8x32xf32>
    %632 = arith.addf %631, %630 : vector<8x32xf32>
    %cst_256 = arith.constant 1.000000e+00 : f32
    %633 = vector.broadcast %cst_256 : f32 to vector<8x32xf32>
    %634 = arith.divf %633, %632 : vector<8x32xf32>
    %635 = vector.extract_strided_slice %618 {offsets = [0, 64], sizes = [8, 32], strides = [1, 1]} : vector<8x128xf32> to vector<8x32xf32>
    %636 = math.tanh %635 : vector<8x32xf32>
    %637 = vector.extract_strided_slice %618 {offsets = [0, 96], sizes = [8, 32], strides = [1, 1]} : vector<8x128xf32> to vector<8x32xf32>
    %cst_257 = arith.constant 0.000000e+00 : f32
    %638 = vector.broadcast %cst_257 : f32 to vector<8x32xf32>
    %639 = arith.subf %638, %637 : vector<8x32xf32>
    %640 = math.exp %639 : vector<8x32xf32>
    %cst_258 = arith.constant 1.000000e+00 : f32
    %641 = vector.broadcast %cst_258 : f32 to vector<8x32xf32>
    %642 = arith.addf %641, %640 : vector<8x32xf32>
    %cst_259 = arith.constant 1.000000e+00 : f32
    %643 = vector.broadcast %cst_259 : f32 to vector<8x32xf32>
    %644 = arith.divf %643, %642 : vector<8x32xf32>
    %645 = arith.mulf %634, %567 : vector<8x32xf32>
    %646 = arith.mulf %626, %636 : vector<8x32xf32>
    %647 = arith.addf %645, %646 : vector<8x32xf32>
    %648 = math.tanh %647 : vector<8x32xf32>
    %649 = arith.mulf %644, %648 : vector<8x32xf32>
    %650 = arith.truncf %649 : vector<8x32xf32> to vector<8x32xbf16>
    %c0_260 = arith.constant 0 : index
    %c0_261 = arith.constant 0 : index
    %c32_262 = arith.constant 32 : index
    %651 = vector.load %arg5[%c0_260, %c0_261, %c32_262] : memref<8x8x64xbf16, #tpu.memory_space<vmem>>, vector<1x8x32xbf16>
    %652 = vector.shape_cast %651 : vector<1x8x32xbf16> to vector<8x32xbf16>
    %653 = vector.shape_cast %650 : vector<8x32xbf16> to vector<1x8x32xbf16>
    tpu.vector_store %arg5[%c0_260, %c0_261, %c32_262], %653 {strides = array<i32>} : memref<8x8x64xbf16, #tpu.memory_space<vmem>>, vector<1x8x32xbf16>,
    return
  }
  func.func @transform_0(%arg0: i32) -> (i32, i32, i32) {
    %c0_i32 = arith.constant 0 : i32
    %c0_i32_0 = arith.constant 0 : i32
    %c0_i32_1 = arith.constant 0 : i32
    return %c0_i32, %arg0, %c0_i32_0 : i32, i32, i32
  }
  func.func @transform_1(%arg0: i32) -> (i32, i32) {
    %c0_i32 = arith.constant 0 : i32
    %c0_i32_0 = arith.constant 0 : i32
    %c0_i32_1 = arith.constant 0 : i32
    return %c0_i32, %c0_i32_0 : i32, i32
  }
  func.func @transform_2(%arg0: i32) -> (i32, i32, i32) {
    %c0_i32 = arith.constant 0 : i32
    %c0_i32_0 = arith.constant 0 : i32
    %c0_i32_1 = arith.constant 0 : i32
    %c0_i32_2 = arith.constant 0 : i32
    return %c0_i32, %c0_i32_0, %c0_i32_1 : i32, i32, i32
  }
  func.func @transform_3(%arg0: i32) -> (i32, i32) {
    %c0_i32 = arith.constant 0 : i32
    %c0_i32_0 = arith.constant 0 : i32
    %c0_i32_1 = arith.constant 0 : i32
    return %c0_i32, %c0_i32_0 : i32, i32
  }
  func.func @transform_4(%arg0: i32) -> (i32, i32, i32) {
    %c0_i32 = arith.constant 0 : i32
    %c0_i32_0 = arith.constant 0 : i32
    %c0_i32_1 = arith.constant 0 : i32
    return %c0_i32, %arg0, %c0_i32_0 : i32, i32, i32
  }
}

module attributes {stable_mosaic.version = 11 : i64} {
  func.func @_lstm_layer_kernel(%arg0: i32, %arg1: memref<8x8x64xbf16, #tpu.memory_space<vmem>>, %arg2: memref<64x256xbf16, #tpu.memory_space<vmem>>, %arg3: memref<2x32x128xbf16, #tpu.memory_space<vmem>>, %arg4: memref<1x256xf32, #tpu.memory_space<vmem>>, %arg5: memref<8x8x64xbf16, #tpu.memory_space<vmem>>, %arg6: memref<8x8x256xf32, #tpu.memory_space<vmem>>) attributes {dimension_semantics = [#tpu.dimension_semantics<parallel>], iteration_bounds = array<i64: 1>, scalar_prefetch = 0 : i64, scratch_operands = 1 : i64, tpu.core_type = #tpu.core_type<tc>, window_params = [{transform_indices = @transform_0, window_bounds = array<i64: 8, 8, 64>}, {pipeline_mode = #tpu.pipeline_mode<synchronous>, transform_indices = @transform_1, window_bounds = array<i64: 64, 256>}, {pipeline_mode = #tpu.pipeline_mode<synchronous>, transform_indices = @transform_2, window_bounds = array<i64: 2, 32, 128>}, {pipeline_mode = #tpu.pipeline_mode<synchronous>, transform_indices = @transform_3, window_bounds = array<i64: 1, 256>}, {transform_indices = @transform_4, window_bounds = array<i64: 8, 8, 64>}]} {
    %c0 = arith.constant 0 : index
    %c0_0 = arith.constant 0 : index
    %c0_1 = arith.constant 0 : index
    %0 = vector.load %arg1[%c0, %c0_0, %c0_1] : memref<8x8x64xbf16, #tpu.memory_space<vmem>>, vector<8x8x64xbf16>
    %1 = vector.shape_cast %0 : vector<8x8x64xbf16> to vector<64x64xbf16>
    %c0_2 = arith.constant 0 : index
    %c0_3 = arith.constant 0 : index
    %2 = vector.load %arg2[%c0_2, %c0_3] : memref<64x256xbf16, #tpu.memory_space<vmem>>, vector<64x256xbf16>
    %cst = arith.constant dense<0.000000e+00> : vector<64x256xf32>
    %3 = tpu.matmul %1, %2, %cst {dimension_numbers = #tpu.dot_dimension_numbers<[1], [0], [0], [1], [0, 0, 1, 1], [], []>} : vector<64x64xbf16>, vector<64x256xbf16>, vector<64x256xf32> -> vector<64x256xf32>
    %c0_4 = arith.constant 0 : index
    %c0_5 = arith.constant 0 : index
    %4 = vector.load %arg4[%c0_4, %c0_5] : memref<1x256xf32, #tpu.memory_space<vmem>>, vector<1x256xf32>
    %5 = vector.broadcast %4 : vector<1x256xf32> to vector<64x256xf32>
    %6 = arith.addf %3, %5 : vector<64x256xf32>
    %7 = vector.shape_cast %6 : vector<64x256xf32> to vector<8x8x256xf32>
    %c0_6 = arith.constant 0 : index
    %c0_7 = arith.constant 0 : index
    %c0_8 = arith.constant 0 : index
    %8 = vector.load %arg6[%c0_6, %c0_7, %c0_8] : memref<8x8x256xf32, #tpu.memory_space<vmem>>, vector<8x8x256xf32>
    tpu.vector_store %arg6[%c0_6, %c0_7, %c0_8], %7 {strides = array<i32>} : memref<8x8x256xf32, #tpu.memory_space<vmem>>, vector<8x8x256xf32>,
    %c0_9 = arith.constant 0 : index
    %c0_10 = arith.constant 0 : index
    %c0_11 = arith.constant 0 : index
    %9 = vector.load %arg3[%c0_9, %c0_10, %c0_11] : memref<2x32x128xbf16, #tpu.memory_space<vmem>>, vector<1x32x128xbf16>
    %10 = vector.shape_cast %9 : vector<1x32x128xbf16> to vector<32x128xbf16>
    %c1 = arith.constant 1 : index
    %c0_12 = arith.constant 0 : index
    %c0_13 = arith.constant 0 : index
    %11 = vector.load %arg3[%c1, %c0_12, %c0_13] : memref<2x32x128xbf16, #tpu.memory_space<vmem>>, vector<1x32x128xbf16>
    %12 = vector.shape_cast %11 : vector<1x32x128xbf16> to vector<32x128xbf16>
    %cst_14 = arith.constant 0.000000e+00 : f32
    %13 = vector.broadcast %cst_14 : f32 to vector<8x32xf32>
    %c0_15 = arith.constant 0 : index
    %c0_16 = arith.constant 0 : index
    %c0_17 = arith.constant 0 : index
    %14 = vector.load %arg6[%c0_15, %c0_16, %c0_17] : memref<8x8x256xf32, #tpu.memory_space<vmem>>, vector<1x8x128xf32>
    %15 = vector.shape_cast %14 : vector<1x8x128xf32> to vector<8x128xf32>
    %16 = arith.truncf %13 : vector<8x32xf32> to vector<8x32xbf16>
    %cst_18 = arith.constant dense<0.000000e+00> : vector<8x128xf32>
    %17 = tpu.matmul %16, %10, %cst_18 {dimension_numbers = #tpu.dot_dimension_numbers<[1], [0], [0], [1], [0, 0, 1, 1], [], []>} : vector<8x32xbf16>, vector<32x128xbf16>, vector<8x128xf32> -> vector<8x128xf32>
    %18 = arith.addf %15, %17 : vector<8x128xf32>
    %19 = vector.extract_strided_slice %18 {offsets = [0, 0], sizes = [8, 32], strides = [1, 1]} : vector<8x128xf32> to vector<8x32xf32>
    %cst_19 = arith.constant 0.000000e+00 : f32
    %20 = vector.broadcast %cst_19 : f32 to vector<8x32xf32>
    %21 = arith.subf %20, %19 : vector<8x32xf32>
    %22 = math.exp %21 : vector<8x32xf32>
    %cst_20 = arith.constant 1.000000e+00 : f32
    %23 = vector.broadcast %cst_20 : f32 to vector<8x32xf32>
    %24 = arith.addf %23, %22 : vector<8x32xf32>
    %cst_21 = arith.constant 1.000000e+00 : f32
    %25 = vector.broadcast %cst_21 : f32 to vector<8x32xf32>
    %26 = arith.divf %25, %24 : vector<8x32xf32>
    %27 = vector.extract_strided_slice %18 {offsets = [0, 32], sizes = [8, 32], strides = [1, 1]} : vector<8x128xf32> to vector<8x32xf32>
    %cst_22 = arith.constant 0.000000e+00 : f32
    %28 = vector.broadcast %cst_22 : f32 to vector<8x32xf32>
    %29 = arith.subf %28, %27 : vector<8x32xf32>
    %30 = math.exp %29 : vector<8x32xf32>
    %cst_23 = arith.constant 1.000000e+00 : f32
    %31 = vector.broadcast %cst_23 : f32 to vector<8x32xf32>
    %32 = arith.addf %31, %30 : vector<8x32xf32>
    %cst_24 = arith.constant 1.000000e+00 : f32
    %33 = vector.broadcast %cst_24 : f32 to vector<8x32xf32>
    %34 = arith.divf %33, %32 : vector<8x32xf32>
    %35 = vector.extract_strided_slice %18 {offsets = [0, 64], sizes = [8, 32], strides = [1, 1]} : vector<8x128xf32> to vector<8x32xf32>
    %36 = math.tanh %35 : vector<8x32xf32>
    %37 = vector.extract_strided_slice %18 {offsets = [0, 96], sizes = [8, 32], strides = [1, 1]} : vector<8x128xf32> to vector<8x32xf32>
    %cst_25 = arith.constant 0.000000e+00 : f32
    %38 = vector.broadcast %cst_25 : f32 to vector<8x32xf32>
    %39 = arith.subf %38, %37 : vector<8x32xf32>
    %40 = math.exp %39 : vector<8x32xf32>
    %cst_26 = arith.constant 1.000000e+00 : f32
    %41 = vector.broadcast %cst_26 : f32 to vector<8x32xf32>
    %42 = arith.addf %41, %40 : vector<8x32xf32>
    %cst_27 = arith.constant 1.000000e+00 : f32
    %43 = vector.broadcast %cst_27 : f32 to vector<8x32xf32>
    %44 = arith.divf %43, %42 : vector<8x32xf32>
    %45 = arith.mulf %34, %13 : vector<8x32xf32>
    %46 = arith.mulf %26, %36 : vector<8x32xf32>
    %47 = arith.addf %45, %46 : vector<8x32xf32>
    %48 = math.tanh %47 : vector<8x32xf32>
    %49 = arith.mulf %44, %48 : vector<8x32xf32>
    %50 = arith.truncf %49 : vector<8x32xf32> to vector<8x32xbf16>
    %c0_28 = arith.constant 0 : index
    %c0_29 = arith.constant 0 : index
    %c0_30 = arith.constant 0 : index
    %51 = vector.load %arg5[%c0_28, %c0_29, %c0_30] : memref<8x8x64xbf16, #tpu.memory_space<vmem>>, vector<1x8x32xbf16>
    %52 = vector.shape_cast %51 : vector<1x8x32xbf16> to vector<8x32xbf16>
    %53 = vector.shape_cast %50 : vector<8x32xbf16> to vector<1x8x32xbf16>
    tpu.vector_store %arg5[%c0_28, %c0_29, %c0_30], %53 {strides = array<i32>} : memref<8x8x64xbf16, #tpu.memory_space<vmem>>, vector<1x8x32xbf16>,
    %c7 = arith.constant 7 : index
    %c0_31 = arith.constant 0 : index
    %c128 = arith.constant 128 : index
    %54 = vector.load %arg6[%c7, %c0_31, %c128] : memref<8x8x256xf32, #tpu.memory_space<vmem>>, vector<1x8x128xf32>
    %55 = vector.shape_cast %54 : vector<1x8x128xf32> to vector<8x128xf32>
    %56 = arith.truncf %13 : vector<8x32xf32> to vector<8x32xbf16>
    %cst_32 = arith.constant dense<0.000000e+00> : vector<8x128xf32>
    %57 = tpu.matmul %56, %12, %cst_32 {dimension_numbers = #tpu.dot_dimension_numbers<[1], [0], [0], [1], [0, 0, 1, 1], [], []>} : vector<8x32xbf16>, vector<32x128xbf16>, vector<8x128xf32> -> vector<8x128xf32>
    %58 = arith.addf %55, %57 : vector<8x128xf32>
    %59 = vector.extract_strided_slice %58 {offsets = [0, 0], sizes = [8, 32], strides = [1, 1]} : vector<8x128xf32> to vector<8x32xf32>
    %cst_33 = arith.constant 0.000000e+00 : f32
    %60 = vector.broadcast %cst_33 : f32 to vector<8x32xf32>
    %61 = arith.subf %60, %59 : vector<8x32xf32>
    %62 = math.exp %61 : vector<8x32xf32>
    %cst_34 = arith.constant 1.000000e+00 : f32
    %63 = vector.broadcast %cst_34 : f32 to vector<8x32xf32>
    %64 = arith.addf %63, %62 : vector<8x32xf32>
    %cst_35 = arith.constant 1.000000e+00 : f32
    %65 = vector.broadcast %cst_35 : f32 to vector<8x32xf32>
    %66 = arith.divf %65, %64 : vector<8x32xf32>
    %67 = vector.extract_strided_slice %58 {offsets = [0, 32], sizes = [8, 32], strides = [1, 1]} : vector<8x128xf32> to vector<8x32xf32>
    %cst_36 = arith.constant 0.000000e+00 : f32
    %68 = vector.broadcast %cst_36 : f32 to vector<8x32xf32>
    %69 = arith.subf %68, %67 : vector<8x32xf32>
    %70 = math.exp %69 : vector<8x32xf32>
    %cst_37 = arith.constant 1.000000e+00 : f32
    %71 = vector.broadcast %cst_37 : f32 to vector<8x32xf32>
    %72 = arith.addf %71, %70 : vector<8x32xf32>
    %cst_38 = arith.constant 1.000000e+00 : f32
    %73 = vector.broadcast %cst_38 : f32 to vector<8x32xf32>
    %74 = arith.divf %73, %72 : vector<8x32xf32>
    %75 = vector.extract_strided_slice %58 {offsets = [0, 64], sizes = [8, 32], strides = [1, 1]} : vector<8x128xf32> to vector<8x32xf32>
    %76 = math.tanh %75 : vector<8x32xf32>
    %77 = vector.extract_strided_slice %58 {offsets = [0, 96], sizes = [8, 32], strides = [1, 1]} : vector<8x128xf32> to vector<8x32xf32>
    %cst_39 = arith.constant 0.000000e+00 : f32
    %78 = vector.broadcast %cst_39 : f32 to vector<8x32xf32>
    %79 = arith.subf %78, %77 : vector<8x32xf32>
    %80 = math.exp %79 : vector<8x32xf32>
    %cst_40 = arith.constant 1.000000e+00 : f32
    %81 = vector.broadcast %cst_40 : f32 to vector<8x32xf32>
    %82 = arith.addf %81, %80 : vector<8x32xf32>
    %cst_41 = arith.constant 1.000000e+00 : f32
    %83 = vector.broadcast %cst_41 : f32 to vector<8x32xf32>
    %84 = arith.divf %83, %82 : vector<8x32xf32>
    %85 = arith.mulf %74, %13 : vector<8x32xf32>
    %86 = arith.mulf %66, %76 : vector<8x32xf32>
    %87 = arith.addf %85, %86 : vector<8x32xf32>
    %88 = math.tanh %87 : vector<8x32xf32>
    %89 = arith.mulf %84, %88 : vector<8x32xf32>
    %90 = arith.truncf %89 : vector<8x32xf32> to vector<8x32xbf16>
    %c7_42 = arith.constant 7 : index
    %c0_43 = arith.constant 0 : index
    %c32 = arith.constant 32 : index
    %91 = vector.load %arg5[%c7_42, %c0_43, %c32] : memref<8x8x64xbf16, #tpu.memory_space<vmem>>, vector<1x8x32xbf16>
    %92 = vector.shape_cast %91 : vector<1x8x32xbf16> to vector<8x32xbf16>
    %93 = vector.shape_cast %90 : vector<8x32xbf16> to vector<1x8x32xbf16>
    tpu.vector_store %arg5[%c7_42, %c0_43, %c32], %93 {strides = array<i32>} : memref<8x8x64xbf16, #tpu.memory_space<vmem>>, vector<1x8x32xbf16>,
    %c1_44 = arith.constant 1 : index
    %c0_45 = arith.constant 0 : index
    %c0_46 = arith.constant 0 : index
    %94 = vector.load %arg6[%c1_44, %c0_45, %c0_46] : memref<8x8x256xf32, #tpu.memory_space<vmem>>, vector<1x8x128xf32>
    %95 = vector.shape_cast %94 : vector<1x8x128xf32> to vector<8x128xf32>
    %96 = arith.truncf %49 : vector<8x32xf32> to vector<8x32xbf16>
    %cst_47 = arith.constant dense<0.000000e+00> : vector<8x128xf32>
    %97 = tpu.matmul %96, %10, %cst_47 {dimension_numbers = #tpu.dot_dimension_numbers<[1], [0], [0], [1], [0, 0, 1, 1], [], []>} : vector<8x32xbf16>, vector<32x128xbf16>, vector<8x128xf32> -> vector<8x128xf32>
    %98 = arith.addf %95, %97 : vector<8x128xf32>
    %99 = vector.extract_strided_slice %98 {offsets = [0, 0], sizes = [8, 32], strides = [1, 1]} : vector<8x128xf32> to vector<8x32xf32>
    %cst_48 = arith.constant 0.000000e+00 : f32
    %100 = vector.broadcast %cst_48 : f32 to vector<8x32xf32>
    %101 = arith.subf %100, %99 : vector<8x32xf32>
    %102 = math.exp %101 : vector<8x32xf32>
    %cst_49 = arith.constant 1.000000e+00 : f32
    %103 = vector.broadcast %cst_49 : f32 to vector<8x32xf32>
    %104 = arith.addf %103, %102 : vector<8x32xf32>
    %cst_50 = arith.constant 1.000000e+00 : f32
    %105 = vector.broadcast %cst_50 : f32 to vector<8x32xf32>
    %106 = arith.divf %105, %104 : vector<8x32xf32>
    %107 = vector.extract_strided_slice %98 {offsets = [0, 32], sizes = [8, 32], strides = [1, 1]} : vector<8x128xf32> to vector<8x32xf32>
    %cst_51 = arith.constant 0.000000e+00 : f32
    %108 = vector.broadcast %cst_51 : f32 to vector<8x32xf32>
    %109 = arith.subf %108, %107 : vector<8x32xf32>
    %110 = math.exp %109 : vector<8x32xf32>
    %cst_52 = arith.constant 1.000000e+00 : f32
    %111 = vector.broadcast %cst_52 : f32 to vector<8x32xf32>
    %112 = arith.addf %111, %110 : vector<8x32xf32>
    %cst_53 = arith.constant 1.000000e+00 : f32
    %113 = vector.broadcast %cst_53 : f32 to vector<8x32xf32>
    %114 = arith.divf %113, %112 : vector<8x32xf32>
    %115 = vector.extract_strided_slice %98 {offsets = [0, 64], sizes = [8, 32], strides = [1, 1]} : vector<8x128xf32> to vector<8x32xf32>
    %116 = math.tanh %115 : vector<8x32xf32>
    %117 = vector.extract_strided_slice %98 {offsets = [0, 96], sizes = [8, 32], strides = [1, 1]} : vector<8x128xf32> to vector<8x32xf32>
    %cst_54 = arith.constant 0.000000e+00 : f32
    %118 = vector.broadcast %cst_54 : f32 to vector<8x32xf32>
    %119 = arith.subf %118, %117 : vector<8x32xf32>
    %120 = math.exp %119 : vector<8x32xf32>
    %cst_55 = arith.constant 1.000000e+00 : f32
    %121 = vector.broadcast %cst_55 : f32 to vector<8x32xf32>
    %122 = arith.addf %121, %120 : vector<8x32xf32>
    %cst_56 = arith.constant 1.000000e+00 : f32
    %123 = vector.broadcast %cst_56 : f32 to vector<8x32xf32>
    %124 = arith.divf %123, %122 : vector<8x32xf32>
    %125 = arith.mulf %114, %47 : vector<8x32xf32>
    %126 = arith.mulf %106, %116 : vector<8x32xf32>
    %127 = arith.addf %125, %126 : vector<8x32xf32>
    %128 = math.tanh %127 : vector<8x32xf32>
    %129 = arith.mulf %124, %128 : vector<8x32xf32>
    %130 = arith.truncf %129 : vector<8x32xf32> to vector<8x32xbf16>
    %c1_57 = arith.constant 1 : index
    %c0_58 = arith.constant 0 : index
    %c0_59 = arith.constant 0 : index
    %131 = vector.load %arg5[%c1_57, %c0_58, %c0_59] : memref<8x8x64xbf16, #tpu.memory_space<vmem>>, vector<1x8x32xbf16>
    %132 = vector.shape_cast %131 : vector<1x8x32xbf16> to vector<8x32xbf16>
    %133 = vector.shape_cast %130 : vector<8x32xbf16> to vector<1x8x32xbf16>
    tpu.vector_store %arg5[%c1_57, %c0_58, %c0_59], %133 {strides = array<i32>} : memref<8x8x64xbf16, #tpu.memory_space<vmem>>, vector<1x8x32xbf16>,
    %c6 = arith.constant 6 : index
    %c0_60 = arith.constant 0 : index
    %c128_61 = arith.constant 128 : index
    %134 = vector.load %arg6[%c6, %c0_60, %c128_61] : memref<8x8x256xf32, #tpu.memory_space<vmem>>, vector<1x8x128xf32>
    %135 = vector.shape_cast %134 : vector<1x8x128xf32> to vector<8x128xf32>
    %136 = arith.truncf %89 : vector<8x32xf32> to vector<8x32xbf16>
    %cst_62 = arith.constant dense<0.000000e+00> : vector<8x128xf32>
    %137 = tpu.matmul %136, %12, %cst_62 {dimension_numbers = #tpu.dot_dimension_numbers<[1], [0], [0], [1], [0, 0, 1, 1], [], []>} : vector<8x32xbf16>, vector<32x128xbf16>, vector<8x128xf32> -> vector<8x128xf32>
    %138 = arith.addf %135, %137 : vector<8x128xf32>
    %139 = vector.extract_strided_slice %138 {offsets = [0, 0], sizes = [8, 32], strides = [1, 1]} : vector<8x128xf32> to vector<8x32xf32>
    %cst_63 = arith.constant 0.000000e+00 : f32
    %140 = vector.broadcast %cst_63 : f32 to vector<8x32xf32>
    %141 = arith.subf %140, %139 : vector<8x32xf32>
    %142 = math.exp %141 : vector<8x32xf32>
    %cst_64 = arith.constant 1.000000e+00 : f32
    %143 = vector.broadcast %cst_64 : f32 to vector<8x32xf32>
    %144 = arith.addf %143, %142 : vector<8x32xf32>
    %cst_65 = arith.constant 1.000000e+00 : f32
    %145 = vector.broadcast %cst_65 : f32 to vector<8x32xf32>
    %146 = arith.divf %145, %144 : vector<8x32xf32>
    %147 = vector.extract_strided_slice %138 {offsets = [0, 32], sizes = [8, 32], strides = [1, 1]} : vector<8x128xf32> to vector<8x32xf32>
    %cst_66 = arith.constant 0.000000e+00 : f32
    %148 = vector.broadcast %cst_66 : f32 to vector<8x32xf32>
    %149 = arith.subf %148, %147 : vector<8x32xf32>
    %150 = math.exp %149 : vector<8x32xf32>
    %cst_67 = arith.constant 1.000000e+00 : f32
    %151 = vector.broadcast %cst_67 : f32 to vector<8x32xf32>
    %152 = arith.addf %151, %150 : vector<8x32xf32>
    %cst_68 = arith.constant 1.000000e+00 : f32
    %153 = vector.broadcast %cst_68 : f32 to vector<8x32xf32>
    %154 = arith.divf %153, %152 : vector<8x32xf32>
    %155 = vector.extract_strided_slice %138 {offsets = [0, 64], sizes = [8, 32], strides = [1, 1]} : vector<8x128xf32> to vector<8x32xf32>
    %156 = math.tanh %155 : vector<8x32xf32>
    %157 = vector.extract_strided_slice %138 {offsets = [0, 96], sizes = [8, 32], strides = [1, 1]} : vector<8x128xf32> to vector<8x32xf32>
    %cst_69 = arith.constant 0.000000e+00 : f32
    %158 = vector.broadcast %cst_69 : f32 to vector<8x32xf32>
    %159 = arith.subf %158, %157 : vector<8x32xf32>
    %160 = math.exp %159 : vector<8x32xf32>
    %cst_70 = arith.constant 1.000000e+00 : f32
    %161 = vector.broadcast %cst_70 : f32 to vector<8x32xf32>
    %162 = arith.addf %161, %160 : vector<8x32xf32>
    %cst_71 = arith.constant 1.000000e+00 : f32
    %163 = vector.broadcast %cst_71 : f32 to vector<8x32xf32>
    %164 = arith.divf %163, %162 : vector<8x32xf32>
    %165 = arith.mulf %154, %87 : vector<8x32xf32>
    %166 = arith.mulf %146, %156 : vector<8x32xf32>
    %167 = arith.addf %165, %166 : vector<8x32xf32>
    %168 = math.tanh %167 : vector<8x32xf32>
    %169 = arith.mulf %164, %168 : vector<8x32xf32>
    %170 = arith.truncf %169 : vector<8x32xf32> to vector<8x32xbf16>
    %c6_72 = arith.constant 6 : index
    %c0_73 = arith.constant 0 : index
    %c32_74 = arith.constant 32 : index
    %171 = vector.load %arg5[%c6_72, %c0_73, %c32_74] : memref<8x8x64xbf16, #tpu.memory_space<vmem>>, vector<1x8x32xbf16>
    %172 = vector.shape_cast %171 : vector<1x8x32xbf16> to vector<8x32xbf16>
    %173 = vector.shape_cast %170 : vector<8x32xbf16> to vector<1x8x32xbf16>
    tpu.vector_store %arg5[%c6_72, %c0_73, %c32_74], %173 {strides = array<i32>} : memref<8x8x64xbf16, #tpu.memory_space<vmem>>, vector<1x8x32xbf16>,
    %c2 = arith.constant 2 : index
    %c0_75 = arith.constant 0 : index
    %c0_76 = arith.constant 0 : index
    %174 = vector.load %arg6[%c2, %c0_75, %c0_76] : memref<8x8x256xf32, #tpu.memory_space<vmem>>, vector<1x8x128xf32>
    %175 = vector.shape_cast %174 : vector<1x8x128xf32> to vector<8x128xf32>
    %176 = arith.truncf %129 : vector<8x32xf32> to vector<8x32xbf16>
    %cst_77 = arith.constant dense<0.000000e+00> : vector<8x128xf32>
    %177 = tpu.matmul %176, %10, %cst_77 {dimension_numbers = #tpu.dot_dimension_numbers<[1], [0], [0], [1], [0, 0, 1, 1], [], []>} : vector<8x32xbf16>, vector<32x128xbf16>, vector<8x128xf32> -> vector<8x128xf32>
    %178 = arith.addf %175, %177 : vector<8x128xf32>
    %179 = vector.extract_strided_slice %178 {offsets = [0, 0], sizes = [8, 32], strides = [1, 1]} : vector<8x128xf32> to vector<8x32xf32>
    %cst_78 = arith.constant 0.000000e+00 : f32
    %180 = vector.broadcast %cst_78 : f32 to vector<8x32xf32>
    %181 = arith.subf %180, %179 : vector<8x32xf32>
    %182 = math.exp %181 : vector<8x32xf32>
    %cst_79 = arith.constant 1.000000e+00 : f32
    %183 = vector.broadcast %cst_79 : f32 to vector<8x32xf32>
    %184 = arith.addf %183, %182 : vector<8x32xf32>
    %cst_80 = arith.constant 1.000000e+00 : f32
    %185 = vector.broadcast %cst_80 : f32 to vector<8x32xf32>
    %186 = arith.divf %185, %184 : vector<8x32xf32>
    %187 = vector.extract_strided_slice %178 {offsets = [0, 32], sizes = [8, 32], strides = [1, 1]} : vector<8x128xf32> to vector<8x32xf32>
    %cst_81 = arith.constant 0.000000e+00 : f32
    %188 = vector.broadcast %cst_81 : f32 to vector<8x32xf32>
    %189 = arith.subf %188, %187 : vector<8x32xf32>
    %190 = math.exp %189 : vector<8x32xf32>
    %cst_82 = arith.constant 1.000000e+00 : f32
    %191 = vector.broadcast %cst_82 : f32 to vector<8x32xf32>
    %192 = arith.addf %191, %190 : vector<8x32xf32>
    %cst_83 = arith.constant 1.000000e+00 : f32
    %193 = vector.broadcast %cst_83 : f32 to vector<8x32xf32>
    %194 = arith.divf %193, %192 : vector<8x32xf32>
    %195 = vector.extract_strided_slice %178 {offsets = [0, 64], sizes = [8, 32], strides = [1, 1]} : vector<8x128xf32> to vector<8x32xf32>
    %196 = math.tanh %195 : vector<8x32xf32>
    %197 = vector.extract_strided_slice %178 {offsets = [0, 96], sizes = [8, 32], strides = [1, 1]} : vector<8x128xf32> to vector<8x32xf32>
    %cst_84 = arith.constant 0.000000e+00 : f32
    %198 = vector.broadcast %cst_84 : f32 to vector<8x32xf32>
    %199 = arith.subf %198, %197 : vector<8x32xf32>
    %200 = math.exp %199 : vector<8x32xf32>
    %cst_85 = arith.constant 1.000000e+00 : f32
    %201 = vector.broadcast %cst_85 : f32 to vector<8x32xf32>
    %202 = arith.addf %201, %200 : vector<8x32xf32>
    %cst_86 = arith.constant 1.000000e+00 : f32
    %203 = vector.broadcast %cst_86 : f32 to vector<8x32xf32>
    %204 = arith.divf %203, %202 : vector<8x32xf32>
    %205 = arith.mulf %194, %127 : vector<8x32xf32>
    %206 = arith.mulf %186, %196 : vector<8x32xf32>
    %207 = arith.addf %205, %206 : vector<8x32xf32>
    %208 = math.tanh %207 : vector<8x32xf32>
    %209 = arith.mulf %204, %208 : vector<8x32xf32>
    %210 = arith.truncf %209 : vector<8x32xf32> to vector<8x32xbf16>
    %c2_87 = arith.constant 2 : index
    %c0_88 = arith.constant 0 : index
    %c0_89 = arith.constant 0 : index
    %211 = vector.load %arg5[%c2_87, %c0_88, %c0_89] : memref<8x8x64xbf16, #tpu.memory_space<vmem>>, vector<1x8x32xbf16>
    %212 = vector.shape_cast %211 : vector<1x8x32xbf16> to vector<8x32xbf16>
    %213 = vector.shape_cast %210 : vector<8x32xbf16> to vector<1x8x32xbf16>
    tpu.vector_store %arg5[%c2_87, %c0_88, %c0_89], %213 {strides = array<i32>} : memref<8x8x64xbf16, #tpu.memory_space<vmem>>, vector<1x8x32xbf16>,
    %c5 = arith.constant 5 : index
    %c0_90 = arith.constant 0 : index
    %c128_91 = arith.constant 128 : index
    %214 = vector.load %arg6[%c5, %c0_90, %c128_91] : memref<8x8x256xf32, #tpu.memory_space<vmem>>, vector<1x8x128xf32>
    %215 = vector.shape_cast %214 : vector<1x8x128xf32> to vector<8x128xf32>
    %216 = arith.truncf %169 : vector<8x32xf32> to vector<8x32xbf16>
    %cst_92 = arith.constant dense<0.000000e+00> : vector<8x128xf32>
    %217 = tpu.matmul %216, %12, %cst_92 {dimension_numbers = #tpu.dot_dimension_numbers<[1], [0], [0], [1], [0, 0, 1, 1], [], []>} : vector<8x32xbf16>, vector<32x128xbf16>, vector<8x128xf32> -> vector<8x128xf32>
    %218 = arith.addf %215, %217 : vector<8x128xf32>
    %219 = vector.extract_strided_slice %218 {offsets = [0, 0], sizes = [8, 32], strides = [1, 1]} : vector<8x128xf32> to vector<8x32xf32>
    %cst_93 = arith.constant 0.000000e+00 : f32
    %220 = vector.broadcast %cst_93 : f32 to vector<8x32xf32>
    %221 = arith.subf %220, %219 : vector<8x32xf32>
    %222 = math.exp %221 : vector<8x32xf32>
    %cst_94 = arith.constant 1.000000e+00 : f32
    %223 = vector.broadcast %cst_94 : f32 to vector<8x32xf32>
    %224 = arith.addf %223, %222 : vector<8x32xf32>
    %cst_95 = arith.constant 1.000000e+00 : f32
    %225 = vector.broadcast %cst_95 : f32 to vector<8x32xf32>
    %226 = arith.divf %225, %224 : vector<8x32xf32>
    %227 = vector.extract_strided_slice %218 {offsets = [0, 32], sizes = [8, 32], strides = [1, 1]} : vector<8x128xf32> to vector<8x32xf32>
    %cst_96 = arith.constant 0.000000e+00 : f32
    %228 = vector.broadcast %cst_96 : f32 to vector<8x32xf32>
    %229 = arith.subf %228, %227 : vector<8x32xf32>
    %230 = math.exp %229 : vector<8x32xf32>
    %cst_97 = arith.constant 1.000000e+00 : f32
    %231 = vector.broadcast %cst_97 : f32 to vector<8x32xf32>
    %232 = arith.addf %231, %230 : vector<8x32xf32>
    %cst_98 = arith.constant 1.000000e+00 : f32
    %233 = vector.broadcast %cst_98 : f32 to vector<8x32xf32>
    %234 = arith.divf %233, %232 : vector<8x32xf32>
    %235 = vector.extract_strided_slice %218 {offsets = [0, 64], sizes = [8, 32], strides = [1, 1]} : vector<8x128xf32> to vector<8x32xf32>
    %236 = math.tanh %235 : vector<8x32xf32>
    %237 = vector.extract_strided_slice %218 {offsets = [0, 96], sizes = [8, 32], strides = [1, 1]} : vector<8x128xf32> to vector<8x32xf32>
    %cst_99 = arith.constant 0.000000e+00 : f32
    %238 = vector.broadcast %cst_99 : f32 to vector<8x32xf32>
    %239 = arith.subf %238, %237 : vector<8x32xf32>
    %240 = math.exp %239 : vector<8x32xf32>
    %cst_100 = arith.constant 1.000000e+00 : f32
    %241 = vector.broadcast %cst_100 : f32 to vector<8x32xf32>
    %242 = arith.addf %241, %240 : vector<8x32xf32>
    %cst_101 = arith.constant 1.000000e+00 : f32
    %243 = vector.broadcast %cst_101 : f32 to vector<8x32xf32>
    %244 = arith.divf %243, %242 : vector<8x32xf32>
    %245 = arith.mulf %234, %167 : vector<8x32xf32>
    %246 = arith.mulf %226, %236 : vector<8x32xf32>
    %247 = arith.addf %245, %246 : vector<8x32xf32>
    %248 = math.tanh %247 : vector<8x32xf32>
    %249 = arith.mulf %244, %248 : vector<8x32xf32>
    %250 = arith.truncf %249 : vector<8x32xf32> to vector<8x32xbf16>
    %c5_102 = arith.constant 5 : index
    %c0_103 = arith.constant 0 : index
    %c32_104 = arith.constant 32 : index
    %251 = vector.load %arg5[%c5_102, %c0_103, %c32_104] : memref<8x8x64xbf16, #tpu.memory_space<vmem>>, vector<1x8x32xbf16>
    %252 = vector.shape_cast %251 : vector<1x8x32xbf16> to vector<8x32xbf16>
    %253 = vector.shape_cast %250 : vector<8x32xbf16> to vector<1x8x32xbf16>
    tpu.vector_store %arg5[%c5_102, %c0_103, %c32_104], %253 {strides = array<i32>} : memref<8x8x64xbf16, #tpu.memory_space<vmem>>, vector<1x8x32xbf16>,
    %c3 = arith.constant 3 : index
    %c0_105 = arith.constant 0 : index
    %c0_106 = arith.constant 0 : index
    %254 = vector.load %arg6[%c3, %c0_105, %c0_106] : memref<8x8x256xf32, #tpu.memory_space<vmem>>, vector<1x8x128xf32>
    %255 = vector.shape_cast %254 : vector<1x8x128xf32> to vector<8x128xf32>
    %256 = arith.truncf %209 : vector<8x32xf32> to vector<8x32xbf16>
    %cst_107 = arith.constant dense<0.000000e+00> : vector<8x128xf32>
    %257 = tpu.matmul %256, %10, %cst_107 {dimension_numbers = #tpu.dot_dimension_numbers<[1], [0], [0], [1], [0, 0, 1, 1], [], []>} : vector<8x32xbf16>, vector<32x128xbf16>, vector<8x128xf32> -> vector<8x128xf32>
    %258 = arith.addf %255, %257 : vector<8x128xf32>
    %259 = vector.extract_strided_slice %258 {offsets = [0, 0], sizes = [8, 32], strides = [1, 1]} : vector<8x128xf32> to vector<8x32xf32>
    %cst_108 = arith.constant 0.000000e+00 : f32
    %260 = vector.broadcast %cst_108 : f32 to vector<8x32xf32>
    %261 = arith.subf %260, %259 : vector<8x32xf32>
    %262 = math.exp %261 : vector<8x32xf32>
    %cst_109 = arith.constant 1.000000e+00 : f32
    %263 = vector.broadcast %cst_109 : f32 to vector<8x32xf32>
    %264 = arith.addf %263, %262 : vector<8x32xf32>
    %cst_110 = arith.constant 1.000000e+00 : f32
    %265 = vector.broadcast %cst_110 : f32 to vector<8x32xf32>
    %266 = arith.divf %265, %264 : vector<8x32xf32>
    %267 = vector.extract_strided_slice %258 {offsets = [0, 32], sizes = [8, 32], strides = [1, 1]} : vector<8x128xf32> to vector<8x32xf32>
    %cst_111 = arith.constant 0.000000e+00 : f32
    %268 = vector.broadcast %cst_111 : f32 to vector<8x32xf32>
    %269 = arith.subf %268, %267 : vector<8x32xf32>
    %270 = math.exp %269 : vector<8x32xf32>
    %cst_112 = arith.constant 1.000000e+00 : f32
    %271 = vector.broadcast %cst_112 : f32 to vector<8x32xf32>
    %272 = arith.addf %271, %270 : vector<8x32xf32>
    %cst_113 = arith.constant 1.000000e+00 : f32
    %273 = vector.broadcast %cst_113 : f32 to vector<8x32xf32>
    %274 = arith.divf %273, %272 : vector<8x32xf32>
    %275 = vector.extract_strided_slice %258 {offsets = [0, 64], sizes = [8, 32], strides = [1, 1]} : vector<8x128xf32> to vector<8x32xf32>
    %276 = math.tanh %275 : vector<8x32xf32>
    %277 = vector.extract_strided_slice %258 {offsets = [0, 96], sizes = [8, 32], strides = [1, 1]} : vector<8x128xf32> to vector<8x32xf32>
    %cst_114 = arith.constant 0.000000e+00 : f32
    %278 = vector.broadcast %cst_114 : f32 to vector<8x32xf32>
    %279 = arith.subf %278, %277 : vector<8x32xf32>
    %280 = math.exp %279 : vector<8x32xf32>
    %cst_115 = arith.constant 1.000000e+00 : f32
    %281 = vector.broadcast %cst_115 : f32 to vector<8x32xf32>
    %282 = arith.addf %281, %280 : vector<8x32xf32>
    %cst_116 = arith.constant 1.000000e+00 : f32
    %283 = vector.broadcast %cst_116 : f32 to vector<8x32xf32>
    %284 = arith.divf %283, %282 : vector<8x32xf32>
    %285 = arith.mulf %274, %207 : vector<8x32xf32>
    %286 = arith.mulf %266, %276 : vector<8x32xf32>
    %287 = arith.addf %285, %286 : vector<8x32xf32>
    %288 = math.tanh %287 : vector<8x32xf32>
    %289 = arith.mulf %284, %288 : vector<8x32xf32>
    %290 = arith.truncf %289 : vector<8x32xf32> to vector<8x32xbf16>
    %c3_117 = arith.constant 3 : index
    %c0_118 = arith.constant 0 : index
    %c0_119 = arith.constant 0 : index
    %291 = vector.load %arg5[%c3_117, %c0_118, %c0_119] : memref<8x8x64xbf16, #tpu.memory_space<vmem>>, vector<1x8x32xbf16>
    %292 = vector.shape_cast %291 : vector<1x8x32xbf16> to vector<8x32xbf16>
    %293 = vector.shape_cast %290 : vector<8x32xbf16> to vector<1x8x32xbf16>
    tpu.vector_store %arg5[%c3_117, %c0_118, %c0_119], %293 {strides = array<i32>} : memref<8x8x64xbf16, #tpu.memory_space<vmem>>, vector<1x8x32xbf16>,
    %c4 = arith.constant 4 : index
    %c0_120 = arith.constant 0 : index
    %c128_121 = arith.constant 128 : index
    %294 = vector.load %arg6[%c4, %c0_120, %c128_121] : memref<8x8x256xf32, #tpu.memory_space<vmem>>, vector<1x8x128xf32>
    %295 = vector.shape_cast %294 : vector<1x8x128xf32> to vector<8x128xf32>
    %296 = arith.truncf %249 : vector<8x32xf32> to vector<8x32xbf16>
    %cst_122 = arith.constant dense<0.000000e+00> : vector<8x128xf32>
    %297 = tpu.matmul %296, %12, %cst_122 {dimension_numbers = #tpu.dot_dimension_numbers<[1], [0], [0], [1], [0, 0, 1, 1], [], []>} : vector<8x32xbf16>, vector<32x128xbf16>, vector<8x128xf32> -> vector<8x128xf32>
    %298 = arith.addf %295, %297 : vector<8x128xf32>
    %299 = vector.extract_strided_slice %298 {offsets = [0, 0], sizes = [8, 32], strides = [1, 1]} : vector<8x128xf32> to vector<8x32xf32>
    %cst_123 = arith.constant 0.000000e+00 : f32
    %300 = vector.broadcast %cst_123 : f32 to vector<8x32xf32>
    %301 = arith.subf %300, %299 : vector<8x32xf32>
    %302 = math.exp %301 : vector<8x32xf32>
    %cst_124 = arith.constant 1.000000e+00 : f32
    %303 = vector.broadcast %cst_124 : f32 to vector<8x32xf32>
    %304 = arith.addf %303, %302 : vector<8x32xf32>
    %cst_125 = arith.constant 1.000000e+00 : f32
    %305 = vector.broadcast %cst_125 : f32 to vector<8x32xf32>
    %306 = arith.divf %305, %304 : vector<8x32xf32>
    %307 = vector.extract_strided_slice %298 {offsets = [0, 32], sizes = [8, 32], strides = [1, 1]} : vector<8x128xf32> to vector<8x32xf32>
    %cst_126 = arith.constant 0.000000e+00 : f32
    %308 = vector.broadcast %cst_126 : f32 to vector<8x32xf32>
    %309 = arith.subf %308, %307 : vector<8x32xf32>
    %310 = math.exp %309 : vector<8x32xf32>
    %cst_127 = arith.constant 1.000000e+00 : f32
    %311 = vector.broadcast %cst_127 : f32 to vector<8x32xf32>
    %312 = arith.addf %311, %310 : vector<8x32xf32>
    %cst_128 = arith.constant 1.000000e+00 : f32
    %313 = vector.broadcast %cst_128 : f32 to vector<8x32xf32>
    %314 = arith.divf %313, %312 : vector<8x32xf32>
    %315 = vector.extract_strided_slice %298 {offsets = [0, 64], sizes = [8, 32], strides = [1, 1]} : vector<8x128xf32> to vector<8x32xf32>
    %316 = math.tanh %315 : vector<8x32xf32>
    %317 = vector.extract_strided_slice %298 {offsets = [0, 96], sizes = [8, 32], strides = [1, 1]} : vector<8x128xf32> to vector<8x32xf32>
    %cst_129 = arith.constant 0.000000e+00 : f32
    %318 = vector.broadcast %cst_129 : f32 to vector<8x32xf32>
    %319 = arith.subf %318, %317 : vector<8x32xf32>
    %320 = math.exp %319 : vector<8x32xf32>
    %cst_130 = arith.constant 1.000000e+00 : f32
    %321 = vector.broadcast %cst_130 : f32 to vector<8x32xf32>
    %322 = arith.addf %321, %320 : vector<8x32xf32>
    %cst_131 = arith.constant 1.000000e+00 : f32
    %323 = vector.broadcast %cst_131 : f32 to vector<8x32xf32>
    %324 = arith.divf %323, %322 : vector<8x32xf32>
    %325 = arith.mulf %314, %247 : vector<8x32xf32>
    %326 = arith.mulf %306, %316 : vector<8x32xf32>
    %327 = arith.addf %325, %326 : vector<8x32xf32>
    %328 = math.tanh %327 : vector<8x32xf32>
    %329 = arith.mulf %324, %328 : vector<8x32xf32>
    %330 = arith.truncf %329 : vector<8x32xf32> to vector<8x32xbf16>
    %c4_132 = arith.constant 4 : index
    %c0_133 = arith.constant 0 : index
    %c32_134 = arith.constant 32 : index
    %331 = vector.load %arg5[%c4_132, %c0_133, %c32_134] : memref<8x8x64xbf16, #tpu.memory_space<vmem>>, vector<1x8x32xbf16>
    %332 = vector.shape_cast %331 : vector<1x8x32xbf16> to vector<8x32xbf16>
    %333 = vector.shape_cast %330 : vector<8x32xbf16> to vector<1x8x32xbf16>
    tpu.vector_store %arg5[%c4_132, %c0_133, %c32_134], %333 {strides = array<i32>} : memref<8x8x64xbf16, #tpu.memory_space<vmem>>, vector<1x8x32xbf16>,
    %c4_135 = arith.constant 4 : index
    %c0_136 = arith.constant 0 : index
    %c0_137 = arith.constant 0 : index
    %334 = vector.load %arg6[%c4_135, %c0_136, %c0_137] : memref<8x8x256xf32, #tpu.memory_space<vmem>>, vector<1x8x128xf32>
    %335 = vector.shape_cast %334 : vector<1x8x128xf32> to vector<8x128xf32>
    %336 = arith.truncf %289 : vector<8x32xf32> to vector<8x32xbf16>
    %cst_138 = arith.constant dense<0.000000e+00> : vector<8x128xf32>
    %337 = tpu.matmul %336, %10, %cst_138 {dimension_numbers = #tpu.dot_dimension_numbers<[1], [0], [0], [1], [0, 0, 1, 1], [], []>} : vector<8x32xbf16>, vector<32x128xbf16>, vector<8x128xf32> -> vector<8x128xf32>
    %338 = arith.addf %335, %337 : vector<8x128xf32>
    %339 = vector.extract_strided_slice %338 {offsets = [0, 0], sizes = [8, 32], strides = [1, 1]} : vector<8x128xf32> to vector<8x32xf32>
    %cst_139 = arith.constant 0.000000e+00 : f32
    %340 = vector.broadcast %cst_139 : f32 to vector<8x32xf32>
    %341 = arith.subf %340, %339 : vector<8x32xf32>
    %342 = math.exp %341 : vector<8x32xf32>
    %cst_140 = arith.constant 1.000000e+00 : f32
    %343 = vector.broadcast %cst_140 : f32 to vector<8x32xf32>
    %344 = arith.addf %343, %342 : vector<8x32xf32>
    %cst_141 = arith.constant 1.000000e+00 : f32
    %345 = vector.broadcast %cst_141 : f32 to vector<8x32xf32>
    %346 = arith.divf %345, %344 : vector<8x32xf32>
    %347 = vector.extract_strided_slice %338 {offsets = [0, 32], sizes = [8, 32], strides = [1, 1]} : vector<8x128xf32> to vector<8x32xf32>
    %cst_142 = arith.constant 0.000000e+00 : f32
    %348 = vector.broadcast %cst_142 : f32 to vector<8x32xf32>
    %349 = arith.subf %348, %347 : vector<8x32xf32>
    %350 = math.exp %349 : vector<8x32xf32>
    %cst_143 = arith.constant 1.000000e+00 : f32
    %351 = vector.broadcast %cst_143 : f32 to vector<8x32xf32>
    %352 = arith.addf %351, %350 : vector<8x32xf32>
    %cst_144 = arith.constant 1.000000e+00 : f32
    %353 = vector.broadcast %cst_144 : f32 to vector<8x32xf32>
    %354 = arith.divf %353, %352 : vector<8x32xf32>
    %355 = vector.extract_strided_slice %338 {offsets = [0, 64], sizes = [8, 32], strides = [1, 1]} : vector<8x128xf32> to vector<8x32xf32>
    %356 = math.tanh %355 : vector<8x32xf32>
    %357 = vector.extract_strided_slice %338 {offsets = [0, 96], sizes = [8, 32], strides = [1, 1]} : vector<8x128xf32> to vector<8x32xf32>
    %cst_145 = arith.constant 0.000000e+00 : f32
    %358 = vector.broadcast %cst_145 : f32 to vector<8x32xf32>
    %359 = arith.subf %358, %357 : vector<8x32xf32>
    %360 = math.exp %359 : vector<8x32xf32>
    %cst_146 = arith.constant 1.000000e+00 : f32
    %361 = vector.broadcast %cst_146 : f32 to vector<8x32xf32>
    %362 = arith.addf %361, %360 : vector<8x32xf32>
    %cst_147 = arith.constant 1.000000e+00 : f32
    %363 = vector.broadcast %cst_147 : f32 to vector<8x32xf32>
    %364 = arith.divf %363, %362 : vector<8x32xf32>
    %365 = arith.mulf %354, %287 : vector<8x32xf32>
    %366 = arith.mulf %346, %356 : vector<8x32xf32>
    %367 = arith.addf %365, %366 : vector<8x32xf32>
    %368 = math.tanh %367 : vector<8x32xf32>
    %369 = arith.mulf %364, %368 : vector<8x32xf32>
    %370 = arith.truncf %369 : vector<8x32xf32> to vector<8x32xbf16>
    %c4_148 = arith.constant 4 : index
    %c0_149 = arith.constant 0 : index
    %c0_150 = arith.constant 0 : index
    %371 = vector.load %arg5[%c4_148, %c0_149, %c0_150] : memref<8x8x64xbf16, #tpu.memory_space<vmem>>, vector<1x8x32xbf16>
    %372 = vector.shape_cast %371 : vector<1x8x32xbf16> to vector<8x32xbf16>
    %373 = vector.shape_cast %370 : vector<8x32xbf16> to vector<1x8x32xbf16>
    tpu.vector_store %arg5[%c4_148, %c0_149, %c0_150], %373 {strides = array<i32>} : memref<8x8x64xbf16, #tpu.memory_space<vmem>>, vector<1x8x32xbf16>,
    %c3_151 = arith.constant 3 : index
    %c0_152 = arith.constant 0 : index
    %c128_153 = arith.constant 128 : index
    %374 = vector.load %arg6[%c3_151, %c0_152, %c128_153] : memref<8x8x256xf32, #tpu.memory_space<vmem>>, vector<1x8x128xf32>
    %375 = vector.shape_cast %374 : vector<1x8x128xf32> to vector<8x128xf32>
    %376 = arith.truncf %329 : vector<8x32xf32> to vector<8x32xbf16>
    %cst_154 = arith.constant dense<0.000000e+00> : vector<8x128xf32>
    %377 = tpu.matmul %376, %12, %cst_154 {dimension_numbers = #tpu.dot_dimension_numbers<[1], [0], [0], [1], [0, 0, 1, 1], [], []>} : vector<8x32xbf16>, vector<32x128xbf16>, vector<8x128xf32> -> vector<8x128xf32>
    %378 = arith.addf %375, %377 : vector<8x128xf32>
    %379 = vector.extract_strided_slice %378 {offsets = [0, 0], sizes = [8, 32], strides = [1, 1]} : vector<8x128xf32> to vector<8x32xf32>
    %cst_155 = arith.constant 0.000000e+00 : f32
    %380 = vector.broadcast %cst_155 : f32 to vector<8x32xf32>
    %381 = arith.subf %380, %379 : vector<8x32xf32>
    %382 = math.exp %381 : vector<8x32xf32>
    %cst_156 = arith.constant 1.000000e+00 : f32
    %383 = vector.broadcast %cst_156 : f32 to vector<8x32xf32>
    %384 = arith.addf %383, %382 : vector<8x32xf32>
    %cst_157 = arith.constant 1.000000e+00 : f32
    %385 = vector.broadcast %cst_157 : f32 to vector<8x32xf32>
    %386 = arith.divf %385, %384 : vector<8x32xf32>
    %387 = vector.extract_strided_slice %378 {offsets = [0, 32], sizes = [8, 32], strides = [1, 1]} : vector<8x128xf32> to vector<8x32xf32>
    %cst_158 = arith.constant 0.000000e+00 : f32
    %388 = vector.broadcast %cst_158 : f32 to vector<8x32xf32>
    %389 = arith.subf %388, %387 : vector<8x32xf32>
    %390 = math.exp %389 : vector<8x32xf32>
    %cst_159 = arith.constant 1.000000e+00 : f32
    %391 = vector.broadcast %cst_159 : f32 to vector<8x32xf32>
    %392 = arith.addf %391, %390 : vector<8x32xf32>
    %cst_160 = arith.constant 1.000000e+00 : f32
    %393 = vector.broadcast %cst_160 : f32 to vector<8x32xf32>
    %394 = arith.divf %393, %392 : vector<8x32xf32>
    %395 = vector.extract_strided_slice %378 {offsets = [0, 64], sizes = [8, 32], strides = [1, 1]} : vector<8x128xf32> to vector<8x32xf32>
    %396 = math.tanh %395 : vector<8x32xf32>
    %397 = vector.extract_strided_slice %378 {offsets = [0, 96], sizes = [8, 32], strides = [1, 1]} : vector<8x128xf32> to vector<8x32xf32>
    %cst_161 = arith.constant 0.000000e+00 : f32
    %398 = vector.broadcast %cst_161 : f32 to vector<8x32xf32>
    %399 = arith.subf %398, %397 : vector<8x32xf32>
    %400 = math.exp %399 : vector<8x32xf32>
    %cst_162 = arith.constant 1.000000e+00 : f32
    %401 = vector.broadcast %cst_162 : f32 to vector<8x32xf32>
    %402 = arith.addf %401, %400 : vector<8x32xf32>
    %cst_163 = arith.constant 1.000000e+00 : f32
    %403 = vector.broadcast %cst_163 : f32 to vector<8x32xf32>
    %404 = arith.divf %403, %402 : vector<8x32xf32>
    %405 = arith.mulf %394, %327 : vector<8x32xf32>
    %406 = arith.mulf %386, %396 : vector<8x32xf32>
    %407 = arith.addf %405, %406 : vector<8x32xf32>
    %408 = math.tanh %407 : vector<8x32xf32>
    %409 = arith.mulf %404, %408 : vector<8x32xf32>
    %410 = arith.truncf %409 : vector<8x32xf32> to vector<8x32xbf16>
    %c3_164 = arith.constant 3 : index
    %c0_165 = arith.constant 0 : index
    %c32_166 = arith.constant 32 : index
    %411 = vector.load %arg5[%c3_164, %c0_165, %c32_166] : memref<8x8x64xbf16, #tpu.memory_space<vmem>>, vector<1x8x32xbf16>
    %412 = vector.shape_cast %411 : vector<1x8x32xbf16> to vector<8x32xbf16>
    %413 = vector.shape_cast %410 : vector<8x32xbf16> to vector<1x8x32xbf16>
    tpu.vector_store %arg5[%c3_164, %c0_165, %c32_166], %413 {strides = array<i32>} : memref<8x8x64xbf16, #tpu.memory_space<vmem>>, vector<1x8x32xbf16>,
    %c5_167 = arith.constant 5 : index
    %c0_168 = arith.constant 0 : index
    %c0_169 = arith.constant 0 : index
    %414 = vector.load %arg6[%c5_167, %c0_168, %c0_169] : memref<8x8x256xf32, #tpu.memory_space<vmem>>, vector<1x8x128xf32>
    %415 = vector.shape_cast %414 : vector<1x8x128xf32> to vector<8x128xf32>
    %416 = arith.truncf %369 : vector<8x32xf32> to vector<8x32xbf16>
    %cst_170 = arith.constant dense<0.000000e+00> : vector<8x128xf32>
    %417 = tpu.matmul %416, %10, %cst_170 {dimension_numbers = #tpu.dot_dimension_numbers<[1], [0], [0], [1], [0, 0, 1, 1], [], []>} : vector<8x32xbf16>, vector<32x128xbf16>, vector<8x128xf32> -> vector<8x128xf32>
    %418 = arith.addf %415, %417 : vector<8x128xf32>
    %419 = vector.extract_strided_slice %418 {offsets = [0, 0], sizes = [8, 32], strides = [1, 1]} : vector<8x128xf32> to vector<8x32xf32>
    %cst_171 = arith.constant 0.000000e+00 : f32
    %420 = vector.broadcast %cst_171 : f32 to vector<8x32xf32>
    %421 = arith.subf %420, %419 : vector<8x32xf32>
    %422 = math.exp %421 : vector<8x32xf32>
    %cst_172 = arith.constant 1.000000e+00 : f32
    %423 = vector.broadcast %cst_172 : f32 to vector<8x32xf32>
    %424 = arith.addf %423, %422 : vector<8x32xf32>
    %cst_173 = arith.constant 1.000000e+00 : f32
    %425 = vector.broadcast %cst_173 : f32 to vector<8x32xf32>
    %426 = arith.divf %425, %424 : vector<8x32xf32>
    %427 = vector.extract_strided_slice %418 {offsets = [0, 32], sizes = [8, 32], strides = [1, 1]} : vector<8x128xf32> to vector<8x32xf32>
    %cst_174 = arith.constant 0.000000e+00 : f32
    %428 = vector.broadcast %cst_174 : f32 to vector<8x32xf32>
    %429 = arith.subf %428, %427 : vector<8x32xf32>
    %430 = math.exp %429 : vector<8x32xf32>
    %cst_175 = arith.constant 1.000000e+00 : f32
    %431 = vector.broadcast %cst_175 : f32 to vector<8x32xf32>
    %432 = arith.addf %431, %430 : vector<8x32xf32>
    %cst_176 = arith.constant 1.000000e+00 : f32
    %433 = vector.broadcast %cst_176 : f32 to vector<8x32xf32>
    %434 = arith.divf %433, %432 : vector<8x32xf32>
    %435 = vector.extract_strided_slice %418 {offsets = [0, 64], sizes = [8, 32], strides = [1, 1]} : vector<8x128xf32> to vector<8x32xf32>
    %436 = math.tanh %435 : vector<8x32xf32>
    %437 = vector.extract_strided_slice %418 {offsets = [0, 96], sizes = [8, 32], strides = [1, 1]} : vector<8x128xf32> to vector<8x32xf32>
    %cst_177 = arith.constant 0.000000e+00 : f32
    %438 = vector.broadcast %cst_177 : f32 to vector<8x32xf32>
    %439 = arith.subf %438, %437 : vector<8x32xf32>
    %440 = math.exp %439 : vector<8x32xf32>
    %cst_178 = arith.constant 1.000000e+00 : f32
    %441 = vector.broadcast %cst_178 : f32 to vector<8x32xf32>
    %442 = arith.addf %441, %440 : vector<8x32xf32>
    %cst_179 = arith.constant 1.000000e+00 : f32
    %443 = vector.broadcast %cst_179 : f32 to vector<8x32xf32>
    %444 = arith.divf %443, %442 : vector<8x32xf32>
    %445 = arith.mulf %434, %367 : vector<8x32xf32>
    %446 = arith.mulf %426, %436 : vector<8x32xf32>
    %447 = arith.addf %445, %446 : vector<8x32xf32>
    %448 = math.tanh %447 : vector<8x32xf32>
    %449 = arith.mulf %444, %448 : vector<8x32xf32>
    %450 = arith.truncf %449 : vector<8x32xf32> to vector<8x32xbf16>
    %c5_180 = arith.constant 5 : index
    %c0_181 = arith.constant 0 : index
    %c0_182 = arith.constant 0 : index
    %451 = vector.load %arg5[%c5_180, %c0_181, %c0_182] : memref<8x8x64xbf16, #tpu.memory_space<vmem>>, vector<1x8x32xbf16>
    %452 = vector.shape_cast %451 : vector<1x8x32xbf16> to vector<8x32xbf16>
    %453 = vector.shape_cast %450 : vector<8x32xbf16> to vector<1x8x32xbf16>
    tpu.vector_store %arg5[%c5_180, %c0_181, %c0_182], %453 {strides = array<i32>} : memref<8x8x64xbf16, #tpu.memory_space<vmem>>, vector<1x8x32xbf16>,
    %c2_183 = arith.constant 2 : index
    %c0_184 = arith.constant 0 : index
    %c128_185 = arith.constant 128 : index
    %454 = vector.load %arg6[%c2_183, %c0_184, %c128_185] : memref<8x8x256xf32, #tpu.memory_space<vmem>>, vector<1x8x128xf32>
    %455 = vector.shape_cast %454 : vector<1x8x128xf32> to vector<8x128xf32>
    %456 = arith.truncf %409 : vector<8x32xf32> to vector<8x32xbf16>
    %cst_186 = arith.constant dense<0.000000e+00> : vector<8x128xf32>
    %457 = tpu.matmul %456, %12, %cst_186 {dimension_numbers = #tpu.dot_dimension_numbers<[1], [0], [0], [1], [0, 0, 1, 1], [], []>} : vector<8x32xbf16>, vector<32x128xbf16>, vector<8x128xf32> -> vector<8x128xf32>
    %458 = arith.addf %455, %457 : vector<8x128xf32>
    %459 = vector.extract_strided_slice %458 {offsets = [0, 0], sizes = [8, 32], strides = [1, 1]} : vector<8x128xf32> to vector<8x32xf32>
    %cst_187 = arith.constant 0.000000e+00 : f32
    %460 = vector.broadcast %cst_187 : f32 to vector<8x32xf32>
    %461 = arith.subf %460, %459 : vector<8x32xf32>
    %462 = math.exp %461 : vector<8x32xf32>
    %cst_188 = arith.constant 1.000000e+00 : f32
    %463 = vector.broadcast %cst_188 : f32 to vector<8x32xf32>
    %464 = arith.addf %463, %462 : vector<8x32xf32>
    %cst_189 = arith.constant 1.000000e+00 : f32
    %465 = vector.broadcast %cst_189 : f32 to vector<8x32xf32>
    %466 = arith.divf %465, %464 : vector<8x32xf32>
    %467 = vector.extract_strided_slice %458 {offsets = [0, 32], sizes = [8, 32], strides = [1, 1]} : vector<8x128xf32> to vector<8x32xf32>
    %cst_190 = arith.constant 0.000000e+00 : f32
    %468 = vector.broadcast %cst_190 : f32 to vector<8x32xf32>
    %469 = arith.subf %468, %467 : vector<8x32xf32>
    %470 = math.exp %469 : vector<8x32xf32>
    %cst_191 = arith.constant 1.000000e+00 : f32
    %471 = vector.broadcast %cst_191 : f32 to vector<8x32xf32>
    %472 = arith.addf %471, %470 : vector<8x32xf32>
    %cst_192 = arith.constant 1.000000e+00 : f32
    %473 = vector.broadcast %cst_192 : f32 to vector<8x32xf32>
    %474 = arith.divf %473, %472 : vector<8x32xf32>
    %475 = vector.extract_strided_slice %458 {offsets = [0, 64], sizes = [8, 32], strides = [1, 1]} : vector<8x128xf32> to vector<8x32xf32>
    %476 = math.tanh %475 : vector<8x32xf32>
    %477 = vector.extract_strided_slice %458 {offsets = [0, 96], sizes = [8, 32], strides = [1, 1]} : vector<8x128xf32> to vector<8x32xf32>
    %cst_193 = arith.constant 0.000000e+00 : f32
    %478 = vector.broadcast %cst_193 : f32 to vector<8x32xf32>
    %479 = arith.subf %478, %477 : vector<8x32xf32>
    %480 = math.exp %479 : vector<8x32xf32>
    %cst_194 = arith.constant 1.000000e+00 : f32
    %481 = vector.broadcast %cst_194 : f32 to vector<8x32xf32>
    %482 = arith.addf %481, %480 : vector<8x32xf32>
    %cst_195 = arith.constant 1.000000e+00 : f32
    %483 = vector.broadcast %cst_195 : f32 to vector<8x32xf32>
    %484 = arith.divf %483, %482 : vector<8x32xf32>
    %485 = arith.mulf %474, %407 : vector<8x32xf32>
    %486 = arith.mulf %466, %476 : vector<8x32xf32>
    %487 = arith.addf %485, %486 : vector<8x32xf32>
    %488 = math.tanh %487 : vector<8x32xf32>
    %489 = arith.mulf %484, %488 : vector<8x32xf32>
    %490 = arith.truncf %489 : vector<8x32xf32> to vector<8x32xbf16>
    %c2_196 = arith.constant 2 : index
    %c0_197 = arith.constant 0 : index
    %c32_198 = arith.constant 32 : index
    %491 = vector.load %arg5[%c2_196, %c0_197, %c32_198] : memref<8x8x64xbf16, #tpu.memory_space<vmem>>, vector<1x8x32xbf16>
    %492 = vector.shape_cast %491 : vector<1x8x32xbf16> to vector<8x32xbf16>
    %493 = vector.shape_cast %490 : vector<8x32xbf16> to vector<1x8x32xbf16>
    tpu.vector_store %arg5[%c2_196, %c0_197, %c32_198], %493 {strides = array<i32>} : memref<8x8x64xbf16, #tpu.memory_space<vmem>>, vector<1x8x32xbf16>,
    %c6_199 = arith.constant 6 : index
    %c0_200 = arith.constant 0 : index
    %c0_201 = arith.constant 0 : index
    %494 = vector.load %arg6[%c6_199, %c0_200, %c0_201] : memref<8x8x256xf32, #tpu.memory_space<vmem>>, vector<1x8x128xf32>
    %495 = vector.shape_cast %494 : vector<1x8x128xf32> to vector<8x128xf32>
    %496 = arith.truncf %449 : vector<8x32xf32> to vector<8x32xbf16>
    %cst_202 = arith.constant dense<0.000000e+00> : vector<8x128xf32>
    %497 = tpu.matmul %496, %10, %cst_202 {dimension_numbers = #tpu.dot_dimension_numbers<[1], [0], [0], [1], [0, 0, 1, 1], [], []>} : vector<8x32xbf16>, vector<32x128xbf16>, vector<8x128xf32> -> vector<8x128xf32>
    %498 = arith.addf %495, %497 : vector<8x128xf32>
    %499 = vector.extract_strided_slice %498 {offsets = [0, 0], sizes = [8, 32], strides = [1, 1]} : vector<8x128xf32> to vector<8x32xf32>
    %cst_203 = arith.constant 0.000000e+00 : f32
    %500 = vector.broadcast %cst_203 : f32 to vector<8x32xf32>
    %501 = arith.subf %500, %499 : vector<8x32xf32>
    %502 = math.exp %501 : vector<8x32xf32>
    %cst_204 = arith.constant 1.000000e+00 : f32
    %503 = vector.broadcast %cst_204 : f32 to vector<8x32xf32>
    %504 = arith.addf %503, %502 : vector<8x32xf32>
    %cst_205 = arith.constant 1.000000e+00 : f32
    %505 = vector.broadcast %cst_205 : f32 to vector<8x32xf32>
    %506 = arith.divf %505, %504 : vector<8x32xf32>
    %507 = vector.extract_strided_slice %498 {offsets = [0, 32], sizes = [8, 32], strides = [1, 1]} : vector<8x128xf32> to vector<8x32xf32>
    %cst_206 = arith.constant 0.000000e+00 : f32
    %508 = vector.broadcast %cst_206 : f32 to vector<8x32xf32>
    %509 = arith.subf %508, %507 : vector<8x32xf32>
    %510 = math.exp %509 : vector<8x32xf32>
    %cst_207 = arith.constant 1.000000e+00 : f32
    %511 = vector.broadcast %cst_207 : f32 to vector<8x32xf32>
    %512 = arith.addf %511, %510 : vector<8x32xf32>
    %cst_208 = arith.constant 1.000000e+00 : f32
    %513 = vector.broadcast %cst_208 : f32 to vector<8x32xf32>
    %514 = arith.divf %513, %512 : vector<8x32xf32>
    %515 = vector.extract_strided_slice %498 {offsets = [0, 64], sizes = [8, 32], strides = [1, 1]} : vector<8x128xf32> to vector<8x32xf32>
    %516 = math.tanh %515 : vector<8x32xf32>
    %517 = vector.extract_strided_slice %498 {offsets = [0, 96], sizes = [8, 32], strides = [1, 1]} : vector<8x128xf32> to vector<8x32xf32>
    %cst_209 = arith.constant 0.000000e+00 : f32
    %518 = vector.broadcast %cst_209 : f32 to vector<8x32xf32>
    %519 = arith.subf %518, %517 : vector<8x32xf32>
    %520 = math.exp %519 : vector<8x32xf32>
    %cst_210 = arith.constant 1.000000e+00 : f32
    %521 = vector.broadcast %cst_210 : f32 to vector<8x32xf32>
    %522 = arith.addf %521, %520 : vector<8x32xf32>
    %cst_211 = arith.constant 1.000000e+00 : f32
    %523 = vector.broadcast %cst_211 : f32 to vector<8x32xf32>
    %524 = arith.divf %523, %522 : vector<8x32xf32>
    %525 = arith.mulf %514, %447 : vector<8x32xf32>
    %526 = arith.mulf %506, %516 : vector<8x32xf32>
    %527 = arith.addf %525, %526 : vector<8x32xf32>
    %528 = math.tanh %527 : vector<8x32xf32>
    %529 = arith.mulf %524, %528 : vector<8x32xf32>
    %530 = arith.truncf %529 : vector<8x32xf32> to vector<8x32xbf16>
    %c6_212 = arith.constant 6 : index
    %c0_213 = arith.constant 0 : index
    %c0_214 = arith.constant 0 : index
    %531 = vector.load %arg5[%c6_212, %c0_213, %c0_214] : memref<8x8x64xbf16, #tpu.memory_space<vmem>>, vector<1x8x32xbf16>
    %532 = vector.shape_cast %531 : vector<1x8x32xbf16> to vector<8x32xbf16>
    %533 = vector.shape_cast %530 : vector<8x32xbf16> to vector<1x8x32xbf16>
    tpu.vector_store %arg5[%c6_212, %c0_213, %c0_214], %533 {strides = array<i32>} : memref<8x8x64xbf16, #tpu.memory_space<vmem>>, vector<1x8x32xbf16>,
    %c1_215 = arith.constant 1 : index
    %c0_216 = arith.constant 0 : index
    %c128_217 = arith.constant 128 : index
    %534 = vector.load %arg6[%c1_215, %c0_216, %c128_217] : memref<8x8x256xf32, #tpu.memory_space<vmem>>, vector<1x8x128xf32>
    %535 = vector.shape_cast %534 : vector<1x8x128xf32> to vector<8x128xf32>
    %536 = arith.truncf %489 : vector<8x32xf32> to vector<8x32xbf16>
    %cst_218 = arith.constant dense<0.000000e+00> : vector<8x128xf32>
    %537 = tpu.matmul %536, %12, %cst_218 {dimension_numbers = #tpu.dot_dimension_numbers<[1], [0], [0], [1], [0, 0, 1, 1], [], []>} : vector<8x32xbf16>, vector<32x128xbf16>, vector<8x128xf32> -> vector<8x128xf32>
    %538 = arith.addf %535, %537 : vector<8x128xf32>
    %539 = vector.extract_strided_slice %538 {offsets = [0, 0], sizes = [8, 32], strides = [1, 1]} : vector<8x128xf32> to vector<8x32xf32>
    %cst_219 = arith.constant 0.000000e+00 : f32
    %540 = vector.broadcast %cst_219 : f32 to vector<8x32xf32>
    %541 = arith.subf %540, %539 : vector<8x32xf32>
    %542 = math.exp %541 : vector<8x32xf32>
    %cst_220 = arith.constant 1.000000e+00 : f32
    %543 = vector.broadcast %cst_220 : f32 to vector<8x32xf32>
    %544 = arith.addf %543, %542 : vector<8x32xf32>
    %cst_221 = arith.constant 1.000000e+00 : f32
    %545 = vector.broadcast %cst_221 : f32 to vector<8x32xf32>
    %546 = arith.divf %545, %544 : vector<8x32xf32>
    %547 = vector.extract_strided_slice %538 {offsets = [0, 32], sizes = [8, 32], strides = [1, 1]} : vector<8x128xf32> to vector<8x32xf32>
    %cst_222 = arith.constant 0.000000e+00 : f32
    %548 = vector.broadcast %cst_222 : f32 to vector<8x32xf32>
    %549 = arith.subf %548, %547 : vector<8x32xf32>
    %550 = math.exp %549 : vector<8x32xf32>
    %cst_223 = arith.constant 1.000000e+00 : f32
    %551 = vector.broadcast %cst_223 : f32 to vector<8x32xf32>
    %552 = arith.addf %551, %550 : vector<8x32xf32>
    %cst_224 = arith.constant 1.000000e+00 : f32
    %553 = vector.broadcast %cst_224 : f32 to vector<8x32xf32>
    %554 = arith.divf %553, %552 : vector<8x32xf32>
    %555 = vector.extract_strided_slice %538 {offsets = [0, 64], sizes = [8, 32], strides = [1, 1]} : vector<8x128xf32> to vector<8x32xf32>
    %556 = math.tanh %555 : vector<8x32xf32>
    %557 = vector.extract_strided_slice %538 {offsets = [0, 96], sizes = [8, 32], strides = [1, 1]} : vector<8x128xf32> to vector<8x32xf32>
    %cst_225 = arith.constant 0.000000e+00 : f32
    %558 = vector.broadcast %cst_225 : f32 to vector<8x32xf32>
    %559 = arith.subf %558, %557 : vector<8x32xf32>
    %560 = math.exp %559 : vector<8x32xf32>
    %cst_226 = arith.constant 1.000000e+00 : f32
    %561 = vector.broadcast %cst_226 : f32 to vector<8x32xf32>
    %562 = arith.addf %561, %560 : vector<8x32xf32>
    %cst_227 = arith.constant 1.000000e+00 : f32
    %563 = vector.broadcast %cst_227 : f32 to vector<8x32xf32>
    %564 = arith.divf %563, %562 : vector<8x32xf32>
    %565 = arith.mulf %554, %487 : vector<8x32xf32>
    %566 = arith.mulf %546, %556 : vector<8x32xf32>
    %567 = arith.addf %565, %566 : vector<8x32xf32>
    %568 = math.tanh %567 : vector<8x32xf32>
    %569 = arith.mulf %564, %568 : vector<8x32xf32>
    %570 = arith.truncf %569 : vector<8x32xf32> to vector<8x32xbf16>
    %c1_228 = arith.constant 1 : index
    %c0_229 = arith.constant 0 : index
    %c32_230 = arith.constant 32 : index
    %571 = vector.load %arg5[%c1_228, %c0_229, %c32_230] : memref<8x8x64xbf16, #tpu.memory_space<vmem>>, vector<1x8x32xbf16>
    %572 = vector.shape_cast %571 : vector<1x8x32xbf16> to vector<8x32xbf16>
    %573 = vector.shape_cast %570 : vector<8x32xbf16> to vector<1x8x32xbf16>
    tpu.vector_store %arg5[%c1_228, %c0_229, %c32_230], %573 {strides = array<i32>} : memref<8x8x64xbf16, #tpu.memory_space<vmem>>, vector<1x8x32xbf16>,
    %c7_231 = arith.constant 7 : index
    %c0_232 = arith.constant 0 : index
    %c0_233 = arith.constant 0 : index
    %574 = vector.load %arg6[%c7_231, %c0_232, %c0_233] : memref<8x8x256xf32, #tpu.memory_space<vmem>>, vector<1x8x128xf32>
    %575 = vector.shape_cast %574 : vector<1x8x128xf32> to vector<8x128xf32>
    %576 = arith.truncf %529 : vector<8x32xf32> to vector<8x32xbf16>
    %cst_234 = arith.constant dense<0.000000e+00> : vector<8x128xf32>
    %577 = tpu.matmul %576, %10, %cst_234 {dimension_numbers = #tpu.dot_dimension_numbers<[1], [0], [0], [1], [0, 0, 1, 1], [], []>} : vector<8x32xbf16>, vector<32x128xbf16>, vector<8x128xf32> -> vector<8x128xf32>
    %578 = arith.addf %575, %577 : vector<8x128xf32>
    %579 = vector.extract_strided_slice %578 {offsets = [0, 0], sizes = [8, 32], strides = [1, 1]} : vector<8x128xf32> to vector<8x32xf32>
    %cst_235 = arith.constant 0.000000e+00 : f32
    %580 = vector.broadcast %cst_235 : f32 to vector<8x32xf32>
    %581 = arith.subf %580, %579 : vector<8x32xf32>
    %582 = math.exp %581 : vector<8x32xf32>
    %cst_236 = arith.constant 1.000000e+00 : f32
    %583 = vector.broadcast %cst_236 : f32 to vector<8x32xf32>
    %584 = arith.addf %583, %582 : vector<8x32xf32>
    %cst_237 = arith.constant 1.000000e+00 : f32
    %585 = vector.broadcast %cst_237 : f32 to vector<8x32xf32>
    %586 = arith.divf %585, %584 : vector<8x32xf32>
    %587 = vector.extract_strided_slice %578 {offsets = [0, 32], sizes = [8, 32], strides = [1, 1]} : vector<8x128xf32> to vector<8x32xf32>
    %cst_238 = arith.constant 0.000000e+00 : f32
    %588 = vector.broadcast %cst_238 : f32 to vector<8x32xf32>
    %589 = arith.subf %588, %587 : vector<8x32xf32>
    %590 = math.exp %589 : vector<8x32xf32>
    %cst_239 = arith.constant 1.000000e+00 : f32
    %591 = vector.broadcast %cst_239 : f32 to vector<8x32xf32>
    %592 = arith.addf %591, %590 : vector<8x32xf32>
    %cst_240 = arith.constant 1.000000e+00 : f32
    %593 = vector.broadcast %cst_240 : f32 to vector<8x32xf32>
    %594 = arith.divf %593, %592 : vector<8x32xf32>
    %595 = vector.extract_strided_slice %578 {offsets = [0, 64], sizes = [8, 32], strides = [1, 1]} : vector<8x128xf32> to vector<8x32xf32>
    %596 = math.tanh %595 : vector<8x32xf32>
    %597 = vector.extract_strided_slice %578 {offsets = [0, 96], sizes = [8, 32], strides = [1, 1]} : vector<8x128xf32> to vector<8x32xf32>
    %cst_241 = arith.constant 0.000000e+00 : f32
    %598 = vector.broadcast %cst_241 : f32 to vector<8x32xf32>
    %599 = arith.subf %598, %597 : vector<8x32xf32>
    %600 = math.exp %599 : vector<8x32xf32>
    %cst_242 = arith.constant 1.000000e+00 : f32
    %601 = vector.broadcast %cst_242 : f32 to vector<8x32xf32>
    %602 = arith.addf %601, %600 : vector<8x32xf32>
    %cst_243 = arith.constant 1.000000e+00 : f32
    %603 = vector.broadcast %cst_243 : f32 to vector<8x32xf32>
    %604 = arith.divf %603, %602 : vector<8x32xf32>
    %605 = arith.mulf %594, %527 : vector<8x32xf32>
    %606 = arith.mulf %586, %596 : vector<8x32xf32>
    %607 = arith.addf %605, %606 : vector<8x32xf32>
    %608 = math.tanh %607 : vector<8x32xf32>
    %609 = arith.mulf %604, %608 : vector<8x32xf32>
    %610 = arith.truncf %609 : vector<8x32xf32> to vector<8x32xbf16>
    %c7_244 = arith.constant 7 : index
    %c0_245 = arith.constant 0 : index
    %c0_246 = arith.constant 0 : index
    %611 = vector.load %arg5[%c7_244, %c0_245, %c0_246] : memref<8x8x64xbf16, #tpu.memory_space<vmem>>, vector<1x8x32xbf16>
    %612 = vector.shape_cast %611 : vector<1x8x32xbf16> to vector<8x32xbf16>
    %613 = vector.shape_cast %610 : vector<8x32xbf16> to vector<1x8x32xbf16>
    tpu.vector_store %arg5[%c7_244, %c0_245, %c0_246], %613 {strides = array<i32>} : memref<8x8x64xbf16, #tpu.memory_space<vmem>>, vector<1x8x32xbf16>,
    %c0_247 = arith.constant 0 : index
    %c0_248 = arith.constant 0 : index
    %c128_249 = arith.constant 128 : index
    %614 = vector.load %arg6[%c0_247, %c0_248, %c128_249] : memref<8x8x256xf32, #tpu.memory_space<vmem>>, vector<1x8x128xf32>
    %615 = vector.shape_cast %614 : vector<1x8x128xf32> to vector<8x128xf32>
    %616 = arith.truncf %569 : vector<8x32xf32> to vector<8x32xbf16>
    %cst_250 = arith.constant dense<0.000000e+00> : vector<8x128xf32>
    %617 = tpu.matmul %616, %12, %cst_250 {dimension_numbers = #tpu.dot_dimension_numbers<[1], [0], [0], [1], [0, 0, 1, 1], [], []>} : vector<8x32xbf16>, vector<32x128xbf16>, vector<8x128xf32> -> vector<8x128xf32>
    %618 = arith.addf %615, %617 : vector<8x128xf32>
    %619 = vector.extract_strided_slice %618 {offsets = [0, 0], sizes = [8, 32], strides = [1, 1]} : vector<8x128xf32> to vector<8x32xf32>
    %cst_251 = arith.constant 0.000000e+00 : f32
    %620 = vector.broadcast %cst_251 : f32 to vector<8x32xf32>
    %621 = arith.subf %620, %619 : vector<8x32xf32>
    %622 = math.exp %621 : vector<8x32xf32>
    %cst_252 = arith.constant 1.000000e+00 : f32
    %623 = vector.broadcast %cst_252 : f32 to vector<8x32xf32>
    %624 = arith.addf %623, %622 : vector<8x32xf32>
    %cst_253 = arith.constant 1.000000e+00 : f32
    %625 = vector.broadcast %cst_253 : f32 to vector<8x32xf32>
    %626 = arith.divf %625, %624 : vector<8x32xf32>
    %627 = vector.extract_strided_slice %618 {offsets = [0, 32], sizes = [8, 32], strides = [1, 1]} : vector<8x128xf32> to vector<8x32xf32>
    %cst_254 = arith.constant 0.000000e+00 : f32
    %628 = vector.broadcast %cst_254 : f32 to vector<8x32xf32>
    %629 = arith.subf %628, %627 : vector<8x32xf32>
    %630 = math.exp %629 : vector<8x32xf32>
    %cst_255 = arith.constant 1.000000e+00 : f32
    %631 = vector.broadcast %cst_255 : f32 to vector<8x32xf32>
    %632 = arith.addf %631, %630 : vector<8x32xf32>
    %cst_256 = arith.constant 1.000000e+00 : f32
    %633 = vector.broadcast %cst_256 : f32 to vector<8x32xf32>
    %634 = arith.divf %633, %632 : vector<8x32xf32>
    %635 = vector.extract_strided_slice %618 {offsets = [0, 64], sizes = [8, 32], strides = [1, 1]} : vector<8x128xf32> to vector<8x32xf32>
    %636 = math.tanh %635 : vector<8x32xf32>
    %637 = vector.extract_strided_slice %618 {offsets = [0, 96], sizes = [8, 32], strides = [1, 1]} : vector<8x128xf32> to vector<8x32xf32>
    %cst_257 = arith.constant 0.000000e+00 : f32
    %638 = vector.broadcast %cst_257 : f32 to vector<8x32xf32>
    %639 = arith.subf %638, %637 : vector<8x32xf32>
    %640 = math.exp %639 : vector<8x32xf32>
    %cst_258 = arith.constant 1.000000e+00 : f32
    %641 = vector.broadcast %cst_258 : f32 to vector<8x32xf32>
    %642 = arith.addf %641, %640 : vector<8x32xf32>
    %cst_259 = arith.constant 1.000000e+00 : f32
    %643 = vector.broadcast %cst_259 : f32 to vector<8x32xf32>
    %644 = arith.divf %643, %642 : vector<8x32xf32>
    %645 = arith.mulf %634, %567 : vector<8x32xf32>
    %646 = arith.mulf %626, %636 : vector<8x32xf32>
    %647 = arith.addf %645, %646 : vector<8x32xf32>
    %648 = math.tanh %647 : vector<8x32xf32>
    %649 = arith.mulf %644, %648 : vector<8x32xf32>
    %650 = arith.truncf %649 : vector<8x32xf32> to vector<8x32xbf16>
    %c0_260 = arith.constant 0 : index
    %c0_261 = arith.constant 0 : index
    %c32_262 = arith.constant 32 : index
    %651 = vector.load %arg5[%c0_260, %c0_261, %c32_262] : memref<8x8x64xbf16, #tpu.memory_space<vmem>>, vector<1x8x32xbf16>
    %652 = vector.shape_cast %651 : vector<1x8x32xbf16> to vector<8x32xbf16>
    %653 = vector.shape_cast %650 : vector<8x32xbf16> to vector<1x8x32xbf16>
    tpu.vector_store %arg5[%c0_260, %c0_261, %c32_262], %653 {strides = array<i32>} : memref<8x8x64xbf16, #tpu.memory_space<vmem>>, vector<1x8x32xbf16>,
    return
  }
  func.func @transform_0(%arg0: i32) -> (i32, i32, i32) {
    %c0_i32 = arith.constant 0 : i32
    %c0_i32_0 = arith.constant 0 : i32
    %c0_i32_1 = arith.constant 0 : i32
    return %c0_i32, %arg0, %c0_i32_0 : i32, i32, i32
  }
  func.func @transform_1(%arg0: i32) -> (i32, i32) {
    %c0_i32 = arith.constant 0 : i32
    %c0_i32_0 = arith.constant 0 : i32
    %c0_i32_1 = arith.constant 0 : i32
    return %c0_i32, %c0_i32_0 : i32, i32
  }
  func.func @transform_2(%arg0: i32) -> (i32, i32, i32) {
    %c0_i32 = arith.constant 0 : i32
    %c0_i32_0 = arith.constant 0 : i32
    %c0_i32_1 = arith.constant 0 : i32
    %c0_i32_2 = arith.constant 0 : i32
    return %c0_i32, %c0_i32_0, %c0_i32_1 : i32, i32, i32
  }
  func.func @transform_3(%arg0: i32) -> (i32, i32) {
    %c0_i32 = arith.constant 0 : i32
    %c0_i32_0 = arith.constant 0 : i32
    %c0_i32_1 = arith.constant 0 : i32
    return %c0_i32, %c0_i32_0 : i32, i32
  }
  func.func @transform_4(%arg0: i32) -> (i32, i32, i32) {
    %c0_i32 = arith.constant 0 : i32
    %c0_i32_0 = arith.constant 0 : i32
    %c0_i32_1 = arith.constant 0 : i32
    return %c0_i32, %arg0, %c0_i32_0 : i32, i32, i32
  }
}

module attributes {stable_mosaic.version = 11 : i64} {
  func.func @attn_mlp_kernel(%arg0: i32, %arg1: memref<8x8x64xbf16, #tpu.memory_space<vmem>>, %arg2: memref<64x128xbf16, #tpu.memory_space<vmem>>, %arg3: memref<64x128xbf16, #tpu.memory_space<vmem>>, %arg4: memref<1x128xf32, #tpu.memory_space<vmem>>, %arg5: memref<8x128xf32, #tpu.memory_space<vmem>>, %arg6: memref<8x128xf32, #tpu.memory_space<vmem>>, %arg7: memref<128x128xbf16, #tpu.memory_space<vmem>>, %arg8: memref<1x128xf32, #tpu.memory_space<vmem>>, %arg9: memref<128x128xbf16, #tpu.memory_space<vmem>>, %arg10: memref<1x128xf32, #tpu.memory_space<vmem>>, %arg11: memref<128x128xbf16, #tpu.memory_space<vmem>>, %arg12: memref<1x128xf32, #tpu.memory_space<vmem>>, %arg13: memref<8x8x128xf32, #tpu.memory_space<vmem>>) attributes {dimension_semantics = [#tpu.dimension_semantics<parallel>], iteration_bounds = array<i64: 1>, scalar_prefetch = 0 : i64, scratch_operands = 0 : i64, tpu.core_type = #tpu.core_type<tc>, window_params = [{transform_indices = @transform_0, window_bounds = array<i64: 8, 8, 64>}, {pipeline_mode = #tpu.pipeline_mode<synchronous>, transform_indices = @transform_1, window_bounds = array<i64: 64, 128>}, {pipeline_mode = #tpu.pipeline_mode<synchronous>, transform_indices = @transform_2, window_bounds = array<i64: 64, 128>}, {pipeline_mode = #tpu.pipeline_mode<synchronous>, transform_indices = @transform_3, window_bounds = array<i64: 1, 128>}, {pipeline_mode = #tpu.pipeline_mode<synchronous>, transform_indices = @transform_4, window_bounds = array<i64: 8, 128>}, {pipeline_mode = #tpu.pipeline_mode<synchronous>, transform_indices = @transform_5, window_bounds = array<i64: 8, 128>}, {pipeline_mode = #tpu.pipeline_mode<synchronous>, transform_indices = @transform_6, window_bounds = array<i64: 128, 128>}, {pipeline_mode = #tpu.pipeline_mode<synchronous>, transform_indices = @transform_7, window_bounds = array<i64: 1, 128>}, {pipeline_mode = #tpu.pipeline_mode<synchronous>, transform_indices = @transform_8, window_bounds = array<i64: 128, 128>}, {pipeline_mode = #tpu.pipeline_mode<synchronous>, transform_indices = @transform_9, window_bounds = array<i64: 1, 128>}, {pipeline_mode = #tpu.pipeline_mode<synchronous>, transform_indices = @transform_10, window_bounds = array<i64: 128, 128>}, {pipeline_mode = #tpu.pipeline_mode<synchronous>, transform_indices = @transform_11, window_bounds = array<i64: 1, 128>}, {transform_indices = @transform_12, window_bounds = array<i64: 8, 8, 128>}]} {
    %c0 = arith.constant 0 : index
    %c0_0 = arith.constant 0 : index
    %c0_1 = arith.constant 0 : index
    %0 = vector.load %arg1[%c0, %c0_0, %c0_1] : memref<8x8x64xbf16, #tpu.memory_space<vmem>>, vector<8x8x64xbf16>
    "tpu.trace_start"() <{level = 10 : i32, message = "btd,bsd->bts"}> : () -> ()
    %cst = arith.constant dense<0.000000e+00> : vector<8x8x8xf32>
    %1 = tpu.matmul %0, %0, %cst {dimension_numbers = #tpu.dot_dimension_numbers<[2], [2], [1], [1], [0, 0, 0, 1, 1, 1], [0], [0]>} : vector<8x8x64xbf16>, vector<8x8x64xbf16>, vector<8x8x8xf32> -> vector<8x8x8xf32>
    "tpu.trace_stop"() : () -> ()
    %cst_2 = arith.constant dense<0xFF800000> : vector<8x8xf32>
    %2 = vector.multi_reduction <maximumf>, %1, %cst_2 [2] : vector<8x8x8xf32> to vector<8x8xf32>
    %3 = vector.shape_cast %2 : vector<8x8xf32> to vector<8x8x1xf32>
    %4 = vector.broadcast %3 : vector<8x8x1xf32> to vector<8x8x8xf32>
    %5 = arith.subf %1, %4 : vector<8x8x8xf32>
    %6 = math.exp %5 : vector<8x8x8xf32>
    %cst_3 = arith.constant dense<0.000000e+00> : vector<8x8xf32>
    %7 = vector.multi_reduction <add>, %6, %cst_3 [2] : vector<8x8x8xf32> to vector<8x8xf32>
    %8 = vector.shape_cast %7 : vector<8x8xf32> to vector<8x8x1xf32>
    %9 = tpu.reciprocal %8 {approx = true} : vector<8x8x1xf32> -> vector<8x8x1xf32>
    %10 = vector.broadcast %9 : vector<8x8x1xf32> to vector<8x8x8xf32>
    %11 = arith.mulf %6, %10 : vector<8x8x8xf32>
    %12 = arith.truncf %11 : vector<8x8x8xf32> to vector<8x8x8xbf16>
    "tpu.trace_start"() <{level = 10 : i32, message = "bts,bsd->btd"}> : () -> ()
    %cst_4 = arith.constant dense<0.000000e+00> : vector<8x8x64xf32>
    %13 = tpu.matmul %12, %0, %cst_4 {dimension_numbers = #tpu.dot_dimension_numbers<[2], [1], [1], [2], [0, 0, 0, 1, 1, 2], [0], [0]>} : vector<8x8x8xbf16>, vector<8x8x64xbf16>, vector<8x8x64xf32> -> vector<8x8x64xf32>
    "tpu.trace_stop"() : () -> ()
    %14 = vector.shape_cast %0 : vector<8x8x64xbf16> to vector<64x64xbf16>
    %15 = vector.shape_cast %13 : vector<8x8x64xf32> to vector<64x64xf32>
    %16 = arith.truncf %15 : vector<64x64xf32> to vector<64x64xbf16>
    %c0_5 = arith.constant 0 : index
    %c0_6 = arith.constant 0 : index
    %17 = vector.load %arg2[%c0_5, %c0_6] : memref<64x128xbf16, #tpu.memory_space<vmem>>, vector<64x128xbf16>
    %cst_7 = arith.constant dense<0.000000e+00> : vector<64x128xf32>
    %18 = tpu.matmul %16, %17, %cst_7 {dimension_numbers = #tpu.dot_dimension_numbers<[1], [0], [0], [1], [0, 0, 1, 1], [], []>} : vector<64x64xbf16>, vector<64x128xbf16>, vector<64x128xf32> -> vector<64x128xf32>
    %c0_8 = arith.constant 0 : index
    %c0_9 = arith.constant 0 : index
    %19 = vector.load %arg3[%c0_8, %c0_9] : memref<64x128xbf16, #tpu.memory_space<vmem>>, vector<64x128xbf16>
    %cst_10 = arith.constant dense<0.000000e+00> : vector<64x128xf32>
    %20 = tpu.matmul %14, %19, %cst_10 {dimension_numbers = #tpu.dot_dimension_numbers<[1], [0], [0], [1], [0, 0, 1, 1], [], []>} : vector<64x64xbf16>, vector<64x128xbf16>, vector<64x128xf32> -> vector<64x128xf32>
    %21 = arith.addf %18, %20 : vector<64x128xf32>
    %c0_11 = arith.constant 0 : index
    %c0_12 = arith.constant 0 : index
    %22 = vector.load %arg4[%c0_11, %c0_12] : memref<1x128xf32, #tpu.memory_space<vmem>>, vector<1x128xf32>
    %23 = vector.broadcast %22 : vector<1x128xf32> to vector<64x128xf32>
    %24 = arith.addf %21, %23 : vector<64x128xf32>
    %cst_13 = arith.constant 0.000000e+00 : f32
    %25 = vector.broadcast %cst_13 : f32 to vector<64x128xf32>
    %26 = arith.maximumf %24, %25 : vector<64x128xf32>
    %27 = vector.shape_cast %26 : vector<64x128xf32> to vector<8x8x128xf32>
    %c0_14 = arith.constant 0 : index
    %c0_15 = arith.constant 0 : index
    %28 = vector.load %arg5[%c0_14, %c0_15] : memref<8x128xf32, #tpu.memory_space<vmem>>, vector<8x128xf32>
    %29 = vector.shape_cast %28 : vector<8x128xf32> to vector<1x8x128xf32>
    %30 = vector.broadcast %29 : vector<1x8x128xf32> to vector<8x8x128xf32>
    %31 = arith.mulf %27, %30 : vector<8x8x128xf32>
    %c0_16 = arith.constant 0 : index
    %c0_17 = arith.constant 0 : index
    %32 = vector.load %arg6[%c0_16, %c0_17] : memref<8x128xf32, #tpu.memory_space<vmem>>, vector<8x128xf32>
    %33 = vector.shape_cast %32 : vector<8x128xf32> to vector<1x8x128xf32>
    %34 = vector.broadcast %33 : vector<1x8x128xf32> to vector<8x8x128xf32>
    %35 = arith.addf %31, %34 : vector<8x8x128xf32>
    %36 = vector.shape_cast %35 : vector<8x8x128xf32> to vector<64x128xf32>
    %37 = arith.truncf %36 : vector<64x128xf32> to vector<64x128xbf16>
    %c0_18 = arith.constant 0 : index
    %c0_19 = arith.constant 0 : index
    %38 = vector.load %arg7[%c0_18, %c0_19] : memref<128x128xbf16, #tpu.memory_space<vmem>>, vector<128x128xbf16>
    %cst_20 = arith.constant dense<0.000000e+00> : vector<64x128xf32>
    %39 = tpu.matmul %37, %38, %cst_20 {dimension_numbers = #tpu.dot_dimension_numbers<[1], [0], [0], [1], [0, 0, 1, 1], [], []>} : vector<64x128xbf16>, vector<128x128xbf16>, vector<64x128xf32> -> vector<64x128xf32>
    %c0_21 = arith.constant 0 : index
    %c0_22 = arith.constant 0 : index
    %40 = vector.load %arg8[%c0_21, %c0_22] : memref<1x128xf32, #tpu.memory_space<vmem>>, vector<1x128xf32>
    %41 = vector.broadcast %40 : vector<1x128xf32> to vector<64x128xf32>
    %42 = arith.addf %39, %41 : vector<64x128xf32>
    %cst_23 = arith.constant 0.000000e+00 : f32
    %43 = vector.broadcast %cst_23 : f32 to vector<64x128xf32>
    %44 = arith.maximumf %42, %43 : vector<64x128xf32>
    %45 = arith.truncf %44 : vector<64x128xf32> to vector<64x128xbf16>
    %c0_24 = arith.constant 0 : index
    %c0_25 = arith.constant 0 : index
    %46 = vector.load %arg9[%c0_24, %c0_25] : memref<128x128xbf16, #tpu.memory_space<vmem>>, vector<128x128xbf16>
    %cst_26 = arith.constant dense<0.000000e+00> : vector<64x128xf32>
    %47 = tpu.matmul %45, %46, %cst_26 {dimension_numbers = #tpu.dot_dimension_numbers<[1], [0], [0], [1], [0, 0, 1, 1], [], []>} : vector<64x128xbf16>, vector<128x128xbf16>, vector<64x128xf32> -> vector<64x128xf32>
    %c0_27 = arith.constant 0 : index
    %c0_28 = arith.constant 0 : index
    %48 = vector.load %arg10[%c0_27, %c0_28] : memref<1x128xf32, #tpu.memory_space<vmem>>, vector<1x128xf32>
    %49 = vector.broadcast %48 : vector<1x128xf32> to vector<64x128xf32>
    %50 = arith.addf %47, %49 : vector<64x128xf32>
    %cst_29 = arith.constant 0.000000e+00 : f32
    %51 = vector.broadcast %cst_29 : f32 to vector<64x128xf32>
    %52 = arith.maximumf %50, %51 : vector<64x128xf32>
    %53 = arith.truncf %52 : vector<64x128xf32> to vector<64x128xbf16>
    %c0_30 = arith.constant 0 : index
    %c0_31 = arith.constant 0 : index
    %54 = vector.load %arg11[%c0_30, %c0_31] : memref<128x128xbf16, #tpu.memory_space<vmem>>, vector<128x128xbf16>
    %cst_32 = arith.constant dense<0.000000e+00> : vector<64x128xf32>
    %55 = tpu.matmul %53, %54, %cst_32 {dimension_numbers = #tpu.dot_dimension_numbers<[1], [0], [0], [1], [0, 0, 1, 1], [], []>} : vector<64x128xbf16>, vector<128x128xbf16>, vector<64x128xf32> -> vector<64x128xf32>
    %c0_33 = arith.constant 0 : index
    %c0_34 = arith.constant 0 : index
    %56 = vector.load %arg12[%c0_33, %c0_34] : memref<1x128xf32, #tpu.memory_space<vmem>>, vector<1x128xf32>
    %57 = vector.broadcast %56 : vector<1x128xf32> to vector<64x128xf32>
    %58 = arith.addf %55, %57 : vector<64x128xf32>
    %59 = vector.shape_cast %58 : vector<64x128xf32> to vector<8x8x128xf32>
    %c0_35 = arith.constant 0 : index
    %c0_36 = arith.constant 0 : index
    %c0_37 = arith.constant 0 : index
    %60 = vector.load %arg13[%c0_35, %c0_36, %c0_37] : memref<8x8x128xf32, #tpu.memory_space<vmem>>, vector<8x8x128xf32>
    tpu.vector_store %arg13[%c0_35, %c0_36, %c0_37], %59 {strides = array<i32>} : memref<8x8x128xf32, #tpu.memory_space<vmem>>, vector<8x8x128xf32>,
    return
  }
  func.func @transform_0(%arg0: i32) -> (i32, i32, i32) {
    %c0_i32 = arith.constant 0 : i32
    %c0_i32_0 = arith.constant 0 : i32
    %c0_i32_1 = arith.constant 0 : i32
    return %arg0, %c0_i32, %c0_i32_0 : i32, i32, i32
  }
  func.func @transform_1(%arg0: i32) -> (i32, i32) {
    %c0_i32 = arith.constant 0 : i32
    %c0_i32_0 = arith.constant 0 : i32
    %c0_i32_1 = arith.constant 0 : i32
    return %c0_i32, %c0_i32_0 : i32, i32
  }
  func.func @transform_2(%arg0: i32) -> (i32, i32) {
    %c0_i32 = arith.constant 0 : i32
    %c0_i32_0 = arith.constant 0 : i32
    %c0_i32_1 = arith.constant 0 : i32
    return %c0_i32, %c0_i32_0 : i32, i32
  }
  func.func @transform_3(%arg0: i32) -> (i32, i32) {
    %c0_i32 = arith.constant 0 : i32
    %c0_i32_0 = arith.constant 0 : i32
    %c0_i32_1 = arith.constant 0 : i32
    return %c0_i32, %c0_i32_0 : i32, i32
  }
  func.func @transform_4(%arg0: i32) -> (i32, i32) {
    %c0_i32 = arith.constant 0 : i32
    %c0_i32_0 = arith.constant 0 : i32
    %c0_i32_1 = arith.constant 0 : i32
    return %c0_i32, %c0_i32_0 : i32, i32
  }
  func.func @transform_5(%arg0: i32) -> (i32, i32) {
    %c0_i32 = arith.constant 0 : i32
    %c0_i32_0 = arith.constant 0 : i32
    %c0_i32_1 = arith.constant 0 : i32
    return %c0_i32, %c0_i32_0 : i32, i32
  }
  func.func @transform_6(%arg0: i32) -> (i32, i32) {
    %c0_i32 = arith.constant 0 : i32
    %c0_i32_0 = arith.constant 0 : i32
    %c0_i32_1 = arith.constant 0 : i32
    return %c0_i32, %c0_i32_0 : i32, i32
  }
  func.func @transform_7(%arg0: i32) -> (i32, i32) {
    %c0_i32 = arith.constant 0 : i32
    %c0_i32_0 = arith.constant 0 : i32
    %c0_i32_1 = arith.constant 0 : i32
    return %c0_i32, %c0_i32_0 : i32, i32
  }
  func.func @transform_8(%arg0: i32) -> (i32, i32) {
    %c0_i32 = arith.constant 0 : i32
    %c0_i32_0 = arith.constant 0 : i32
    %c0_i32_1 = arith.constant 0 : i32
    return %c0_i32, %c0_i32_0 : i32, i32
  }
  func.func @transform_9(%arg0: i32) -> (i32, i32) {
    %c0_i32 = arith.constant 0 : i32
    %c0_i32_0 = arith.constant 0 : i32
    %c0_i32_1 = arith.constant 0 : i32
    return %c0_i32, %c0_i32_0 : i32, i32
  }
  func.func @transform_10(%arg0: i32) -> (i32, i32) {
    %c0_i32 = arith.constant 0 : i32
    %c0_i32_0 = arith.constant 0 : i32
    %c0_i32_1 = arith.constant 0 : i32
    return %c0_i32, %c0_i32_0 : i32, i32
  }
  func.func @transform_11(%arg0: i32) -> (i32, i32) {
    %c0_i32 = arith.constant 0 : i32
    %c0_i32_0 = arith.constant 0 : i32
    %c0_i32_1 = arith.constant 0 : i32
    return %c0_i32, %c0_i32_0 : i32, i32
  }
  func.func @transform_12(%arg0: i32) -> (i32, i32, i32) {
    %c0_i32 = arith.constant 0 : i32
    %c0_i32_0 = arith.constant 0 : i32
    %c0_i32_1 = arith.constant 0 : i32
    return %arg0, %c0_i32, %c0_i32_0 : i32, i32, i32
  }
}

</mosaic_0001>

<bundles_post_ra>
// kernel: attention_rnn_forward.3
= control target key start
LH: loop header
LB: loop body
LE: loop exit
PB: predicated region body
PF: predicated region fallthrough
CT: control target
= control target key end

     0   :  { %v1881_v0 = vmov 0.0   ;;  %v1882_v2 = vmov 0   ;;  %vm1883_vm0 = vmmov 0   ;;  %vm70_vm1 = vcmask 130048   ;;  %s2354_s1 = inlined_call_operand.vmem [shape: bf16[16,256], index: 1, kind: input, shape index: {}]   ;;  %s2355_s2 = inlined_call_operand.vmem [shape: bf16[2,32,128], index: 2, kind: input, shape index: {}]   ;;  %s2356_s0 = inlined_call_operand.vmem [shape: bf16[8,8,16], index: 0, kind: input, shape index: {}]   ;;  %s2357_s3 = inlined_call_operand.vmem [shape: f32[1,256], index: 3, kind: input, shape index: {}]   ;;  %s2358_s4 = inlined_call_operand.vmem [shape: bf16[8,8,64], index: 4, kind: output, shape index: {}]  }
   0x1   :  { %1609 = vmatprep.subr.bf16.mxu1 %v1881_v0  ;;  %v1742_v1 = vld [vmem:[%s2354_s1 + $0x4] ss:$8 sps:$4 sm:$0xff]   ;;  %115 = vmatprep.mubr.bf16.mxu0 %v1882_v2  ;;  %v1745_v4 = vld [vmem:[%s2354_s1] ss:$8 sps:$4 sm:$0xff]   ;;  %v1941_v7 = vld [vmem:[%s2355_s2 + $0x10] sm:$0xff]   ;;  %v30_v12 = vlaneseq  ;;  %vm194_vm2 = vcmask 261120  }
   0x2   :  { %v1918_v3 = vld [vmem:[%s2355_s2] sm:$0xff]   ;;  %1613 = vmatprep.mubr.msk.bf16.mxu1 %vm1883_vm0, %v1881_v0  ;;  %83 = vmatprep.subr.bf16.mxu0 %v1742_v1  ;;  %v1933_v6 = vld [vmem:[%s2355_s2 + $0x8] sm:$0xff]   ;;  %v1953_v9 = vld [vmem:[%s2355_s2 + $0x18] sm:$0xff]   ;;  %vm270_vm3 = vcmask 257024   ;;  %vm359_vm4 = vcmask 519424  }
   0x3   :  { %1610 = vmatpush3.bf16.msra.mxu1 %v1918_v3  ;;  %v1746_v5 = vld [vmem:[%s2356_s0] sm:$0xff]   ;;  %84 = vmatpush1.bf16.msra.mxu0 %v1745_v4  ;;  %v1748_v8 = vld [vmem:[%s2356_s0 + $0x8] sm:$0xff]   ;;  %v1749_v10 = vld [vmem:[%s2356_s0 + $0x10] sm:$0xff]   ;;  %v31_v13 = vshrl.u32 %v30_v12, 7 }
   0x4   :  { %1611 = vmatprep.subr.bf16.mxu1 %v1881_v0  ;;  %1641 = vmatprep.subr.bf16.mxu0 %v1881_v0  ;;  %v1752_v11 = vld [vmem:[%s2356_s0 + $0x18] sm:$0xff]   ;;  %v28_v15 = vld [vmem:[%s2357_s3] sm:$0x3]  ;;  %s1884_s0 = smov 64   ;;  %s1885_s3 = smov 32  }
   0x5   :  { %v32_v14 = vsub.s32 0, %v31_v13  ;;  %v36_v16 = vsub.s32 1, %v31_v13 }
   0x6   :  { %1489 = vmatmul.mubr.msk.bf16.vlgmr.msra.gmra.mrb[0].mxu0 %vm70_vm1, %v1746_v5 }
   0x7   :  { %1612 = vmatpush3.bf16.msra.mxu1 %v1933_v6  ;;  %125 = vmatprep.mubr.bf16.mxu0 %v1882_v2  ;;  %v33_v17 = vrot.slane %v28_v15, %v32_v14  ;;  %v37_v18 = vrot.slane %v28_v15, %v36_v16 }
   0x8   :  { %1617 = vmatprep.subr.bf16.mxu1 %v1881_v0  ;;  %1642 = vmatpush3.bf16.msra.mxu0 %v1918_v3 }
   0x9   :  { %1643 = vmatprep.subr.bf16.mxu0 %v1881_v0 }
   0xa   :  { %1614 = vmatmul.mubr.bf16.vlgmr.msra.gmra.mrb[0].mxu1 %v1882_v2 }
   0xb   :  { %1618 = vmatpush3.bf16.msra.mxu1 %v1941_v7  ;;  %1621 = vmatprep.mubr.msk.bf16.mxu1 %vm1883_vm0, %v1881_v0 }
   0xc   :  { %1619 = vmatprep.subr.bf16.mxu1 %v1881_v0  ;;  %1644 = vmatpush3.bf16.msra.mxu0 %v1933_v6 }
   0xd   :  { %1657 = vmatprep.subr.bf16.mxu0 %v1881_v0 }
   0xe   :  { %1490 = vmatmul.mubr.msk.bf16.gmra.mrb[4].mxu0 %vm70_vm1, %v1748_v8 }
   0xf   :  { %1620 = vmatpush3.bf16.msra.mxu1 %v1953_v9  ;;  %135 = vmatprep.mubr.bf16.mxu0 %v1882_v2 }
  0x10   :  { %1625 = vmatprep.subr.bf16.mxu1 %v1881_v0 }
  0x12   :  { %1622 = vmatmul.mubr.bf16.vlgmr.msra.gmra.mrb[4].mxu1 %v1882_v2 }
  0x13   :  { %1626 = vmatpush3.bf16.msra.mxu1 %v1918_v3  ;;  %1629 = vmatprep.mubr.msk.bf16.mxu1 %vm1883_vm0, %v1881_v0 }
  0x14   :  { %1627 = vmatprep.subr.bf16.mxu1 %v1881_v0 }
  0x16   :  { %1491 = vmatmul.mubr.msk.bf16.gmra.mrb[8].mxu0 %vm70_vm1, %v1749_v10 }
  0x17   :  { %1628 = vmatpush3.bf16.msra.mxu1 %v1933_v6  ;;  %145 = vmatprep.mubr.bf16.mxu0 %v1882_v2 }
  0x18   :  { %1633 = vmatprep.subr.bf16.mxu1 %v1881_v0 }
  0x1e   :  { %1492 = vmatmul.mubr.msk.bf16.gmra.mrb[12].mxu0 %vm70_vm1, %v1752_v11 }
  0x1f   :  { %1645 = vmatprep.mubr.msk.bf16.mxu0 %vm1883_vm0, %v1881_v0 }
  0xd9   :  { %v117_v19 = vpop.f32.mrb[0].mxu0 }
  0xda   :  { %v118_v20 = vadd.f32 %v117_v19, %v33_v17  ;;  %v119_v21 = vpop.f32.mrb[1].mxu0 }
  0xdb   :  { %v1982_v22 = vadd.f32 %v119_v21, %v37_v18  ;;  %v121_v23 = vpop.f32.mrb[2].mxu0 }
  0xdc   :  { %v1984_v24 = vadd.f32 %v121_v23, %v33_v17  ;;  %v123_v25 = vpop.f32.mrb[3].mxu0 }
  0xdd   :  { %v232_v26 = vpop.f32.mrb[0].mxu1  ;;  %v1986_v27 = vadd.f32 %v123_v25, %v37_v18 }
  0xde   :  { %v238_v28 = vadd.f32 %v232_v26, %v118_v20  ;;  %v1615_v29 = vpop.f32.mrb[1].mxu1 }
  0xdf   :  { %v235_v30 = vpop.f32.mrb[2].mxu1 }
  0xe0   :  { %1753 = vtanh.f32 %v238_v28  ;;  %v1616_v31 = vpop.f32.mrb[3].mxu1  ;;  %v239_v63 = vsub.f32 0.0, %v238_v28 }
  0xe1   :  { %v127_v32 = vpop.f32.mrb[4].mxu0 }
  0xe2   :  { %v1988_v33 = vadd.f32 %v127_v32, %v33_v17  ;;  %v129_v34 = vpop.f32.mrb[5].mxu0  ;;  %v240_v1 = vmul.f32 1.442695, %v239_v63 }
  0xe3   :  { %v1990_v35 = vadd.f32 %v129_v34, %v37_v18  ;;  %v131_v36 = vpop.f32.mrb[6].mxu0 }
  0xe4   :  { %v1992_v37 = vadd.f32 %v131_v36, %v33_v17  ;;  %v133_v38 = vpop.f32.mrb[7].mxu0 }
  0xe5   :  { %v320_v39 = vpop.f32.mrb[4].mxu1  ;;  %v1994_v40 = vadd.f32 %v133_v38, %v37_v18 }
  0xe6   :  { %v1623_v41 = vpop.f32.mrb[5].mxu1 }
  0xe7   :  { %v323_v42 = vpop.f32.mrb[6].mxu1 }
  0xe8   :  { %v1624_v43 = vpop.f32.mrb[7].mxu1 }
  0xe9   :  { %v137_v45 = vpop.f32.mrb[8].mxu0 }
  0xea   :  { %v1754_v44 = vpop.eup %1753  ;;  %v1996_v46 = vadd.f32 %v137_v45, %v33_v17  ;;  %v139_v47 = vpop.f32.mrb[9].mxu0 }
  0xeb   :  { %248 = vrot.lane.b32.xlu0 %v1754_v44, %s1884_s0  ;;  %v1999_v48 = vadd.f32 %v139_v47, %v37_v18  ;;  %v141_v49 = vpop.f32.mrb[10].mxu0 }
  0xec   :  { %v2001_v50 = vadd.f32 %v141_v49, %v33_v17  ;;  %v143_v51 = vpop.f32.mrb[11].mxu0 }
  0xed   :  { %v2003_v52 = vadd.f32 %v143_v51, %v37_v18 }
  0xf1   :  { %v147_v53 = vpop.f32.mrb[12].mxu0 }
  0xf2   :  { %v2005_v54 = vadd.f32 %v147_v53, %v33_v17  ;;  %v149_v55 = vpop.f32.mrb[13].mxu0 }
  0xf3   :  { %v2007_v56 = vadd.f32 %v149_v55, %v37_v18  ;;  %v151_v57 = vpop.f32.mrb[14].mxu0 }
  0xf4   :  { %v2009_v58 = vadd.f32 %v151_v57, %v33_v17  ;;  %v153_v59 = vpop.f32.mrb[15].mxu0 }
  0xf5   :  { %v154_v60 = vadd.f32 %v153_v59, %v37_v18 }
  0xf7   :  { %v326_v61 = vadd.f32 %v320_v39, %v154_v60 }
  0xf9   :  { %1755 = vtanh.f32 %v326_v61  ;;  %v327_v5 = vsub.f32 0.0, %v326_v61 }
  0xfa   :  { %1757 = vpow2.f32 %v240_v1 }
  0xfb   :  { %v328_v8 = vmul.f32 1.442695, %v327_v5 }
 0x103   :  { %v1756_v62 = vpop.eup %1755 }
 0x104   :  { %336 = vrot.lane.b32.xlu0 %v1756_v62, %s1884_s0  ;;  %v1758_v2 = vpop.eup %1757 }
 0x105   :  { %v242_v4 = vadd.f32 1.0, %v1758_v2 }
 0x107   :  { %1759 = vrcp.f32 %v242_v4 }
 0x108   :  { %1761 = vpow2.f32 %v328_v8 }
 0x111   :  { %v1760_v10 = vpop.eup %1759 }
 0x112   :  { %v1762_v13 = vpop.eup %1761  ;;  %v246_v18 = vmul.f32 0.0, %v1760_v10 }
 0x113   :  { %v330_v14 = vadd.f32 1.0, %v1762_v13 }
 0x115   :  { %1763 = vrcp.f32 %v330_v14 }
 0x11f   :  { %v1764_v15 = vpop.eup %1763 }
 0x120   :  { %v334_v23 = vmul.f32 0.0, %v1764_v15 }
 0x15d   :  { %v249_v11 = vpop.permute.xlu0 %248 }
 0x15e   :  { %v251_v12 = vmul.f32 %v1760_v10, %v249_v11 }
 0x160   :  { %253 = vrot.lane.b32.xlu1 %v251_v12, %s1885_s3 }
 0x176   :  { %v337_v16 = vpop.permute.xlu0 %336 }
 0x177   :  { %v339_v17 = vmul.f32 %v1764_v15, %v337_v16 }
 0x179   :  { %341 = vrot.lane.b32.xlu1 %v339_v17, %s1885_s3 }
 0x1d2   :  { %v254_v19 = vpop.permute.xlu1 %253 }
 0x1d3   :  { %v2014_v20 = vadd.f32 %v254_v19, %v246_v18 }
 0x1d5   :  { %1765 = vtanh.f32 %v2014_v20 }
 0x1df   :  { %v1766_v21 = vpop.eup %1765 }
 0x1e0   :  { %259 = vrot.lane.b32.xlu0 %v1766_v21, %s1884_s0 }
 0x1eb   :  { %v342_v25 = vpop.permute.xlu1 %341 }
 0x1ec   :  { %v2018_v26 = vadd.f32 %v342_v25, %v334_v23 }
 0x1ee   :  { %1767 = vtanh.f32 %v2018_v26 }
 0x1f8   :  { %v1768_v28 = vpop.eup %1767 }
 0x1f9   :  { %347 = vrot.lane.b32.xlu1 %v1768_v28, %s1884_s0 }
 0x252   :  { %v260_v29 = vpop.permute.xlu0 %259 }
 0x253   :  { %v262_v30 = vmul.f32 %v1760_v10, %v260_v29 }
 0x255   :  { %v2022_v31 = vpack.c.bf16 %v262_v30, %v262_v30 }
 0x257   :  { %363 = vrot.lane.b32.xlu0 %v2022_v31, %s1885_s3 }
 0x26b   :  { %v348_v32 = vpop.permute.xlu1 %347 }
 0x26c   :  { %v350_v34 = vmul.f32 %v1764_v15, %v348_v32 }
 0x26e   :  { %v2026_v36 = vpack.c.bf16 %v350_v34, %v350_v34 }
 0x270   :  { %444 = vrot.lane.b32.xlu1 %v2026_v36, %s1885_s3 }
 0x2c9   :  { %v364_v38 = vpop.permute.xlu0 %363 }
 0x2ca   :  { %1630 = vmatmul.mubr.msk.bf16.vlgmr.msra.gmra.mrb[8].mxu1 %vm194_vm2, %v364_v38 }
 0x2cb   :  { %1634 = vmatpush3.bf16.msra.mxu1 %v1941_v7  ;;  %1637 = vmatprep.mubr.msk.bf16.mxu1 %vm1883_vm0, %v1881_v0 }
 0x2cc   :  { %1635 = vmatprep.subr.bf16.mxu1 %v1881_v0 }
 0x2cf   :  { %1636 = vmatpush3.bf16.msra.mxu1 %v1953_v9 }
 0x2d0   :  { %1649 = vmatprep.subr.bf16.mxu1 %v1881_v0 }
 0x2e2   :  { %v445_v39 = vpop.permute.xlu1 %444 }
 0x2e3   :  { %1638 = vmatmul.mubr.msk.bf16.vlgmr.msra.gmra.mrb[12].mxu1 %vm194_vm2, %v445_v39 }
 0x2e4   :  { %1650 = vmatpush3.bf16.msra.mxu1 %v1941_v7  ;;  %1653 = vmatprep.mubr.msk.bf16.mxu1 %vm1883_vm0, %v1881_v0 }
 0x2e5   :  { %1651 = vmatprep.subr.bf16.mxu1 %v1881_v0 }
 0x2e8   :  { %1652 = vmatpush3.bf16.msra.mxu1 %v1953_v9 }
 0x2e9   :  { %1665 = vmatprep.subr.bf16.mxu1 %v1881_v0 }
 0x39d   :  { %v402_v41 = vpop.f32.mrb[8].mxu1 }
 0x39e   :  { %v408_v42 = vadd.f32 %v402_v41, %v1984_v24  ;;  %v1631_v43 = vpop.f32.mrb[9].mxu1 }
 0x39f   :  { %v405_v44 = vpop.f32.mrb[10].mxu1 }
 0x3a0   :  { %1769 = vtanh.f32 %v408_v42  ;;  %v1632_v45 = vpop.f32.mrb[11].mxu1  ;;  %v409_v60 = vsub.f32 0.0, %v408_v42 }
 0x3a2   :  { %v410_v61 = vmul.f32 1.442695, %v409_v60 }
 0x3aa   :  { %v1770_v47 = vpop.eup %1769 }
 0x3ab   :  { %418 = vrot.lane.b32.xlu0 %v1770_v47, %s1884_s0 }
 0x3b6   :  { %v483_v49 = vpop.f32.mrb[12].mxu1 }
 0x3b7   :  { %v489_v51 = vadd.f32 %v483_v49, %v2007_v56  ;;  %v1639_v53 = vpop.f32.mrb[13].mxu1 }
 0x3b8   :  { %v486_v55 = vpop.f32.mrb[14].mxu1 }
 0x3b9   :  { %1771 = vtanh.f32 %v489_v51  ;;  %v1640_v57 = vpop.f32.mrb[15].mxu1  ;;  %v490_v63 = vsub.f32 0.0, %v489_v51 }
 0x3ba   :  { %1773 = vpow2.f32 %v410_v61 }
 0x3bb   :  { %v491_v1 = vmul.f32 1.442695, %v490_v63 }
 0x3c3   :  { %v1772_v59 = vpop.eup %1771 }
 0x3c4   :  { %499 = vrot.lane.b32.xlu1 %v1772_v59, %s1884_s0  ;;  %v1774_v24 = vpop.eup %1773 }
 0x3c5   :  { %v412_v62 = vadd.f32 1.0, %v1774_v24 }
 0x3c7   :  { %1775 = vrcp.f32 %v412_v62 }
 0x3c8   :  { %1777 = vpow2.f32 %v491_v1 }
 0x3d1   :  { %v1776_v2 = vpop.eup %1775 }
 0x3d2   :  { %v1778_v56 = vpop.eup %1777  ;;  %v416_v13 = vmul.f32 %v1776_v2, %v2014_v20 }
 0x3d3   :  { %v493_v8 = vadd.f32 1.0, %v1778_v56 }
 0x3d5   :  { %1779 = vrcp.f32 %v493_v8 }
 0x3df   :  { %v1780_v10 = vpop.eup %1779 }
 0x3e0   :  { %v497_v17 = vmul.f32 %v1780_v10, %v2018_v26 }
 0x41d   :  { %v419_v4 = vpop.permute.xlu0 %418 }
 0x41e   :  { %v421_v5 = vmul.f32 %v1776_v2, %v419_v4 }
 0x420   :  { %423 = vrot.lane.b32.xlu0 %v421_v5, %s1885_s3 }
 0x436   :  { %v500_v11 = vpop.permute.xlu1 %499 }
 0x437   :  { %v502_v12 = vmul.f32 %v1780_v10, %v500_v11 }
 0x439   :  { %504 = vrot.lane.b32.xlu1 %v502_v12, %s1885_s3 }
 0x492   :  { %v424_v14 = vpop.permute.xlu0 %423 }
 0x493   :  { %v2051_v15 = vadd.f32 %v424_v14, %v416_v13 }
 0x495   :  { %1781 = vtanh.f32 %v2051_v15 }
 0x49f   :  { %v1782_v16 = vpop.eup %1781 }
 0x4a0   :  { %429 = vrot.lane.b32.xlu0 %v1782_v16, %s1884_s0 }
 0x4ab   :  { %v505_v18 = vpop.permute.xlu1 %504 }
 0x4ac   :  { %v2056_v19 = vadd.f32 %v505_v18, %v497_v17 }
 0x4ae   :  { %1783 = vtanh.f32 %v2056_v19 }
 0x4b8   :  { %v1784_v21 = vpop.eup %1783 }
 0x4b9   :  { %510 = vrot.lane.b32.xlu1 %v1784_v21, %s1884_s0 }
 0x512   :  { %v430_v23 = vpop.permute.xlu0 %429 }
 0x513   :  { %v432_v20 = vmul.f32 %v1776_v2, %v430_v23 }
 0x515   :  { %v2060_v25 = vpack.c.bf16 %v432_v20, %v432_v20 }
 0x517   :  { %525 = vrot.lane.b32.xlu0 %v2060_v25, %s1885_s3 }
 0x52b   :  { %v511_v28 = vpop.permute.xlu1 %510 }
 0x52c   :  { %v513_v29 = vmul.f32 %v1780_v10, %v511_v28 }
 0x52e   :  { %v2064_v30 = vpack.c.bf16 %v513_v29, %v513_v29 }
 0x530   :  { %606 = vrot.lane.b32.xlu1 %v2064_v30, %s1885_s3 }
 0x589   :  { %v526_v26 = vpop.permute.xlu0 %525 }
 0x58a   :  { %1646 = vmatmul.mubr.msk.bf16.vlgmr.msra.gmra.mrb[16].mxu0 %vm194_vm2, %v526_v26 }
 0x58b   :  { %1658 = vmatpush3.bf16.msra.mxu0 %v1918_v3  ;;  %1661 = vmatprep.mubr.msk.bf16.mxu0 %vm1883_vm0, %v1881_v0 }
 0x58c   :  { %1659 = vmatprep.subr.bf16.mxu0 %v1881_v0 }
 0x58f   :  { %1660 = vmatpush3.bf16.msra.mxu0 %v1933_v6 }
 0x590   :  { %1673 = vmatprep.subr.bf16.mxu0 %v1881_v0 }
 0x5a2   :  { %v607_v32 = vpop.permute.xlu1 %606 }
 0x5a3   :  { %1654 = vmatmul.mubr.msk.bf16.vlgmr.msra.gmra.mrb[16].mxu1 %vm194_vm2, %v607_v32 }
 0x5a4   :  { %1666 = vmatpush3.bf16.msra.mxu1 %v1941_v7  ;;  %1669 = vmatprep.mubr.msk.bf16.mxu1 %vm1883_vm0, %v1881_v0 }
 0x5a5   :  { %1667 = vmatprep.subr.bf16.mxu1 %v1881_v0 }
 0x5a8   :  { %1668 = vmatpush3.bf16.msra.mxu1 %v1953_v9 }
 0x5a9   :  { %1681 = vmatprep.subr.bf16.mxu1 %v1881_v0 }
 0x65d   :  { %v564_v34 = vpop.f32.mrb[16].mxu0 }
 0x65e   :  { %v570_v38 = vadd.f32 %v564_v34, %v1988_v33  ;;  %v1647_v39 = vpop.f32.mrb[17].mxu0 }
 0x65f   :  { %v567_v41 = vpop.f32.mrb[18].mxu0 }
 0x660   :  { %1785 = vtanh.f32 %v570_v38  ;;  %v1648_v42 = vpop.f32.mrb[19].mxu0  ;;  %v571_v55 = vsub.f32 0.0, %v570_v38 }
 0x662   :  { %v572_v57 = vmul.f32 1.442695, %v571_v55 }
 0x66a   :  { %v1786_v43 = vpop.eup %1785 }
 0x66b   :  { %580 = vrot.lane.b32.xlu0 %v1786_v43, %s1884_s0 }
 0x676   :  { %v645_v44 = vpop.f32.mrb[16].mxu1 }
 0x677   :  { %v651_v45 = vadd.f32 %v645_v44, %v2003_v52  ;;  %v1655_v47 = vpop.f32.mrb[17].mxu1 }
 0x678   :  { %v648_v49 = vpop.f32.mrb[18].mxu1 }
 0x679   :  { %1787 = vtanh.f32 %v651_v45  ;;  %v1656_v51 = vpop.f32.mrb[19].mxu1  ;;  %v652_v60 = vsub.f32 0.0, %v651_v45 }
 0x67a   :  { %1789 = vpow2.f32 %v572_v57 }
 0x67b   :  { %v653_v61 = vmul.f32 1.442695, %v652_v60 }
 0x683   :  { %v1788_v53 = vpop.eup %1787 }
 0x684   :  { %661 = vrot.lane.b32.xlu1 %v1788_v53, %s1884_s0  ;;  %v1790_v33 = vpop.eup %1789 }
 0x685   :  { %v574_v59 = vadd.f32 1.0, %v1790_v33 }
 0x687   :  { %1791 = vrcp.f32 %v574_v59 }
 0x688   :  { %1793 = vpow2.f32 %v653_v61 }
 0x691   :  { %v1792_v24 = vpop.eup %1791 }
 0x692   :  { %v1794_v52 = vpop.eup %1793  ;;  %v578_v56 = vmul.f32 %v1792_v24, %v2051_v15 }
 0x693   :  { %v655_v1 = vadd.f32 1.0, %v1794_v52 }
 0x695   :  { %1795 = vrcp.f32 %v655_v1 }
 0x69f   :  { %v1796_v2 = vpop.eup %1795 }
 0x6a0   :  { %v659_v12 = vmul.f32 %v1796_v2, %v2056_v19 }
 0x6dd   :  { %v581_v62 = vpop.permute.xlu0 %580 }
 0x6de   :  { %v583_v63 = vmul.f32 %v1792_v24, %v581_v62 }
 0x6e0   :  { %585 = vrot.lane.b32.xlu0 %v583_v63, %s1885_s3 }
 0x6f6   :  { %v662_v4 = vpop.permute.xlu1 %661 }
 0x6f7   :  { %v664_v5 = vmul.f32 %v1796_v2, %v662_v4 }
 0x6f9   :  { %666 = vrot.lane.b32.xlu1 %v664_v5, %s1885_s3 }
 0x752   :  { %v586_v8 = vpop.permute.xlu0 %585 }
 0x753   :  { %v2089_v10 = vadd.f32 %v586_v8, %v578_v56 }
 0x755   :  { %1797 = vtanh.f32 %v2089_v10 }
 0x75f   :  { %v1798_v11 = vpop.eup %1797 }
 0x760   :  { %591 = vrot.lane.b32.xlu0 %v1798_v11, %s1884_s0 }
 0x76b   :  { %v667_v13 = vpop.permute.xlu1 %666 }
 0x76c   :  { %v2094_v14 = vadd.f32 %v667_v13, %v659_v12 }
 0x76e   :  { %1799 = vtanh.f32 %v2094_v14 }
 0x778   :  { %v1800_v16 = vpop.eup %1799 }
 0x779   :  { %672 = vrot.lane.b32.xlu1 %v1800_v16, %s1884_s0 }
 0x7d2   :  { %v592_v17 = vpop.permute.xlu0 %591 }
 0x7d3   :  { %v594_v15 = vmul.f32 %v1792_v24, %v592_v17 }
 0x7d5   :  { %v2098_v18 = vpack.c.bf16 %v594_v15, %v594_v15 }
 0x7d7   :  { %687 = vrot.lane.b32.xlu0 %v2098_v18, %s1885_s3 }
 0x7eb   :  { %v673_v21 = vpop.permute.xlu1 %672 }
 0x7ec   :  { %v675_v23 = vmul.f32 %v1796_v2, %v673_v21 }
 0x7ee   :  { %v2102_v20 = vpack.c.bf16 %v675_v23, %v675_v23 }
 0x7f0   :  { %768 = vrot.lane.b32.xlu1 %v2102_v20, %s1885_s3 }
 0x849   :  { %v688_v19 = vpop.permute.xlu0 %687 }
 0x84a   :  { %1662 = vmatmul.mubr.msk.bf16.vlgmr.msra.gmra.mrb[20].mxu0 %vm194_vm2, %v688_v19 }
 0x84b   :  { %1674 = vmatpush3.bf16.msra.mxu0 %v1918_v3  ;;  %1677 = vmatprep.mubr.msk.bf16.mxu0 %vm1883_vm0, %v1881_v0 }
 0x84c   :  { %1675 = vmatprep.subr.bf16.mxu0 %v1881_v0 }
 0x84f   :  { %1676 = vmatpush3.bf16.msra.mxu0 %v1933_v6 }
 0x850   :  { %1689 = vmatprep.subr.bf16.mxu0 %v1881_v0 }
 0x862   :  { %v769_v28 = vpop.permute.xlu1 %768 }
 0x863   :  { %1670 = vmatmul.mubr.msk.bf16.vlgmr.msra.gmra.mrb[20].mxu1 %vm194_vm2, %v769_v28 }
 0x864   :  { %1682 = vmatpush3.bf16.msra.mxu1 %v1941_v7  ;;  %1685 = vmatprep.mubr.msk.bf16.mxu1 %vm1883_vm0, %v1881_v0 }
 0x865   :  { %1683 = vmatprep.subr.bf16.mxu1 %v1881_v0 }
 0x868   :  { %1684 = vmatpush3.bf16.msra.mxu1 %v1953_v9 }
 0x869   :  { %1697 = vmatprep.subr.bf16.mxu1 %v1881_v0 }
 0x91d   :  { %v726_v29 = vpop.f32.mrb[20].mxu0 }
 0x91e   :  { %v732_v26 = vadd.f32 %v726_v29, %v1992_v37  ;;  %v1663_v32 = vpop.f32.mrb[21].mxu0 }
 0x91f   :  { %v729_v34 = vpop.f32.mrb[22].mxu0 }
 0x920   :  { %1801 = vtanh.f32 %v732_v26  ;;  %v1664_v38 = vpop.f32.mrb[23].mxu0  ;;  %v733_v49 = vsub.f32 0.0, %v732_v26 }
 0x922   :  { %v734_v51 = vmul.f32 1.442695, %v733_v49 }
 0x92a   :  { %v1802_v39 = vpop.eup %1801 }
 0x92b   :  { %742 = vrot.lane.b32.xlu0 %v1802_v39, %s1884_s0 }
 0x936   :  { %v807_v41 = vpop.f32.mrb[20].mxu1 }
 0x937   :  { %v813_v42 = vadd.f32 %v807_v41, %v1999_v48  ;;  %v1671_v43 = vpop.f32.mrb[21].mxu1 }
 0x938   :  { %v810_v44 = vpop.f32.mrb[22].mxu1 }
 0x939   :  { %1803 = vtanh.f32 %v813_v42  ;;  %v1672_v45 = vpop.f32.mrb[23].mxu1  ;;  %v814_v55 = vsub.f32 0.0, %v813_v42 }
 0x93a   :  { %1805 = vpow2.f32 %v734_v51 }
 0x93b   :  { %v815_v57 = vmul.f32 1.442695, %v814_v55 }
 0x943   :  { %v1804_v47 = vpop.eup %1803 }
 0x944   :  { %823 = vrot.lane.b32.xlu1 %v1804_v47, %s1884_s0  ;;  %v1806_v37 = vpop.eup %1805 }
 0x945   :  { %v736_v53 = vadd.f32 1.0, %v1806_v37 }
 0x947   :  { %1807 = vrcp.f32 %v736_v53 }
 0x948   :  { %1809 = vpow2.f32 %v815_v57 }
 0x951   :  { %v1808_v33 = vpop.eup %1807 }
 0x952   :  { %v1810_v48 = vpop.eup %1809  ;;  %v740_v52 = vmul.f32 %v1808_v33, %v2089_v10 }
 0x953   :  { %v817_v61 = vadd.f32 1.0, %v1810_v48 }
 0x955   :  { %1811 = vrcp.f32 %v817_v61 }
 0x95f   :  { %v1812_v24 = vpop.eup %1811 }
 0x960   :  { %v821_v5 = vmul.f32 %v1812_v24, %v2094_v14 }
 0x99d   :  { %v743_v59 = vpop.permute.xlu0 %742 }
 0x99e   :  { %v745_v60 = vmul.f32 %v1808_v33, %v743_v59 }
 0x9a0   :  { %747 = vrot.lane.b32.xlu0 %v745_v60, %s1885_s3 }
 0x9b6   :  { %v824_v62 = vpop.permute.xlu1 %823 }
 0x9b7   :  { %v826_v63 = vmul.f32 %v1812_v24, %v824_v62 }
 0x9b9   :  { %828 = vrot.lane.b32.xlu1 %v826_v63, %s1885_s3 }
 0xa12   :  { %v748_v1 = vpop.permute.xlu0 %747 }
 0xa13   :  { %v2127_v2 = vadd.f32 %v748_v1, %v740_v52 }
 0xa15   :  { %1813 = vtanh.f32 %v2127_v2 }
 0xa1f   :  { %v1814_v4 = vpop.eup %1813 }
 0xa20   :  { %753 = vrot.lane.b32.xlu0 %v1814_v4, %s1884_s0 }
 0xa2b   :  { %v829_v56 = vpop.permute.xlu1 %828 }
 0xa2c   :  { %v2132_v8 = vadd.f32 %v829_v56, %v821_v5 }
 0xa2e   :  { %1815 = vtanh.f32 %v2132_v8 }
 0xa38   :  { %v1816_v11 = vpop.eup %1815 }
 0xa39   :  { %834 = vrot.lane.b32.xlu1 %v1816_v11, %s1884_s0 }
 0xa92   :  { %v754_v12 = vpop.permute.xlu0 %753 }
 0xa93   :  { %v756_v10 = vmul.f32 %v1808_v33, %v754_v12 }
 0xa95   :  { %v2136_v13 = vpack.c.bf16 %v756_v10, %v756_v10 }
 0xa97   :  { %848 = vrot.lane.b32.xlu0 %v2136_v13, %s1885_s3 }
 0xaab   :  { %v835_v16 = vpop.permute.xlu1 %834 }
 0xaac   :  { %v837_v17 = vmul.f32 %v1812_v24, %v835_v16 }
 0xaae   :  { %v2140_v15 = vpack.c.bf16 %v837_v17, %v837_v17 }
 0xab0   :  { %927 = vrot.lane.b32.xlu1 %v2140_v15, %s1885_s3 }
 0xb09   :  { %v849_v14 = vpop.permute.xlu0 %848 }
 0xb0a   :  { %1678 = vmatmul.mubr.msk.bf16.vlgmr.msra.gmra.mrb[24].mxu0 %vm194_vm2, %v849_v14 }
 0xb0b   :  { %1690 = vmatpush3.bf16.msra.mxu0 %v1918_v3  ;;  %1693 = vmatprep.mubr.msk.bf16.mxu0 %vm1883_vm0, %v1881_v0 }
 0xb0c   :  { %1691 = vmatprep.subr.bf16.mxu0 %v1881_v0 }
 0xb0f   :  { %1692 = vmatpush3.bf16.msra.mxu0 %v1933_v6 }
 0xb10   :  { %1705 = vmatprep.subr.bf16.mxu0 %v1881_v0 }
 0xb22   :  { %v928_v21 = vpop.permute.xlu1 %927 }
 0xb23   :  { %1686 = vmatmul.mubr.msk.bf16.vlgmr.msra.gmra.mrb[24].mxu1 %vm194_vm2, %v928_v21 }
 0xb24   :  { %1698 = vmatpush3.bf16.msra.mxu1 %v1941_v7  ;;  %1701 = vmatprep.mubr.msk.bf16.mxu1 %vm1883_vm0, %v1881_v0 }
 0xb25   :  { %1699 = vmatprep.subr.bf16.mxu1 %v1881_v0 }
 0xb28   :  { %1700 = vmatpush3.bf16.msra.mxu1 %v1953_v9 }
 0xb29   :  { %1713 = vmatprep.subr.bf16.mxu1 %v1881_v0 }
 0xbdd   :  { %v887_v23 = vpop.f32.mrb[24].mxu0 }
 0xbde   :  { %v893_v19 = vadd.f32 %v887_v23, %v1996_v46  ;;  %v1679_v28 = vpop.f32.mrb[25].mxu0 }
 0xbdf   :  { %v890_v29 = vpop.f32.mrb[26].mxu0 }
 0xbe0   :  { %1817 = vtanh.f32 %v893_v19  ;;  %v1680_v26 = vpop.f32.mrb[27].mxu0  ;;  %v894_v44 = vsub.f32 0.0, %v893_v19 }
 0xbe2   :  { %v895_v45 = vmul.f32 1.442695, %v894_v44 }
 0xbea   :  { %v1818_v32 = vpop.eup %1817 }
 0xbeb   :  { %903 = vrot.lane.b32.xlu0 %v1818_v32, %s1884_s0 }
 0xbf6   :  { %v966_v34 = vpop.f32.mrb[24].mxu1 }
 0xbf7   :  { %v972_v38 = vadd.f32 %v966_v34, %v1994_v40  ;;  %v1687_v39 = vpop.f32.mrb[25].mxu1 }
 0xbf8   :  { %v969_v41 = vpop.f32.mrb[26].mxu1 }
 0xbf9   :  { %1819 = vtanh.f32 %v972_v38  ;;  %v1688_v42 = vpop.f32.mrb[27].mxu1  ;;  %v973_v49 = vsub.f32 0.0, %v972_v38 }
 0xbfa   :  { %1821 = vpow2.f32 %v895_v45 }
 0xbfb   :  { %v974_v51 = vmul.f32 1.442695, %v973_v49 }
 0xc03   :  { %v1820_v43 = vpop.eup %1819 }
 0xc04   :  { %982 = vrot.lane.b32.xlu1 %v1820_v43, %s1884_s0  ;;  %v1822_v46 = vpop.eup %1821 }
 0xc05   :  { %v897_v47 = vadd.f32 1.0, %v1822_v46 }
 0xc07   :  { %1823 = vrcp.f32 %v897_v47 }
 0xc08   :  { %1825 = vpow2.f32 %v974_v51 }
 0xc11   :  { %v1824_v37 = vpop.eup %1823 }
 0xc12   :  { %v1826_v40 = vpop.eup %1825  ;;  %v901_v48 = vmul.f32 %v1824_v37, %v2127_v2 }
 0xc13   :  { %v976_v57 = vadd.f32 1.0, %v1826_v40 }
 0xc15   :  { %1827 = vrcp.f32 %v976_v57 }
 0xc1f   :  { %v1828_v33 = vpop.eup %1827 }
 0xc20   :  { %v980_v63 = vmul.f32 %v1828_v33, %v2132_v8 }
 0xc5d   :  { %v904_v53 = vpop.permute.xlu0 %903 }
 0xc5e   :  { %v906_v55 = vmul.f32 %v1824_v37, %v904_v53 }
 0xc60   :  { %908 = vrot.lane.b32.xlu0 %v906_v55, %s1885_s3 }
 0xc76   :  { %v983_v59 = vpop.permute.xlu1 %982 }
 0xc77   :  { %v985_v60 = vmul.f32 %v1828_v33, %v983_v59 }
 0xc79   :  { %987 = vrot.lane.b32.xlu1 %v985_v60, %s1885_s3 }
 0xcd2   :  { %v909_v61 = vpop.permute.xlu0 %908 }
 0xcd3   :  { %v2165_v24 = vadd.f32 %v909_v61, %v901_v48 }
 0xcd5   :  { %1829 = vtanh.f32 %v2165_v24 }
 0xcdf   :  { %v1830_v62 = vpop.eup %1829 }
 0xce0   :  { %914 = vrot.lane.b32.xlu0 %v1830_v62, %s1884_s0 }
 0xceb   :  { %v988_v52 = vpop.permute.xlu1 %987 }
 0xcec   :  { %v2170_v1 = vadd.f32 %v988_v52, %v980_v63 }
 0xcee   :  { %1831 = vtanh.f32 %v2170_v1 }
 0xcf8   :  { %v1832_v4 = vpop.eup %1831 }
 0xcf9   :  { %993 = vrot.lane.b32.xlu1 %v1832_v4, %s1884_s0 }
 0xd52   :  { %v915_v5 = vpop.permute.xlu0 %914 }
 0xd53   :  { %v917_v2 = vmul.f32 %v1824_v37, %v915_v5 }
 0xd55   :  { %v2174_v56 = vpack.c.bf16 %v917_v2, %v917_v2 }
 0xd57   :  { %1006 = vrot.lane.b32.xlu0 %v2174_v56, %s1885_s3 }
 0xd6b   :  { %v994_v11 = vpop.permute.xlu1 %993 }
 0xd6c   :  { %v996_v12 = vmul.f32 %v1828_v33, %v994_v11 }
 0xd6e   :  { %v2178_v10 = vpack.c.bf16 %v996_v12, %v996_v12 }
 0xd70   :  { %1085 = vrot.lane.b32.xlu1 %v2178_v10, %s1885_s3 }
 0xdc9   :  { %v1007_v8 = vpop.permute.xlu0 %1006 }
 0xdca   :  { %1694 = vmatmul.mubr.msk.bf16.vlgmr.msra.gmra.mrb[28].mxu0 %vm194_vm2, %v1007_v8 }
 0xdcb   :  { %1706 = vmatpush3.bf16.msra.mxu0 %v1918_v3  ;;  %1709 = vmatprep.mubr.msk.bf16.mxu0 %vm1883_vm0, %v1881_v0 }
 0xdcc   :  { %1707 = vmatprep.subr.bf16.mxu0 %v1881_v0 }
 0xdcf   :  { %1708 = vmatpush3.bf16.msra.mxu0 %v1933_v6 }
 0xdd0   :  { %1721 = vmatprep.subr.bf16.mxu0 %v1881_v0 }
 0xde2   :  { %v1086_v16 = vpop.permute.xlu1 %1085 }
 0xde3   :  { %1702 = vmatmul.mubr.msk.bf16.vlgmr.msra.gmra.mrb[28].mxu1 %vm194_vm2, %v1086_v16 }
 0xde4   :  { %1714 = vmatpush3.bf16.msra.mxu1 %v1941_v7  ;;  %1717 = vmatprep.mubr.msk.bf16.mxu1 %vm1883_vm0, %v1881_v0 }
 0xde5   :  { %1715 = vmatprep.subr.bf16.mxu1 %v1881_v0 }
 0xde8   :  { %1716 = vmatpush3.bf16.msra.mxu1 %v1953_v9 }
 0xde9   :  { %1729 = vmatprep.subr.bf16.mxu1 %v1881_v0 }
 0xe9d   :  { %v1045_v17 = vpop.f32.mrb[28].mxu0 }
 0xe9e   :  { %v1051_v14 = vadd.f32 %v1045_v17, %v2001_v50  ;;  %v1695_v21 = vpop.f32.mrb[29].mxu0 }
 0xe9f   :  { %v1048_v23 = vpop.f32.mrb[30].mxu0 }
 0xea0   :  { %1833 = vtanh.f32 %v1051_v14  ;;  %v1696_v19 = vpop.f32.mrb[31].mxu0  ;;  %v1052_v41 = vsub.f32 0.0, %v1051_v14 }
 0xea2   :  { %v1053_v42 = vmul.f32 1.442695, %v1052_v41 }
 0xeaa   :  { %v1834_v28 = vpop.eup %1833 }
 0xeab   :  { %1061 = vrot.lane.b32.xlu0 %v1834_v28, %s1884_s0 }
 0xeb6   :  { %v1124_v29 = vpop.f32.mrb[28].mxu1 }
 0xeb7   :  { %v1130_v26 = vadd.f32 %v1124_v29, %v1990_v35  ;;  %v1703_v32 = vpop.f32.mrb[29].mxu1 }
 0xeb8   :  { %v1127_v34 = vpop.f32.mrb[30].mxu1 }
 0xeb9   :  { %1835 = vtanh.f32 %v1130_v26  ;;  %v1704_v38 = vpop.f32.mrb[31].mxu1  ;;  %v1131_v44 = vsub.f32 0.0, %v1130_v26 }
 0xeba   :  { %1837 = vpow2.f32 %v1053_v42 }
 0xebb   :  { %v1132_v45 = vmul.f32 1.442695, %v1131_v44 }
 0xec3   :  { %v1836_v39 = vpop.eup %1835 }
 0xec4   :  { %1140 = vrot.lane.b32.xlu1 %v1836_v39, %s1884_s0  ;;  %v1838_v50 = vpop.eup %1837 }
 0xec5   :  { %v1055_v43 = vadd.f32 1.0, %v1838_v50 }
 0xec7   :  { %1839 = vrcp.f32 %v1055_v43 }
 0xec8   :  { %1841 = vpow2.f32 %v1132_v45 }
 0xed1   :  { %v1840_v46 = vpop.eup %1839 }
 0xed2   :  { %v1842_v35 = vpop.eup %1841  ;;  %v1059_v40 = vmul.f32 %v1840_v46, %v2165_v24 }
 0xed3   :  { %v1134_v51 = vadd.f32 1.0, %v1842_v35 }
 0xed5   :  { %1843 = vrcp.f32 %v1134_v51 }
 0xedf   :  { %v1844_v37 = vpop.eup %1843 }
 0xee0   :  { %v1138_v60 = vmul.f32 %v1844_v37, %v2170_v1 }
 0xf1d   :  { %v1062_v47 = vpop.permute.xlu0 %1061 }
 0xf1e   :  { %v1064_v49 = vmul.f32 %v1840_v46, %v1062_v47 }
 0xf20   :  { %1066 = vrot.lane.b32.xlu0 %v1064_v49, %s1885_s3 }
 0xf36   :  { %v1141_v53 = vpop.permute.xlu1 %1140 }
 0xf37   :  { %v1143_v55 = vmul.f32 %v1844_v37, %v1141_v53 }
 0xf39   :  { %1145 = vrot.lane.b32.xlu1 %v1143_v55, %s1885_s3 }
 0xf92   :  { %v1067_v57 = vpop.permute.xlu0 %1066 }
 0xf93   :  { %v2203_v33 = vadd.f32 %v1067_v57, %v1059_v40 }
 0xf95   :  { %1845 = vtanh.f32 %v2203_v33 }
 0xf9f   :  { %v1846_v59 = vpop.eup %1845 }
 0xfa0   :  { %1072 = vrot.lane.b32.xlu0 %v1846_v59, %s1884_s0 }
 0xfab   :  { %v1146_v48 = vpop.permute.xlu1 %1145 }
 0xfac   :  { %v2208_v61 = vadd.f32 %v1146_v48, %v1138_v60 }
 0xfae   :  { %1847 = vtanh.f32 %v2208_v61 }
 0xfb8   :  { %v1848_v62 = vpop.eup %1847 }
 0xfb9   :  { %1151 = vrot.lane.b32.xlu1 %v1848_v62, %s1884_s0 }
0x1012   :  { %v1073_v63 = vpop.permute.xlu0 %1072 }
0x1013   :  { %v1075_v24 = vmul.f32 %v1840_v46, %v1073_v63 }
0x1015   :  { %v2212_v52 = vpack.c.bf16 %v1075_v24, %v1075_v24 }
0x1017   :  { %1164 = vrot.lane.b32.xlu0 %v2212_v52, %s1885_s3 }
0x102b   :  { %v1152_v4 = vpop.permute.xlu1 %1151 }
0x102c   :  { %v1154_v5 = vmul.f32 %v1844_v37, %v1152_v4 }
0x102e   :  { %v2216_v2 = vpack.c.bf16 %v1154_v5, %v1154_v5 }
0x1030   :  { %1243 = vrot.lane.b32.xlu1 %v2216_v2, %s1885_s3 }
0x1089   :  { %v1165_v1 = vpop.permute.xlu0 %1164 }
0x108a   :  { %1710 = vmatmul.mubr.msk.bf16.vlgmr.msra.gmra.mrb[32].mxu0 %vm194_vm2, %v1165_v1 }
0x108b   :  { %1722 = vmatpush3.bf16.msra.mxu0 %v1918_v3  ;;  %1725 = vmatprep.mubr.msk.bf16.mxu0 %vm1883_vm0, %v1881_v0 }
0x108c   :  { %1723 = vmatprep.subr.bf16.mxu0 %v1881_v0 }
0x108f   :  { %1724 = vmatpush3.bf16.msra.mxu0 %v1933_v6 }
0x10a2   :  { %v1244_v11 = vpop.permute.xlu1 %1243 }
0x10a3   :  { %1718 = vmatmul.mubr.msk.bf16.vlgmr.msra.gmra.mrb[32].mxu1 %vm194_vm2, %v1244_v11 }
0x10a4   :  { %1730 = vmatpush3.bf16.msra.mxu1 %v1941_v7  ;;  %1733 = vmatprep.mubr.msk.bf16.mxu1 %vm1883_vm0, %v1881_v0 }
0x10a5   :  { %1731 = vmatprep.subr.bf16.mxu1 %v1881_v0 }
0x10a8   :  { %1732 = vmatpush3.bf16.msra.mxu1 %v1953_v9 }
0x115d   :  { %v1203_v3 = vpop.f32.mrb[32].mxu0 }
0x115e   :  { %v1209_v12 = vadd.f32 %v1203_v3, %v2005_v54  ;;  %v1711_v8 = vpop.f32.mrb[33].mxu0 }
0x115f   :  { %v1206_v16 = vpop.f32.mrb[34].mxu0 }
0x1160   :  { %1849 = vtanh.f32 %v1209_v12  ;;  %v1712_v17 = vpop.f32.mrb[35].mxu0  ;;  %v1210_v9 = vsub.f32 0.0, %v1209_v12 }
0x1162   :  { %v1211_v28 = vmul.f32 1.442695, %v1210_v9 }
0x116a   :  { %v1850_v6 = vpop.eup %1849 }
0x116b   :  { %1219 = vrot.lane.b32.xlu0 %v1850_v6, %s1884_s0 }
0x1176   :  { %v1282_v14 = vpop.f32.mrb[32].mxu1 }
0x1177   :  { %v1288_v7 = vadd.f32 %v1282_v14, %v1986_v27  ;;  %v1719_v21 = vpop.f32.mrb[33].mxu1 }
0x1178   :  { %v1285_v23 = vpop.f32.mrb[34].mxu1 }
0x1179   :  { %1851 = vtanh.f32 %v1288_v7  ;;  %v1720_v19 = vpop.f32.mrb[35].mxu1  ;;  %v1289_v26 = vsub.f32 0.0, %v1288_v7 }
0x117a   :  { %1853 = vpow2.f32 %v1211_v28 }
0x117b   :  { %v1290_v32 = vmul.f32 1.442695, %v1289_v26 }
0x1183   :  { %v1852_v0 = vpop.eup %1851 }
0x1184   :  { %1298 = vrot.lane.b32.xlu1 %v1852_v0, %s1884_s0  ;;  %v1854_v54 = vpop.eup %1853 }
0x1185   :  { %v1213_v29 = vadd.f32 1.0, %v1854_v54 }
0x1187   :  { %1855 = vrcp.f32 %v1213_v29 }
0x1188   :  { %1857 = vpow2.f32 %v1290_v32 }
0x1191   :  { %v1856_v34 = vpop.eup %1855 }
0x1192   :  { %v1858_v27 = vpop.eup %1857  ;;  %v1217_v44 = vmul.f32 %v1856_v34, %v2203_v33 }
0x1193   :  { %v1292_v41 = vadd.f32 1.0, %v1858_v27 }
0x1195   :  { %1859 = vrcp.f32 %v1292_v41 }
0x119f   :  { %v1860_v42 = vpop.eup %1859 }
0x11a0   :  { %v1296_v49 = vmul.f32 %v1860_v42, %v2208_v61 }
0x11dd   :  { %v1220_v38 = vpop.permute.xlu0 %1219 }
0x11de   :  { %v1222_v39 = vmul.f32 %v1856_v34, %v1220_v38 }
0x11e0   :  { %1224 = vrot.lane.b32.xlu0 %v1222_v39, %s1885_s3 }
0x11f6   :  { %v1299_v50 = vpop.permute.xlu1 %1298 }
0x11f7   :  { %v1301_v43 = vmul.f32 %v1860_v42, %v1299_v50 }
0x11f9   :  { %1303 = vrot.lane.b32.xlu1 %v1301_v43, %s1885_s3 }
0x1252   :  { %v1225_v45 = vpop.permute.xlu0 %1224 }
0x1253   :  { %v1227_v46 = vadd.f32 %v1225_v45, %v1217_v44 }
0x1255   :  { %1861 = vtanh.f32 %v1227_v46 }
0x125f   :  { %v1862_v47 = vpop.eup %1861 }
0x1260   :  { %1230 = vrot.lane.b32.xlu0 %v1862_v47, %s1884_s0 }
0x126b   :  { %v1304_v35 = vpop.permute.xlu1 %1303 }
0x126c   :  { %v1306_v51 = vadd.f32 %v1304_v35, %v1296_v49 }
0x126e   :  { %1863 = vtanh.f32 %v1306_v51 }
0x1278   :  { %v1864_v37 = vpop.eup %1863 }
0x1279   :  { %1309 = vrot.lane.b32.xlu1 %v1864_v37, %s1884_s0 }
0x12d2   :  { %v1231_v53 = vpop.permute.xlu0 %1230 }
0x12d3   :  { %v1233_v55 = vmul.f32 %v1856_v34, %v1231_v53 }
0x12d5   :  { %v2242_v40 = vpack.c.bf16 %v1233_v55, %v1233_v55 }
0x12d7   :  { %1322 = vrot.lane.b32.xlu0 %v2242_v40, %s1885_s3 }
0x12eb   :  { %v1310_v57 = vpop.permute.xlu1 %1309 }
0x12ec   :  { %v1312_v33 = vmul.f32 %v1860_v42, %v1310_v57 }
0x12ee   :  { %v2246_v59 = vpack.c.bf16 %v1312_v33, %v1312_v33 }
0x12f0   :  { %1401 = vrot.lane.b32.xlu1 %v2246_v59, %s1885_s3 }
0x1349   :  { %v1323_v60 = vpop.permute.xlu0 %1322 }
0x134a   :  { %1726 = vmatmul.mubr.msk.bf16.vlgmr.msra.gmra.mrb[36].mxu0 %vm194_vm2, %v1323_v60 }
0x1362   :  { %v1402_v48 = vpop.permute.xlu1 %1401 }
0x1363   :  { %1734 = vmatmul.mubr.msk.bf16.vlgmr.msra.gmra.mrb[36].mxu1 %vm194_vm2, %v1402_v48 }
0x141d   :  { %v1361_v61 = vpop.f32.mrb[36].mxu0 }
0x141e   :  { %v1367_v62 = vadd.f32 %v1361_v61, %v2009_v58  ;;  %v1727_v63 = vpop.f32.mrb[37].mxu0 }
0x141f   :  { %v1364_v24 = vpop.f32.mrb[38].mxu0 }
0x1420   :  { %1865 = vtanh.f32 %v1367_v62  ;;  %v1728_v4 = vpop.f32.mrb[39].mxu0  ;;  %v1368_v17 = vsub.f32 0.0, %v1367_v62 }
0x1422   :  { %v1369_v6 = vmul.f32 1.442695, %v1368_v17 }
0x142a   :  { %v1866_v5 = vpop.eup %1865 }
0x142b   :  { %1377 = vrot.lane.b32.xlu0 %v1866_v5, %s1884_s0 }
0x1436   :  { %v1440_v1 = vpop.f32.mrb[36].mxu1 }
0x1437   :  { %v1446_v11 = vadd.f32 %v1440_v1, %v1982_v22  ;;  %v1735_v3 = vpop.f32.mrb[37].mxu1 }
0x1438   :  { %v1443_v12 = vpop.f32.mrb[38].mxu1 }
0x1439   :  { %1867 = vtanh.f32 %v1446_v11  ;;  %v1736_v8 = vpop.f32.mrb[39].mxu1  ;;  %v1447_v7 = vsub.f32 0.0, %v1446_v11 }
0x143a   :  { %1869 = vpow2.f32 %v1369_v6 }
0x143b   :  { %v1448_v21 = vmul.f32 1.442695, %v1447_v7 }
0x1443   :  { %v1868_v16 = vpop.eup %1867 }
0x1444   :  { %1456 = vrot.lane.b32.xlu1 %v1868_v16, %s1884_s0  ;;  %v1870_v58 = vpop.eup %1869 }
0x1445   :  { %v1371_v14 = vadd.f32 1.0, %v1870_v58 }
0x1447   :  { %1871 = vrcp.f32 %v1371_v14 }
0x1448   :  { %1873 = vpow2.f32 %v1448_v21 }
0x1451   :  { %v1872_v23 = vpop.eup %1871 }
0x1452   :  { %v1874_v22 = vpop.eup %1873  ;;  %v1375_v26 = vmul.f32 %v1872_v23, %v1227_v46 }
0x1453   :  { %v1450_v9 = vadd.f32 1.0, %v1874_v22 }
0x1455   :  { %1875 = vrcp.f32 %v1450_v9 }
0x145f   :  { %v1876_v28 = vpop.eup %1875 }
0x1460   :  { %v1454_v39 = vmul.f32 %v1876_v28, %v1306_v51 }
0x149d   :  { %v1378_v19 = vpop.permute.xlu0 %1377 }
0x149e   :  { %v1380_v0 = vmul.f32 %v1872_v23, %v1378_v19 }
0x14a0   :  { %1382 = vrot.lane.b32.xlu0 %v1380_v0, %s1885_s3 }
0x14b6   :  { %v1457_v54 = vpop.permute.xlu1 %1456 }
0x14b7   :  { %v1459_v29 = vmul.f32 %v1876_v28, %v1457_v54 }
0x14b9   :  { %1461 = vrot.lane.b32.xlu1 %v1459_v29, %s1885_s3 }
0x1512   :  { %v1383_v32 = vpop.permute.xlu0 %1382 }
0x1513   :  { %v1385_v34 = vadd.f32 %v1383_v32, %v1375_v26 }
0x1515   :  { %1877 = vtanh.f32 %v1385_v34 }
0x151f   :  { %v1878_v38 = vpop.eup %1877 }
0x1520   :  { %1388 = vrot.lane.b32.xlu0 %v1878_v38, %s1884_s0 }
0x1524   :  { %267 = vrot.lane.b32.xlu0 %v2022_v31, %s1885_s3 }
0x1528   :  { %437 = vrot.lane.b32.xlu0 %v2060_v25, %s1885_s3 }
0x152b   :  { %v1462_v27 = vpop.permute.xlu1 %1461 }
0x152c   :  { %599 = vrot.lane.b32.xlu0 %v2098_v18, %s1885_s3  ;;  %v1464_v41 = vadd.f32 %v1462_v27, %v1454_v39 }
0x152e   :  { %1879 = vtanh.f32 %v1464_v41 }
0x1530   :  { %761 = vrot.lane.b32.xlu0 %v2136_v13, %s1885_s3 }
0x1534   :  { %922 = vrot.lane.b32.xlu0 %v2174_v56, %s1885_s3 }
0x1538   :  { %1080 = vrot.lane.b32.xlu0 %v2212_v52, %s1885_s3  ;;  %v1880_v31 = vpop.eup %1879 }
0x1539   :  { %1467 = vrot.lane.b32.xlu1 %v1880_v31, %s1884_s0 }
0x153c   :  { %1238 = vrot.lane.b32.xlu0 %v2242_v40, %s1885_s3 }
0x153d   :  { %355 = vrot.lane.b32.xlu1 %v2026_v36, %s1884_s0 }
0x1541   :  { %518 = vrot.lane.b32.xlu1 %v2064_v30, %s1884_s0 }
0x1545   :  { %680 = vrot.lane.b32.xlu1 %v2102_v20, %s1884_s0 }
0x1549   :  { %842 = vrot.lane.b32.xlu1 %v2140_v15, %s1884_s0 }
0x154d   :  { %1001 = vrot.lane.b32.xlu1 %v2178_v10, %s1884_s0 }
0x1551   :  { %1159 = vrot.lane.b32.xlu1 %v2216_v2, %s1884_s0 }
0x1555   :  { %1317 = vrot.lane.b32.xlu1 %v2246_v59, %s1884_s0 }
0x1592   :  { %v1389_v25 = vpop.permute.xlu0 %1388 }
0x1593   :  { %v1391_v36 = vmul.f32 %v1872_v23, %v1389_v25 }
0x1595   :  { %v1559_v18 = vpack.c.bf16 %v1391_v36, %v1391_v36 }
0x1596   :  { %v268_v30 = vpop.permute.xlu0 %267 }
0x1597   :  { %271 = vst.msk [vmem:[%s2358_s4] sm:$0xf] %vm270_vm3, %v268_v30  ;;  %1396 = vrot.lane.b32.xlu0 %v1559_v18, %s1885_s3 }
0x159a   :  { %v438_v20 = vpop.permute.xlu0 %437 }
0x159b   :  { %1506 = vst.msk [vmem:[%s2358_s4 + $0x4] sm:$0xf] %vm270_vm3, %v438_v20 }
0x159e   :  { %v600_v13 = vpop.permute.xlu0 %599 }
0x159f   :  { %1512 = vst.msk [vmem:[%s2358_s4 + $0x8] sm:$0xf] %vm270_vm3, %v600_v13 }
0x15a2   :  { %v762_v15 = vpop.permute.xlu0 %761 }
0x15a3   :  { %1518 = vst.msk [vmem:[%s2358_s4 + $0xc] sm:$0xf] %vm270_vm3, %v762_v15 }
0x15a6   :  { %v923_v56 = vpop.permute.xlu0 %922 }
0x15aa   :  { %v1081_v2 = vpop.permute.xlu0 %1080 }
0x15ab   :  { %v1468_v10 = vpop.permute.xlu1 %1467 }
0x15ac   :  { %v1470_v52 = vmul.f32 %v1876_v28, %v1468_v10 }
0x15ae   :  { %v1560_v42 = vpack.c.bf16 %v1470_v52, %v1470_v52  ;;  %v1239_v44 = vpop.permute.xlu0 %1238 }
0x15af   :  { %v356_v50 = vpop.permute.xlu1 %355 }
0x15b0   :  { %1503 = vst.msk [vmem:[%s2358_s4 + $0x1c] sm:$0xf] %vm359_vm4, %v356_v50  ;;  %1475 = vrot.lane.b32.xlu1 %v1560_v42, %s1884_s0 }
0x15b3   :  { %v519_v43 = vpop.permute.xlu1 %518 }
0x15b4   :  { %1509 = vst.msk [vmem:[%s2358_s4 + $0x18] sm:$0xf] %vm359_vm4, %v519_v43 }
0x15b5   :  { %1536 = vst.msk [vmem:[%s2358_s4 + $0x18] sm:$0xf] %vm270_vm3, %v1239_v44 }
0x15b7   :  { %v681_v45 = vpop.permute.xlu1 %680 }
0x15b8   :  { %1515 = vst.msk [vmem:[%s2358_s4 + $0x14] sm:$0xf] %vm359_vm4, %v681_v45 }
0x15b9   :  { %1530 = vst.msk [vmem:[%s2358_s4 + $0x14] sm:$0xf] %vm270_vm3, %v1081_v2 }
0x15bb   :  { %v843_v46 = vpop.permute.xlu1 %842 }
0x15bc   :  { %1521 = vst.msk [vmem:[%s2358_s4 + $0x10] sm:$0xf] %vm359_vm4, %v843_v46 }
0x15bd   :  { %1524 = vst.msk [vmem:[%s2358_s4 + $0x10] sm:$0xf] %vm270_vm3, %v923_v56 }
0x15bf   :  { %v1002_v47 = vpop.permute.xlu1 %1001 }
0x15c0   :  { %1527 = vst.msk [vmem:[%s2358_s4 + $0xc] sm:$0xf] %vm359_vm4, %v1002_v47 }
0x15c3   :  { %v1160_v49 = vpop.permute.xlu1 %1159 }
0x15c4   :  { %1533 = vst.msk [vmem:[%s2358_s4 + $0x8] sm:$0xf] %vm359_vm4, %v1160_v49 }
0x15c7   :  { %v1318_v35 = vpop.permute.xlu1 %1317 }
0x15c8   :  { %1539 = vst.msk [vmem:[%s2358_s4 + $0x4] sm:$0xf] %vm359_vm4, %v1318_v35 }
0x1609   :  { %v1397_v51 = vpop.permute.xlu0 %1396 }
0x160a   :  { %1542 = vst.msk [vmem:[%s2358_s4 + $0x1c] sm:$0xf] %vm270_vm3, %v1397_v51 }
0x1622   :  { %v1476_v37 = vpop.permute.xlu1 %1475 }
0x1623   :  { %1478 = vst.msk [vmem:[%s2358_s4] sm:$0xf] %vm359_vm4, %v1476_v37 }

// kernel: attention_rnn_forward.4
= control target key start
LH: loop header
LB: loop body
LE: loop exit
PB: predicated region body
PF: predicated region fallthrough
CT: control target
= control target key end

     0   :  { %v1933_v1 = vmov 0.0   ;;  %v1934_v2 = vmov 0   ;;  %vm1935_vm0 = vmmov 0   ;;  %vm106_vm1 = vcmask 523264   ;;  %s2426_s1 = inlined_call_operand.vmem [shape: bf16[64,256], index: 1, kind: input, shape index: {}]   ;;  %s2427_s2 = inlined_call_operand.vmem [shape: bf16[2,32,128], index: 2, kind: input, shape index: {}]   ;;  %s2428_s0 = inlined_call_operand.vmem [shape: bf16[8,8,64], index: 0, kind: input, shape index: {}]   ;;  %s2429_s3 = inlined_call_operand.vmem [shape: f32[1,256], index: 3, kind: input, shape index: {}]   ;;  %s2430_s4 = inlined_call_operand.vmem [shape: bf16[8,8,64], index: 4, kind: output, shape index: {}]  }
   0x1   :  { %v1784_v0 = vld [vmem:[%s2426_s1 + $0x4] ss:$8 sps:$4 sm:$0xff]   ;;  %1651 = vmatprep.subr.bf16.mxu1 %v1933_v1  ;;  %151 = vmatprep.mubr.bf16.mxu0 %v1934_v2  ;;  %v1786_v3 = vld [vmem:[%s2426_s1] ss:$8 sps:$4 sm:$0xff]   ;;  %v1787_v4 = vld [vmem:[%s2426_s1 + $0x14] ss:$8 sps:$4 sm:$0xff]   ;;  %v36_v18 = vlaneseq }
   0x2   :  { %1655 = vmatprep.mubr.msk.bf16.mxu1 %vm1935_vm0, %v1933_v1  ;;  %119 = vmatprep.subr.bf16.mxu0 %v1784_v0  ;;  %v1789_v5 = vld [vmem:[%s2426_s1 + $0x10] ss:$8 sps:$4 sm:$0xff]   ;;  %v1790_v6 = vld [vmem:[%s2426_s1 + $0x24] ss:$8 sps:$4 sm:$0xff]   ;;  %v1792_v8 = vld [vmem:[%s2426_s1 + $0x20] ss:$8 sps:$4 sm:$0xff]  }
   0x3   :  { %120 = vmatpush1.bf16.msra.mxu0 %v1786_v3  ;;  %v1984_v7 = vld [vmem:[%s2427_s2] sm:$0xff]   ;;  %v1994_v9 = vld [vmem:[%s2427_s2 + $0x8] sm:$0xff]   ;;  %v1794_v10 = vld [vmem:[%s2426_s1 + $0x34] ss:$8 sps:$4 sm:$0xff]   ;;  %v37_v19 = vshrl.u32 %v36_v18, 7  ;;  %vm230_vm2 = vcmask 261120  }
   0x4   :  { %121 = vmatprep.subr.bf16.mxu0 %v1787_v4  ;;  %1652 = vmatpush3.bf16.msra.mxu1 %v1984_v7  ;;  %v1796_v11 = vld [vmem:[%s2426_s1 + $0x30] ss:$8 sps:$4 sm:$0xff]   ;;  %v1798_v13 = vld [vmem:[%s2428_s0] sm:$0xff]   ;;  %v1799_v15 = vld [vmem:[%s2428_s0 + $0x8] sm:$0xff]   ;;  %vm306_vm3 = vcmask 257024   ;;  %vm395_vm4 = vcmask 519424  }
   0x5   :  { %1653 = vmatprep.subr.bf16.mxu1 %v1933_v1  ;;  %v2007_v12 = vld [vmem:[%s2427_s2 + $0x10] sm:$0xff]   ;;  %v2016_v14 = vld [vmem:[%s2427_s2 + $0x18] sm:$0xff]   ;;  %v38_v20 = vsub.s32 0, %v37_v19  ;;  %v34_v21 = vld [vmem:[%s2429_s3] sm:$0x3]  ;;  %v42_v22 = vsub.s32 1, %v37_v19 }
   0x6   :  { %v1800_v16 = vld [vmem:[%s2428_s0 + $0x10] sm:$0xff]   ;;  %v1803_v17 = vld [vmem:[%s2428_s0 + $0x18] sm:$0xff]   ;;  %s1936_s0 = smov 64   ;;  %s1937_s3 = smov 32  }
   0x7   :  { %122 = vmatpush1.bf16.msra.mxu0 %v1789_v5  ;;  %v39_v25 = vrot.slane %v34_v21, %v38_v20  ;;  %v43_v27 = vrot.slane %v34_v21, %v42_v22 }
   0x8   :  { %123 = vmatprep.subr.bf16.mxu0 %v1790_v6  ;;  %1654 = vmatpush3.bf16.msra.mxu1 %v1994_v9 }
   0x9   :  { %1659 = vmatprep.subr.bf16.mxu1 %v1933_v1 }
   0xb   :  { %124 = vmatpush1.bf16.msra.mxu0 %v1792_v8  ;;  %1656 = vmatmul.mubr.bf16.vlgmr.msra.gmra.mrb[0].mxu1 %v1934_v2 }
   0xc   :  { %125 = vmatprep.subr.bf16.mxu0 %v1794_v10  ;;  %1660 = vmatpush3.bf16.msra.mxu1 %v2007_v12 }
   0xd   :  { %1663 = vmatprep.mubr.msk.bf16.mxu1 %vm1935_vm0, %v1933_v1  ;;  %1661 = vmatprep.subr.bf16.mxu1 %v1933_v1 }
   0xf   :  { %126 = vmatpush1.bf16.msra.mxu0 %v1796_v11 }
  0x10   :  { %1691 = vmatprep.subr.bf16.mxu0 %v1933_v1  ;;  %1662 = vmatpush3.bf16.msra.mxu1 %v2016_v14 }
  0x11   :  { %1667 = vmatprep.subr.bf16.mxu1 %v1933_v1 }
  0x12   :  { %1531 = vmatmul.mubr.msk.bf16.vlgmr.msra.gmra.mrb[0].mxu0 %vm106_vm1, %v1798_v13 }
  0x13   :  { %161 = vmatprep.mubr.bf16.mxu0 %v1934_v2  ;;  %1692 = vmatpush3.bf16.msra.mxu0 %v2007_v12 }
  0x14   :  { %1664 = vmatmul.mubr.bf16.vlgmr.msra.gmra.mrb[4].mxu1 %v1934_v2  ;;  %1693 = vmatprep.subr.bf16.mxu0 %v1933_v1 }
  0x15   :  { %1668 = vmatpush3.bf16.msra.mxu1 %v1984_v7  ;;  %1671 = vmatprep.mubr.msk.bf16.mxu1 %vm1935_vm0, %v1933_v1 }
  0x16   :  { %1669 = vmatprep.subr.bf16.mxu1 %v1933_v1 }
  0x17   :  { %1694 = vmatpush3.bf16.msra.mxu0 %v2016_v14 }
  0x18   :  { %1707 = vmatprep.subr.bf16.mxu0 %v1933_v1 }
  0x19   :  { %1670 = vmatpush3.bf16.msra.mxu1 %v1994_v9 }
  0x1a   :  { %1532 = vmatmul.mubr.msk.bf16.gmra.mrb[4].mxu0 %vm106_vm1, %v1799_v15  ;;  %1675 = vmatprep.subr.bf16.mxu1 %v1933_v1 }
  0x1b   :  { %171 = vmatprep.mubr.bf16.mxu0 %v1934_v2 }
  0x22   :  { %1533 = vmatmul.mubr.msk.bf16.gmra.mrb[8].mxu0 %vm106_vm1, %v1800_v16 }
  0x23   :  { %181 = vmatprep.mubr.bf16.mxu0 %v1934_v2 }
  0x2a   :  { %1534 = vmatmul.mubr.msk.bf16.gmra.mrb[12].mxu0 %vm106_vm1, %v1803_v17 }
  0x2b   :  { %1695 = vmatprep.mubr.msk.bf16.mxu0 %vm1935_vm0, %v1933_v1 }
  0xde   :  { %v268_v23 = vpop.f32.mrb[0].mxu1 }
  0xdf   :  { %v1657_v24 = vpop.f32.mrb[1].mxu1 }
  0xe0   :  { %v271_v26 = vpop.f32.mrb[2].mxu1 }
  0xe1   :  { %v1658_v28 = vpop.f32.mrb[3].mxu1 }
  0xe5   :  { %v153_v29 = vpop.f32.mrb[0].mxu0 }
  0xe6   :  { %v154_v30 = vadd.f32 %v153_v29, %v39_v25  ;;  %v155_v31 = vpop.f32.mrb[1].mxu0 }
  0xe7   :  { %v2052_v32 = vadd.f32 %v155_v31, %v43_v27  ;;  %v157_v33 = vpop.f32.mrb[2].mxu0  ;;  %v356_v37 = vpop.f32.mrb[4].mxu1 }
  0xe8   :  { %v2054_v34 = vadd.f32 %v157_v33, %v39_v25  ;;  %v274_v35 = vadd.f32 %v268_v23, %v154_v30  ;;  %v159_v36 = vpop.f32.mrb[3].mxu0  ;;  %v1665_v39 = vpop.f32.mrb[5].mxu1 }
  0xe9   :  { %v2056_v38 = vadd.f32 %v159_v36, %v43_v27  ;;  %v359_v40 = vpop.f32.mrb[6].mxu1 }
  0xea   :  { %1804 = vtanh.f32 %v274_v35  ;;  %v1666_v41 = vpop.f32.mrb[7].mxu1  ;;  %v275_v6 = vsub.f32 0.0, %v274_v35 }
  0xec   :  { %v276_v8 = vmul.f32 1.442695, %v275_v6 }
  0xed   :  { %v163_v42 = vpop.f32.mrb[4].mxu0 }
  0xee   :  { %v2058_v43 = vadd.f32 %v163_v42, %v39_v25  ;;  %v165_v44 = vpop.f32.mrb[5].mxu0 }
  0xef   :  { %v2060_v45 = vadd.f32 %v165_v44, %v43_v27  ;;  %v167_v46 = vpop.f32.mrb[6].mxu0 }
  0xf0   :  { %v2062_v47 = vadd.f32 %v167_v46, %v39_v25  ;;  %v169_v48 = vpop.f32.mrb[7].mxu0 }
  0xf1   :  { %v2064_v49 = vadd.f32 %v169_v48, %v43_v27 }
  0xf4   :  { %v1805_v50 = vpop.eup %1804 }
  0xf5   :  { %v173_v51 = vpop.f32.mrb[8].mxu0  ;;  %284 = vrot.lane.b32.xlu0 %v1805_v50, %s1936_s0 }
  0xf6   :  { %v2067_v52 = vadd.f32 %v173_v51, %v39_v25  ;;  %v175_v53 = vpop.f32.mrb[9].mxu0 }
  0xf7   :  { %v2069_v54 = vadd.f32 %v175_v53, %v43_v27  ;;  %v177_v55 = vpop.f32.mrb[10].mxu0 }
  0xf8   :  { %v2071_v56 = vadd.f32 %v177_v55, %v39_v25  ;;  %v179_v57 = vpop.f32.mrb[11].mxu0 }
  0xf9   :  { %v2073_v58 = vadd.f32 %v179_v57, %v43_v27 }
  0xfd   :  { %v183_v59 = vpop.f32.mrb[12].mxu0 }
  0xfe   :  { %v2075_v60 = vadd.f32 %v183_v59, %v39_v25  ;;  %v185_v61 = vpop.f32.mrb[13].mxu0 }
  0xff   :  { %v2077_v62 = vadd.f32 %v185_v61, %v43_v27  ;;  %v187_v63 = vpop.f32.mrb[14].mxu0 }
 0x100   :  { %v2079_v0 = vadd.f32 %v187_v63, %v39_v25  ;;  %v189_v2 = vpop.f32.mrb[15].mxu0 }
 0x101   :  { %v190_v3 = vadd.f32 %v189_v2, %v43_v27 }
 0x103   :  { %v362_v4 = vadd.f32 %v356_v37, %v190_v3 }
 0x105   :  { %1806 = vtanh.f32 %v362_v4  ;;  %v363_v13 = vsub.f32 0.0, %v362_v4 }
 0x106   :  { %1808 = vpow2.f32 %v276_v8 }
 0x107   :  { %v364_v15 = vmul.f32 1.442695, %v363_v13 }
 0x10f   :  { %v1807_v5 = vpop.eup %1806 }
 0x110   :  { %372 = vrot.lane.b32.xlu0 %v1807_v5, %s1936_s0  ;;  %v1809_v10 = vpop.eup %1808 }
 0x111   :  { %v278_v11 = vadd.f32 1.0, %v1809_v10 }
 0x113   :  { %1810 = vrcp.f32 %v278_v11 }
 0x114   :  { %1812 = vpow2.f32 %v364_v15 }
 0x11d   :  { %v1811_v16 = vpop.eup %1810 }
 0x11e   :  { %v1813_v19 = vpop.eup %1812  ;;  %v282_v24 = vmul.f32 0.0, %v1811_v16 }
 0x11f   :  { %v366_v20 = vadd.f32 1.0, %v1813_v19 }
 0x121   :  { %1814 = vrcp.f32 %v366_v20 }
 0x12b   :  { %v1815_v21 = vpop.eup %1814 }
 0x12c   :  { %v370_v28 = vmul.f32 0.0, %v1815_v21 }
 0x167   :  { %v285_v17 = vpop.permute.xlu0 %284 }
 0x168   :  { %v287_v18 = vmul.f32 %v1811_v16, %v285_v17 }
 0x16a   :  { %289 = vrot.lane.b32.xlu1 %v287_v18, %s1937_s3 }
 0x182   :  { %v373_v22 = vpop.permute.xlu0 %372 }
 0x183   :  { %v375_v23 = vmul.f32 %v1815_v21, %v373_v22 }
 0x185   :  { %377 = vrot.lane.b32.xlu1 %v375_v23, %s1937_s3 }
 0x1dc   :  { %v290_v25 = vpop.permute.xlu1 %289 }
 0x1dd   :  { %v2084_v26 = vadd.f32 %v290_v25, %v282_v24 }
 0x1df   :  { %1816 = vtanh.f32 %v2084_v26 }
 0x1e9   :  { %v1817_v27 = vpop.eup %1816 }
 0x1ea   :  { %295 = vrot.lane.b32.xlu0 %v1817_v27, %s1936_s0 }
 0x1f7   :  { %v378_v29 = vpop.permute.xlu1 %377 }
 0x1f8   :  { %v2088_v30 = vadd.f32 %v378_v29, %v370_v28 }
 0x1fa   :  { %1818 = vtanh.f32 %v2088_v30 }
 0x204   :  { %v1819_v31 = vpop.eup %1818 }
 0x205   :  { %383 = vrot.lane.b32.xlu1 %v1819_v31, %s1936_s0 }
 0x25c   :  { %v296_v33 = vpop.permute.xlu0 %295 }
 0x25d   :  { %v298_v35 = vmul.f32 %v1811_v16, %v296_v33 }
 0x25f   :  { %v2092_v36 = vpack.c.bf16 %v298_v35, %v298_v35 }
 0x261   :  { %399 = vrot.lane.b32.xlu0 %v2092_v36, %s1937_s3 }
 0x277   :  { %v384_v37 = vpop.permute.xlu1 %383 }
 0x278   :  { %v386_v39 = vmul.f32 %v1815_v21, %v384_v37 }
 0x27a   :  { %v2096_v40 = vpack.c.bf16 %v386_v39, %v386_v39 }
 0x27c   :  { %480 = vrot.lane.b32.xlu1 %v2096_v40, %s1937_s3 }
 0x2d3   :  { %v400_v41 = vpop.permute.xlu0 %399 }
 0x2d4   :  { %1672 = vmatmul.mubr.msk.bf16.vlgmr.msra.gmra.mrb[8].mxu1 %vm230_vm2, %v400_v41 }
 0x2d5   :  { %1676 = vmatpush3.bf16.msra.mxu1 %v2007_v12  ;;  %1679 = vmatprep.mubr.msk.bf16.mxu1 %vm1935_vm0, %v1933_v1 }
 0x2d6   :  { %1677 = vmatprep.subr.bf16.mxu1 %v1933_v1 }
 0x2d9   :  { %1678 = vmatpush3.bf16.msra.mxu1 %v2016_v14 }
 0x2da   :  { %1683 = vmatprep.subr.bf16.mxu1 %v1933_v1 }
 0x2ee   :  { %v481_v42 = vpop.permute.xlu1 %480 }
 0x2ef   :  { %1680 = vmatmul.mubr.msk.bf16.vlgmr.msra.gmra.mrb[12].mxu1 %vm230_vm2, %v481_v42 }
 0x2f0   :  { %1684 = vmatpush3.bf16.msra.mxu1 %v1984_v7  ;;  %1687 = vmatprep.mubr.msk.bf16.mxu1 %vm1935_vm0, %v1933_v1 }
 0x2f1   :  { %1685 = vmatprep.subr.bf16.mxu1 %v1933_v1 }
 0x2f4   :  { %1686 = vmatpush3.bf16.msra.mxu1 %v1994_v9 }
 0x2f5   :  { %1699 = vmatprep.subr.bf16.mxu1 %v1933_v1 }
 0x3a7   :  { %v438_v44 = vpop.f32.mrb[8].mxu1 }
 0x3a8   :  { %v444_v46 = vadd.f32 %v438_v44, %v2054_v34  ;;  %v1673_v48 = vpop.f32.mrb[9].mxu1 }
 0x3a9   :  { %v441_v50 = vpop.f32.mrb[10].mxu1 }
 0x3aa   :  { %1820 = vtanh.f32 %v444_v46  ;;  %v1674_v51 = vpop.f32.mrb[11].mxu1  ;;  %v445_v3 = vsub.f32 0.0, %v444_v46 }
 0x3ac   :  { %v446_v4 = vmul.f32 1.442695, %v445_v3 }
 0x3b4   :  { %v1821_v53 = vpop.eup %1820 }
 0x3b5   :  { %454 = vrot.lane.b32.xlu0 %v1821_v53, %s1936_s0 }
 0x3c2   :  { %v519_v55 = vpop.f32.mrb[12].mxu1 }
 0x3c3   :  { %v525_v57 = vadd.f32 %v519_v55, %v2077_v62  ;;  %v1681_v59 = vpop.f32.mrb[13].mxu1 }
 0x3c4   :  { %v522_v61 = vpop.f32.mrb[14].mxu1 }
 0x3c5   :  { %1822 = vtanh.f32 %v525_v57  ;;  %v1682_v63 = vpop.f32.mrb[15].mxu1  ;;  %v526_v6 = vsub.f32 0.0, %v525_v57 }
 0x3c6   :  { %1824 = vpow2.f32 %v446_v4 }
 0x3c7   :  { %v527_v8 = vmul.f32 1.442695, %v526_v6 }
 0x3cf   :  { %v1823_v2 = vpop.eup %1822 }
 0x3d0   :  { %535 = vrot.lane.b32.xlu1 %v1823_v2, %s1936_s0  ;;  %v1825_v34 = vpop.eup %1824 }
 0x3d1   :  { %v448_v5 = vadd.f32 1.0, %v1825_v34 }
 0x3d3   :  { %1826 = vrcp.f32 %v448_v5 }
 0x3d4   :  { %1828 = vpow2.f32 %v527_v8 }
 0x3dd   :  { %v1827_v10 = vpop.eup %1826 }
 0x3de   :  { %v1829_v62 = vpop.eup %1828  ;;  %v452_v19 = vmul.f32 %v1827_v10, %v2084_v26 }
 0x3df   :  { %v529_v15 = vadd.f32 1.0, %v1829_v62 }
 0x3e1   :  { %1830 = vrcp.f32 %v529_v15 }
 0x3eb   :  { %v1831_v16 = vpop.eup %1830 }
 0x3ec   :  { %v533_v23 = vmul.f32 %v1831_v16, %v2088_v30 }
 0x427   :  { %v455_v11 = vpop.permute.xlu0 %454 }
 0x428   :  { %v457_v13 = vmul.f32 %v1827_v10, %v455_v11 }
 0x42a   :  { %459 = vrot.lane.b32.xlu0 %v457_v13, %s1937_s3 }
 0x442   :  { %v536_v17 = vpop.permute.xlu1 %535 }
 0x443   :  { %v538_v18 = vmul.f32 %v1831_v16, %v536_v17 }
 0x445   :  { %540 = vrot.lane.b32.xlu1 %v538_v18, %s1937_s3 }
 0x49c   :  { %v460_v20 = vpop.permute.xlu0 %459 }
 0x49d   :  { %v2121_v21 = vadd.f32 %v460_v20, %v452_v19 }
 0x49f   :  { %1832 = vtanh.f32 %v2121_v21 }
 0x4a9   :  { %v1833_v22 = vpop.eup %1832 }
 0x4aa   :  { %465 = vrot.lane.b32.xlu0 %v1833_v22, %s1936_s0 }
 0x4b7   :  { %v541_v24 = vpop.permute.xlu1 %540 }
 0x4b8   :  { %v2126_v25 = vadd.f32 %v541_v24, %v533_v23 }
 0x4ba   :  { %1834 = vtanh.f32 %v2126_v25 }
 0x4c4   :  { %v1835_v27 = vpop.eup %1834 }
 0x4c5   :  { %546 = vrot.lane.b32.xlu1 %v1835_v27, %s1936_s0 }
 0x51c   :  { %v466_v28 = vpop.permute.xlu0 %465 }
 0x51d   :  { %v468_v26 = vmul.f32 %v1827_v10, %v466_v28 }
 0x51f   :  { %v2130_v29 = vpack.c.bf16 %v468_v26, %v468_v26 }
 0x521   :  { %561 = vrot.lane.b32.xlu0 %v2130_v29, %s1937_s3 }
 0x537   :  { %v547_v31 = vpop.permute.xlu1 %546 }
 0x538   :  { %v549_v33 = vmul.f32 %v1831_v16, %v547_v31 }
 0x53a   :  { %v2134_v35 = vpack.c.bf16 %v549_v33, %v549_v33 }
 0x53c   :  { %642 = vrot.lane.b32.xlu1 %v2134_v35, %s1937_s3 }
 0x593   :  { %v562_v30 = vpop.permute.xlu0 %561 }
 0x594   :  { %1688 = vmatmul.mubr.msk.bf16.vlgmr.msra.gmra.mrb[16].mxu1 %vm230_vm2, %v562_v30 }
 0x595   :  { %1700 = vmatpush3.bf16.msra.mxu1 %v1984_v7  ;;  %1703 = vmatprep.mubr.msk.bf16.mxu1 %vm1935_vm0, %v1933_v1 }
 0x596   :  { %1701 = vmatprep.subr.bf16.mxu1 %v1933_v1 }
 0x599   :  { %1702 = vmatpush3.bf16.msra.mxu1 %v1994_v9 }
 0x59a   :  { %1715 = vmatprep.subr.bf16.mxu1 %v1933_v1 }
 0x5ae   :  { %v643_v37 = vpop.permute.xlu1 %642 }
 0x5af   :  { %1696 = vmatmul.mubr.msk.bf16.vlgmr.msra.gmra.mrb[16].mxu0 %vm230_vm2, %v643_v37 }
 0x5b0   :  { %1708 = vmatpush3.bf16.msra.mxu0 %v2007_v12  ;;  %1711 = vmatprep.mubr.msk.bf16.mxu0 %vm1935_vm0, %v1933_v1 }
 0x5b1   :  { %1709 = vmatprep.subr.bf16.mxu0 %v1933_v1 }
 0x5b4   :  { %1710 = vmatpush3.bf16.msra.mxu0 %v2016_v14 }
 0x5b5   :  { %1723 = vmatprep.subr.bf16.mxu0 %v1933_v1 }
 0x667   :  { %v600_v39 = vpop.f32.mrb[16].mxu1 }
 0x668   :  { %v606_v41 = vadd.f32 %v600_v39, %v2058_v43  ;;  %v1689_v42 = vpop.f32.mrb[17].mxu1 }
 0x669   :  { %v603_v44 = vpop.f32.mrb[18].mxu1 }
 0x66a   :  { %1836 = vtanh.f32 %v606_v41  ;;  %v1690_v46 = vpop.f32.mrb[19].mxu1  ;;  %v607_v61 = vsub.f32 0.0, %v606_v41 }
 0x66c   :  { %v608_v63 = vmul.f32 1.442695, %v607_v61 }
 0x674   :  { %v1837_v48 = vpop.eup %1836 }
 0x675   :  { %616 = vrot.lane.b32.xlu0 %v1837_v48, %s1936_s0 }
 0x682   :  { %v681_v50 = vpop.f32.mrb[16].mxu0 }
 0x683   :  { %v687_v51 = vadd.f32 %v681_v50, %v2073_v58  ;;  %v1697_v53 = vpop.f32.mrb[17].mxu0 }
 0x684   :  { %v684_v55 = vpop.f32.mrb[18].mxu0 }
 0x685   :  { %1838 = vtanh.f32 %v687_v51  ;;  %v1698_v57 = vpop.f32.mrb[19].mxu0  ;;  %v688_v3 = vsub.f32 0.0, %v687_v51 }
 0x686   :  { %1840 = vpow2.f32 %v608_v63 }
 0x687   :  { %v689_v4 = vmul.f32 1.442695, %v688_v3 }
 0x68f   :  { %v1839_v59 = vpop.eup %1838 }
 0x690   :  { %697 = vrot.lane.b32.xlu1 %v1839_v59, %s1936_s0  ;;  %v1841_v43 = vpop.eup %1840 }
 0x691   :  { %v610_v2 = vadd.f32 1.0, %v1841_v43 }
 0x693   :  { %1842 = vrcp.f32 %v610_v2 }
 0x694   :  { %1844 = vpow2.f32 %v689_v4 }
 0x69d   :  { %v1843_v34 = vpop.eup %1842 }
 0x69e   :  { %v1845_v58 = vpop.eup %1844  ;;  %v614_v62 = vmul.f32 %v1843_v34, %v2121_v21 }
 0x69f   :  { %v691_v8 = vadd.f32 1.0, %v1845_v58 }
 0x6a1   :  { %1846 = vrcp.f32 %v691_v8 }
 0x6ab   :  { %v1847_v10 = vpop.eup %1846 }
 0x6ac   :  { %v695_v18 = vmul.f32 %v1847_v10, %v2126_v25 }
 0x6e7   :  { %v617_v5 = vpop.permute.xlu0 %616 }
 0x6e8   :  { %v619_v6 = vmul.f32 %v1843_v34, %v617_v5 }
 0x6ea   :  { %621 = vrot.lane.b32.xlu0 %v619_v6, %s1937_s3 }
 0x702   :  { %v698_v11 = vpop.permute.xlu1 %697 }
 0x703   :  { %v700_v13 = vmul.f32 %v1847_v10, %v698_v11 }
 0x705   :  { %702 = vrot.lane.b32.xlu1 %v700_v13, %s1937_s3 }
 0x75c   :  { %v622_v15 = vpop.permute.xlu0 %621 }
 0x75d   :  { %v2159_v16 = vadd.f32 %v622_v15, %v614_v62 }
 0x75f   :  { %1848 = vtanh.f32 %v2159_v16 }
 0x769   :  { %v1849_v17 = vpop.eup %1848 }
 0x76a   :  { %627 = vrot.lane.b32.xlu0 %v1849_v17, %s1936_s0 }
 0x777   :  { %v703_v19 = vpop.permute.xlu1 %702 }
 0x778   :  { %v2164_v20 = vadd.f32 %v703_v19, %v695_v18 }
 0x77a   :  { %1850 = vtanh.f32 %v2164_v20 }
 0x784   :  { %v1851_v22 = vpop.eup %1850 }
 0x785   :  { %708 = vrot.lane.b32.xlu1 %v1851_v22, %s1936_s0 }
 0x7dc   :  { %v628_v23 = vpop.permute.xlu0 %627 }
 0x7dd   :  { %v630_v21 = vmul.f32 %v1843_v34, %v628_v23 }
 0x7df   :  { %v2168_v24 = vpack.c.bf16 %v630_v21, %v630_v21 }
 0x7e1   :  { %723 = vrot.lane.b32.xlu0 %v2168_v24, %s1937_s3 }
 0x7f7   :  { %v709_v27 = vpop.permute.xlu1 %708 }
 0x7f8   :  { %v711_v28 = vmul.f32 %v1847_v10, %v709_v27 }
 0x7fa   :  { %v2172_v26 = vpack.c.bf16 %v711_v28, %v711_v28 }
 0x7fc   :  { %804 = vrot.lane.b32.xlu1 %v2172_v26, %s1937_s3 }
 0x853   :  { %v724_v25 = vpop.permute.xlu0 %723 }
 0x854   :  { %1704 = vmatmul.mubr.msk.bf16.vlgmr.msra.gmra.mrb[20].mxu1 %vm230_vm2, %v724_v25 }
 0x855   :  { %1716 = vmatpush3.bf16.msra.mxu1 %v1984_v7  ;;  %1719 = vmatprep.mubr.msk.bf16.mxu1 %vm1935_vm0, %v1933_v1 }
 0x856   :  { %1717 = vmatprep.subr.bf16.mxu1 %v1933_v1 }
 0x859   :  { %1718 = vmatpush3.bf16.msra.mxu1 %v1994_v9 }
 0x85a   :  { %1731 = vmatprep.subr.bf16.mxu1 %v1933_v1 }
 0x86e   :  { %v805_v31 = vpop.permute.xlu1 %804 }
 0x86f   :  { %1712 = vmatmul.mubr.msk.bf16.vlgmr.msra.gmra.mrb[20].mxu0 %vm230_vm2, %v805_v31 }
 0x870   :  { %1724 = vmatpush3.bf16.msra.mxu0 %v2007_v12  ;;  %1727 = vmatprep.mubr.msk.bf16.mxu0 %vm1935_vm0, %v1933_v1 }
 0x871   :  { %1725 = vmatprep.subr.bf16.mxu0 %v1933_v1 }
 0x874   :  { %1726 = vmatpush3.bf16.msra.mxu0 %v2016_v14 }
 0x875   :  { %1739 = vmatprep.subr.bf16.mxu0 %v1933_v1 }
 0x927   :  { %v762_v33 = vpop.f32.mrb[20].mxu1 }
 0x928   :  { %v768_v30 = vadd.f32 %v762_v33, %v2062_v47  ;;  %v1705_v37 = vpop.f32.mrb[21].mxu1 }
 0x929   :  { %v765_v39 = vpop.f32.mrb[22].mxu1 }
 0x92a   :  { %1852 = vtanh.f32 %v768_v30  ;;  %v1706_v41 = vpop.f32.mrb[23].mxu1  ;;  %v769_v55 = vsub.f32 0.0, %v768_v30 }
 0x92c   :  { %v770_v57 = vmul.f32 1.442695, %v769_v55 }
 0x934   :  { %v1853_v42 = vpop.eup %1852 }
 0x935   :  { %778 = vrot.lane.b32.xlu0 %v1853_v42, %s1936_s0 }
 0x942   :  { %v843_v44 = vpop.f32.mrb[20].mxu0 }
 0x943   :  { %v849_v46 = vadd.f32 %v843_v44, %v2069_v54  ;;  %v1713_v48 = vpop.f32.mrb[21].mxu0 }
 0x944   :  { %v846_v50 = vpop.f32.mrb[22].mxu0 }
 0x945   :  { %1854 = vtanh.f32 %v849_v46  ;;  %v1714_v51 = vpop.f32.mrb[23].mxu0  ;;  %v850_v61 = vsub.f32 0.0, %v849_v46 }
 0x946   :  { %1856 = vpow2.f32 %v770_v57 }
 0x947   :  { %v851_v63 = vmul.f32 1.442695, %v850_v61 }
 0x94f   :  { %v1855_v53 = vpop.eup %1854 }
 0x950   :  { %859 = vrot.lane.b32.xlu1 %v1855_v53, %s1936_s0  ;;  %v1857_v47 = vpop.eup %1856 }
 0x951   :  { %v772_v59 = vadd.f32 1.0, %v1857_v47 }
 0x953   :  { %1858 = vrcp.f32 %v772_v59 }
 0x954   :  { %1860 = vpow2.f32 %v851_v63 }
 0x95d   :  { %v1859_v43 = vpop.eup %1858 }
 0x95e   :  { %v1861_v54 = vpop.eup %1860  ;;  %v776_v58 = vmul.f32 %v1859_v43, %v2159_v16 }
 0x95f   :  { %v853_v4 = vadd.f32 1.0, %v1861_v54 }
 0x961   :  { %1862 = vrcp.f32 %v853_v4 }
 0x96b   :  { %v1863_v34 = vpop.eup %1862 }
 0x96c   :  { %v857_v13 = vmul.f32 %v1863_v34, %v2164_v20 }
 0x9a7   :  { %v779_v2 = vpop.permute.xlu0 %778 }
 0x9a8   :  { %v781_v3 = vmul.f32 %v1859_v43, %v779_v2 }
 0x9aa   :  { %783 = vrot.lane.b32.xlu0 %v781_v3, %s1937_s3 }
 0x9c2   :  { %v860_v5 = vpop.permute.xlu1 %859 }
 0x9c3   :  { %v862_v6 = vmul.f32 %v1863_v34, %v860_v5 }
 0x9c5   :  { %864 = vrot.lane.b32.xlu1 %v862_v6, %s1937_s3 }
 0xa1c   :  { %v784_v8 = vpop.permute.xlu0 %783 }
 0xa1d   :  { %v2197_v10 = vadd.f32 %v784_v8, %v776_v58 }
 0xa1f   :  { %1864 = vtanh.f32 %v2197_v10 }
 0xa29   :  { %v1865_v11 = vpop.eup %1864 }
 0xa2a   :  { %789 = vrot.lane.b32.xlu0 %v1865_v11, %s1936_s0 }
 0xa37   :  { %v865_v62 = vpop.permute.xlu1 %864 }
 0xa38   :  { %v2202_v15 = vadd.f32 %v865_v62, %v857_v13 }
 0xa3a   :  { %1866 = vtanh.f32 %v2202_v15 }
 0xa44   :  { %v1867_v17 = vpop.eup %1866 }
 0xa45   :  { %870 = vrot.lane.b32.xlu1 %v1867_v17, %s1936_s0 }
 0xa9c   :  { %v790_v18 = vpop.permute.xlu0 %789 }
 0xa9d   :  { %v792_v16 = vmul.f32 %v1859_v43, %v790_v18 }
 0xa9f   :  { %v2206_v19 = vpack.c.bf16 %v792_v16, %v792_v16 }
 0xaa1   :  { %884 = vrot.lane.b32.xlu0 %v2206_v19, %s1937_s3 }
 0xab7   :  { %v871_v22 = vpop.permute.xlu1 %870 }
 0xab8   :  { %v873_v23 = vmul.f32 %v1863_v34, %v871_v22 }
 0xaba   :  { %v2210_v21 = vpack.c.bf16 %v873_v23, %v873_v23 }
 0xabc   :  { %963 = vrot.lane.b32.xlu1 %v2210_v21, %s1937_s3 }
 0xb13   :  { %v885_v20 = vpop.permute.xlu0 %884 }
 0xb14   :  { %1720 = vmatmul.mubr.msk.bf16.vlgmr.msra.gmra.mrb[24].mxu1 %vm230_vm2, %v885_v20 }
 0xb15   :  { %1732 = vmatpush3.bf16.msra.mxu1 %v1984_v7  ;;  %1735 = vmatprep.mubr.msk.bf16.mxu1 %vm1935_vm0, %v1933_v1 }
 0xb16   :  { %1733 = vmatprep.subr.bf16.mxu1 %v1933_v1 }
 0xb19   :  { %1734 = vmatpush3.bf16.msra.mxu1 %v1994_v9 }
 0xb1a   :  { %1747 = vmatprep.subr.bf16.mxu1 %v1933_v1 }
 0xb2e   :  { %v964_v27 = vpop.permute.xlu1 %963 }
 0xb2f   :  { %1728 = vmatmul.mubr.msk.bf16.vlgmr.msra.gmra.mrb[24].mxu0 %vm230_vm2, %v964_v27 }
 0xb30   :  { %1740 = vmatpush3.bf16.msra.mxu0 %v2007_v12  ;;  %1743 = vmatprep.mubr.msk.bf16.mxu0 %vm1935_vm0, %v1933_v1 }
 0xb31   :  { %1741 = vmatprep.subr.bf16.mxu0 %v1933_v1 }
 0xb34   :  { %1742 = vmatpush3.bf16.msra.mxu0 %v2016_v14 }
 0xb35   :  { %1755 = vmatprep.subr.bf16.mxu0 %v1933_v1 }
 0xbe7   :  { %v923_v28 = vpop.f32.mrb[24].mxu1 }
 0xbe8   :  { %v929_v25 = vadd.f32 %v923_v28, %v2067_v52  ;;  %v1721_v31 = vpop.f32.mrb[25].mxu1 }
 0xbe9   :  { %v926_v33 = vpop.f32.mrb[26].mxu1 }
 0xbea   :  { %1868 = vtanh.f32 %v929_v25  ;;  %v1722_v30 = vpop.f32.mrb[27].mxu1  ;;  %v930_v50 = vsub.f32 0.0, %v929_v25 }
 0xbec   :  { %v931_v51 = vmul.f32 1.442695, %v930_v50 }
 0xbf4   :  { %v1869_v37 = vpop.eup %1868 }
 0xbf5   :  { %939 = vrot.lane.b32.xlu0 %v1869_v37, %s1936_s0 }
 0xc02   :  { %v1002_v39 = vpop.f32.mrb[24].mxu0 }
 0xc03   :  { %v1008_v41 = vadd.f32 %v1002_v39, %v2064_v49  ;;  %v1729_v42 = vpop.f32.mrb[25].mxu0 }
 0xc04   :  { %v1005_v44 = vpop.f32.mrb[26].mxu0 }
 0xc05   :  { %1870 = vtanh.f32 %v1008_v41  ;;  %v1730_v46 = vpop.f32.mrb[27].mxu0  ;;  %v1009_v55 = vsub.f32 0.0, %v1008_v41 }
 0xc06   :  { %1872 = vpow2.f32 %v931_v51 }
 0xc07   :  { %v1010_v57 = vmul.f32 1.442695, %v1009_v55 }
 0xc0f   :  { %v1871_v48 = vpop.eup %1870 }
 0xc10   :  { %1018 = vrot.lane.b32.xlu1 %v1871_v48, %s1936_s0  ;;  %v1873_v52 = vpop.eup %1872 }
 0xc11   :  { %v933_v53 = vadd.f32 1.0, %v1873_v52 }
 0xc13   :  { %1874 = vrcp.f32 %v933_v53 }
 0xc14   :  { %1876 = vpow2.f32 %v1010_v57 }
 0xc1d   :  { %v1875_v47 = vpop.eup %1874 }
 0xc1e   :  { %v1877_v49 = vpop.eup %1876  ;;  %v937_v54 = vmul.f32 %v1875_v47, %v2197_v10 }
 0xc1f   :  { %v1012_v63 = vadd.f32 1.0, %v1877_v49 }
 0xc21   :  { %1878 = vrcp.f32 %v1012_v63 }
 0xc2b   :  { %v1879_v43 = vpop.eup %1878 }
 0xc2c   :  { %v1016_v6 = vmul.f32 %v1879_v43, %v2202_v15 }
 0xc67   :  { %v940_v59 = vpop.permute.xlu0 %939 }
 0xc68   :  { %v942_v61 = vmul.f32 %v1875_v47, %v940_v59 }
 0xc6a   :  { %944 = vrot.lane.b32.xlu0 %v942_v61, %s1937_s3 }
 0xc82   :  { %v1019_v2 = vpop.permute.xlu1 %1018 }
 0xc83   :  { %v1021_v3 = vmul.f32 %v1879_v43, %v1019_v2 }
 0xc85   :  { %1023 = vrot.lane.b32.xlu1 %v1021_v3, %s1937_s3 }
 0xcdc   :  { %v945_v4 = vpop.permute.xlu0 %944 }
 0xcdd   :  { %v2235_v34 = vadd.f32 %v945_v4, %v937_v54 }
 0xcdf   :  { %1880 = vtanh.f32 %v2235_v34 }
 0xce9   :  { %v1881_v5 = vpop.eup %1880 }
 0xcea   :  { %950 = vrot.lane.b32.xlu0 %v1881_v5, %s1936_s0 }
 0xcf7   :  { %v1024_v58 = vpop.permute.xlu1 %1023 }
 0xcf8   :  { %v2240_v8 = vadd.f32 %v1024_v58, %v1016_v6 }
 0xcfa   :  { %1882 = vtanh.f32 %v2240_v8 }
 0xd04   :  { %v1883_v11 = vpop.eup %1882 }
 0xd05   :  { %1029 = vrot.lane.b32.xlu1 %v1883_v11, %s1936_s0 }
 0xd5c   :  { %v951_v13 = vpop.permute.xlu0 %950 }
 0xd5d   :  { %v953_v10 = vmul.f32 %v1875_v47, %v951_v13 }
 0xd5f   :  { %v2244_v62 = vpack.c.bf16 %v953_v10, %v953_v10  ;;  %v1932_v10 = vld [vmem:[%s2427_s2] sm:$0xff]  }
 0xd61   :  { %1042 = vrot.lane.b32.xlu0 %v2244_v62, %s1937_s3 }
 0xd77   :  { %v1030_v17 = vpop.permute.xlu1 %1029 }
 0xd78   :  { %v1032_v18 = vmul.f32 %v1879_v43, %v1030_v17 }
 0xd7a   :  { %v2248_v16 = vpack.c.bf16 %v1032_v18, %v1032_v18 }
 0xd7c   :  { %1121 = vrot.lane.b32.xlu1 %v2248_v16, %s1937_s3 }
 0xdd3   :  { %v1043_v15 = vpop.permute.xlu0 %1042 }
 0xdd4   :  { %1736 = vmatmul.mubr.msk.bf16.vlgmr.msra.gmra.mrb[28].mxu1 %vm230_vm2, %v1043_v15 }
 0xdd5   :  { %1748 = vmatpush3.bf16.msra.mxu1 %v1984_v7  ;;  %1751 = vmatprep.mubr.msk.bf16.mxu1 %vm1935_vm0, %v1933_v1 }
 0xdd6   :  { %1749 = vmatprep.subr.bf16.mxu1 %v1933_v1 }
 0xdd9   :  { %1750 = vmatpush3.bf16.msra.mxu1 %v1994_v9 }
 0xdda   :  { %1763 = vmatprep.subr.bf16.mxu1 %v1933_v1 }
 0xdee   :  { %v1122_v22 = vpop.permute.xlu1 %1121 }
 0xdef   :  { %1744 = vmatmul.mubr.msk.bf16.vlgmr.msra.gmra.mrb[28].mxu0 %vm230_vm2, %v1122_v22 }
 0xdf0   :  { %1756 = vmatpush3.bf16.msra.mxu0 %v2007_v12  ;;  %1759 = vmatprep.mubr.msk.bf16.mxu0 %vm1935_vm0, %v1933_v1 }
 0xdf1   :  { %1757 = vmatprep.subr.bf16.mxu0 %v1933_v1 }
 0xdf4   :  { %1758 = vmatpush3.bf16.msra.mxu0 %v2016_v14 }
 0xdf5   :  { %1771 = vmatprep.subr.bf16.mxu0 %v1933_v1 }
 0xea7   :  { %v1081_v7 = vpop.f32.mrb[28].mxu1 }
 0xea8   :  { %v1087_v23 = vadd.f32 %v1081_v7, %v2071_v56  ;;  %v1737_v20 = vpop.f32.mrb[29].mxu1 }
 0xea9   :  { %v1084_v27 = vpop.f32.mrb[30].mxu1 }
 0xeaa   :  { %1884 = vtanh.f32 %v1087_v23  ;;  %v1738_v28 = vpop.f32.mrb[31].mxu1  ;;  %v1088_v42 = vsub.f32 0.0, %v1087_v23 }
 0xeac   :  { %v1089_v44 = vmul.f32 1.442695, %v1088_v42 }
 0xeb4   :  { %v1885_v25 = vpop.eup %1884 }
 0xeb5   :  { %1097 = vrot.lane.b32.xlu0 %v1885_v25, %s1936_s0 }
 0xec2   :  { %v1160_v31 = vpop.f32.mrb[28].mxu0 }
 0xec3   :  { %v1166_v33 = vadd.f32 %v1160_v31, %v2060_v45  ;;  %v1745_v30 = vpop.f32.mrb[29].mxu0 }
 0xec4   :  { %v1163_v37 = vpop.f32.mrb[30].mxu0 }
 0xec5   :  { %1886 = vtanh.f32 %v1166_v33  ;;  %v1746_v39 = vpop.f32.mrb[31].mxu0  ;;  %v1167_v48 = vsub.f32 0.0, %v1166_v33 }
 0xec6   :  { %1888 = vpow2.f32 %v1089_v44 }
 0xec7   :  { %v1168_v50 = vmul.f32 1.442695, %v1167_v48 }
 0xecf   :  { %v1887_v41 = vpop.eup %1886 }
 0xed0   :  { %1176 = vrot.lane.b32.xlu1 %v1887_v41, %s1936_s0  ;;  %v1889_v56 = vpop.eup %1888 }
 0xed1   :  { %v1091_v46 = vadd.f32 1.0, %v1889_v56 }
 0xed3   :  { %1890 = vrcp.f32 %v1091_v46 }
 0xed4   :  { %1892 = vpow2.f32 %v1168_v50 }
 0xedd   :  { %v1891_v51 = vpop.eup %1890 }
 0xede   :  { %v1893_v45 = vpop.eup %1892  ;;  %v1095_v61 = vmul.f32 %v1891_v51, %v2235_v34 }
 0xedf   :  { %v1170_v55 = vadd.f32 1.0, %v1893_v45 }
 0xee1   :  { %1894 = vrcp.f32 %v1170_v55 }
 0xeeb   :  { %v1895_v57 = vpop.eup %1894 }
 0xeec   :  { %v1174_v2 = vmul.f32 %v1895_v57, %v2240_v8 }
 0xf27   :  { %v1098_v52 = vpop.permute.xlu0 %1097 }
 0xf28   :  { %v1100_v53 = vmul.f32 %v1891_v51, %v1098_v52 }
 0xf2a   :  { %1102 = vrot.lane.b32.xlu0 %v1100_v53, %s1937_s3 }
 0xf42   :  { %v1177_v47 = vpop.permute.xlu1 %1176 }
 0xf43   :  { %v1179_v59 = vmul.f32 %v1895_v57, %v1177_v47 }
 0xf45   :  { %1181 = vrot.lane.b32.xlu1 %v1179_v59, %s1937_s3 }
 0xf9c   :  { %v1103_v49 = vpop.permute.xlu0 %1102 }
 0xf9d   :  { %v2273_v63 = vadd.f32 %v1103_v49, %v1095_v61 }
 0xf9f   :  { %1896 = vtanh.f32 %v2273_v63 }
 0xfa9   :  { %v1897_v43 = vpop.eup %1896 }
 0xfaa   :  { %1108 = vrot.lane.b32.xlu0 %v1897_v43, %s1936_s0 }
 0xfb7   :  { %v1182_v3 = vpop.permute.xlu1 %1181 }
 0xfb8   :  { %v2278_v54 = vadd.f32 %v1182_v3, %v1174_v2 }
 0xfba   :  { %1898 = vtanh.f32 %v2278_v54 }
 0xfc4   :  { %v1899_v4 = vpop.eup %1898 }
 0xfc5   :  { %1187 = vrot.lane.b32.xlu1 %v1899_v4, %s1936_s0 }
0x101c   :  { %v1109_v5 = vpop.permute.xlu0 %1108 }
0x101d   :  { %v1111_v34 = vmul.f32 %v1891_v51, %v1109_v5 }
0x101f   :  { %v2282_v6 = vpack.c.bf16 %v1111_v34, %v1111_v34 }
0x1021   :  { %1200 = vrot.lane.b32.xlu0 %v2282_v6, %s1937_s3 }
0x1037   :  { %v1188_v58 = vpop.permute.xlu1 %1187 }
0x1038   :  { %v1190_v11 = vmul.f32 %v1895_v57, %v1188_v58 }
0x103a   :  { %v2286_v13 = vpack.c.bf16 %v1190_v11, %v1190_v11 }
0x103c   :  { %1279 = vrot.lane.b32.xlu1 %v2286_v13, %s1937_s3 }
0x1093   :  { %v1201_v8 = vpop.permute.xlu0 %1200 }
0x1094   :  { %1752 = vmatmul.mubr.msk.bf16.vlgmr.msra.gmra.mrb[32].mxu1 %vm230_vm2, %v1201_v8 }
0x1095   :  { %1764 = vmatpush3.bf16.msra.mxu1 %v1932_v10  ;;  %1767 = vmatprep.mubr.msk.bf16.mxu1 %vm1935_vm0, %v1933_v1 }
0x1096   :  { %1765 = vmatprep.subr.bf16.mxu1 %v1933_v1 }
0x1099   :  { %1766 = vmatpush3.bf16.msra.mxu1 %v1994_v9 }
0x10ae   :  { %v1280_v17 = vpop.permute.xlu1 %1279 }
0x10af   :  { %1760 = vmatmul.mubr.msk.bf16.vlgmr.msra.gmra.mrb[32].mxu0 %vm230_vm2, %v1280_v17 }
0x10b0   :  { %1772 = vmatpush3.bf16.msra.mxu0 %v2007_v12  ;;  %1775 = vmatprep.mubr.msk.bf16.mxu0 %vm1935_vm0, %v1933_v1 }
0x10b1   :  { %1773 = vmatprep.subr.bf16.mxu0 %v1933_v1 }
0x10b4   :  { %1774 = vmatpush3.bf16.msra.mxu0 %v2016_v14 }
0x1167   :  { %v1239_v18 = vpop.f32.mrb[32].mxu1 }
0x1168   :  { %v1245_v15 = vadd.f32 %v1239_v18, %v2075_v60  ;;  %v1753_v22 = vpop.f32.mrb[33].mxu1 }
0x1169   :  { %v1242_v7 = vpop.f32.mrb[34].mxu1 }
0x116a   :  { %1900 = vtanh.f32 %v1245_v15  ;;  %v1754_v23 = vpop.f32.mrb[35].mxu1  ;;  %v1246_v14 = vsub.f32 0.0, %v1245_v15 }
0x116c   :  { %v1247_v31 = vmul.f32 1.442695, %v1246_v14 }
0x1174   :  { %v1901_v9 = vpop.eup %1900 }
0x1175   :  { %1255 = vrot.lane.b32.xlu0 %v1901_v9, %s1936_s0 }
0x1182   :  { %v1318_v20 = vpop.f32.mrb[32].mxu0 }
0x1183   :  { %v1324_v12 = vadd.f32 %v1318_v20, %v2056_v38  ;;  %v1761_v27 = vpop.f32.mrb[33].mxu0 }
0x1184   :  { %v1321_v28 = vpop.f32.mrb[34].mxu0 }
0x1185   :  { %1902 = vtanh.f32 %v1324_v12  ;;  %v1762_v25 = vpop.f32.mrb[35].mxu0  ;;  %v1325_v30 = vsub.f32 0.0, %v1324_v12 }
0x1186   :  { %1904 = vpow2.f32 %v1247_v31 }
0x1187   :  { %v1326_v37 = vmul.f32 1.442695, %v1325_v30 }
0x118f   :  { %v1903_v1 = vpop.eup %1902 }
0x1190   :  { %1334 = vrot.lane.b32.xlu1 %v1903_v1, %s1936_s0  ;;  %v1905_v60 = vpop.eup %1904 }
0x1191   :  { %v1249_v33 = vadd.f32 1.0, %v1905_v60 }
0x1193   :  { %1906 = vrcp.f32 %v1249_v33 }
0x1194   :  { %1908 = vpow2.f32 %v1326_v37 }
0x119d   :  { %v1907_v39 = vpop.eup %1906 }
0x119e   :  { %v1909_v38 = vpop.eup %1908  ;;  %v1253_v50 = vmul.f32 %v1907_v39, %v2273_v63 }
0x119f   :  { %v1328_v44 = vadd.f32 1.0, %v1909_v38 }
0x11a1   :  { %1910 = vrcp.f32 %v1328_v44 }
0x11ab   :  { %v1911_v56 = vpop.eup %1910 }
0x11ac   :  { %v1332_v45 = vmul.f32 %v1911_v56, %v2278_v54 }
0x11e7   :  { %v1256_v41 = vpop.permute.xlu0 %1255 }
0x11e8   :  { %v1258_v42 = vmul.f32 %v1907_v39, %v1256_v41 }
0x11ea   :  { %1260 = vrot.lane.b32.xlu0 %v1258_v42, %s1937_s3 }
0x1202   :  { %v1335_v46 = vpop.permute.xlu1 %1334 }
0x1203   :  { %v1337_v48 = vmul.f32 %v1911_v56, %v1335_v46 }
0x1205   :  { %1339 = vrot.lane.b32.xlu1 %v1337_v48, %s1937_s3 }
0x125c   :  { %v1261_v51 = vpop.permute.xlu0 %1260 }
0x125d   :  { %v1263_v52 = vadd.f32 %v1261_v51, %v1253_v50 }
0x125f   :  { %1912 = vtanh.f32 %v1263_v52 }
0x1269   :  { %v1913_v53 = vpop.eup %1912 }
0x126a   :  { %1266 = vrot.lane.b32.xlu0 %v1913_v53, %s1936_s0 }
0x1277   :  { %v1340_v55 = vpop.permute.xlu1 %1339 }
0x1278   :  { %v1342_v57 = vadd.f32 %v1340_v55, %v1332_v45 }
0x127a   :  { %1914 = vtanh.f32 %v1342_v57 }
0x1284   :  { %v1915_v47 = vpop.eup %1914 }
0x1285   :  { %1345 = vrot.lane.b32.xlu1 %v1915_v47, %s1936_s0 }
0x12dc   :  { %v1267_v59 = vpop.permute.xlu0 %1266 }
0x12dd   :  { %v1269_v61 = vmul.f32 %v1907_v39, %v1267_v59 }
0x12df   :  { %v2314_v49 = vpack.c.bf16 %v1269_v61, %v1269_v61 }
0x12e1   :  { %1358 = vrot.lane.b32.xlu0 %v2314_v49, %s1937_s3 }
0x12f7   :  { %v1346_v63 = vpop.permute.xlu1 %1345 }
0x12f8   :  { %v1348_v43 = vmul.f32 %v1911_v56, %v1346_v63 }
0x12fa   :  { %v2318_v2 = vpack.c.bf16 %v1348_v43, %v1348_v43 }
0x12fc   :  { %1437 = vrot.lane.b32.xlu1 %v2318_v2, %s1937_s3 }
0x1353   :  { %v1359_v3 = vpop.permute.xlu0 %1358 }
0x1354   :  { %1768 = vmatmul.mubr.msk.bf16.vlgmr.msra.gmra.mrb[36].mxu1 %vm230_vm2, %v1359_v3 }
0x136e   :  { %v1438_v54 = vpop.permute.xlu1 %1437 }
0x136f   :  { %1776 = vmatmul.mubr.msk.bf16.vlgmr.msra.gmra.mrb[36].mxu0 %vm230_vm2, %v1438_v54 }
0x1427   :  { %v1397_v4 = vpop.f32.mrb[36].mxu1 }
0x1428   :  { %v1403_v5 = vadd.f32 %v1397_v4, %v2079_v0  ;;  %v1769_v34 = vpop.f32.mrb[37].mxu1 }
0x1429   :  { %v1400_v58 = vpop.f32.mrb[38].mxu1 }
0x142a   :  { %1916 = vtanh.f32 %v1403_v5  ;;  %v1770_v11 = vpop.f32.mrb[39].mxu1  ;;  %v1404_v23 = vsub.f32 0.0, %v1403_v5 }
0x142c   :  { %v1405_v9 = vmul.f32 1.442695, %v1404_v23 }
0x1434   :  { %v1917_v8 = vpop.eup %1916 }
0x1435   :  { %1413 = vrot.lane.b32.xlu0 %v1917_v8, %s1936_s0 }
0x1442   :  { %v1476_v10 = vpop.f32.mrb[36].mxu0 }
0x1443   :  { %v1482_v17 = vadd.f32 %v1476_v10, %v2052_v32  ;;  %v1777_v18 = vpop.f32.mrb[37].mxu0 }
0x1444   :  { %v1479_v15 = vpop.f32.mrb[38].mxu0 }
0x1445   :  { %1918 = vtanh.f32 %v1482_v17  ;;  %v1778_v22 = vpop.f32.mrb[39].mxu0  ;;  %v1483_v12 = vsub.f32 0.0, %v1482_v17 }
0x1446   :  { %1920 = vpow2.f32 %v1405_v9 }
0x1447   :  { %v1484_v27 = vmul.f32 1.442695, %v1483_v12 }
0x144f   :  { %v1919_v7 = vpop.eup %1918 }
0x1450   :  { %1492 = vrot.lane.b32.xlu1 %v1919_v7, %s1936_s0  ;;  %v1921_v0 = vpop.eup %1920 }
0x1451   :  { %v1407_v20 = vadd.f32 1.0, %v1921_v0 }
0x1453   :  { %1922 = vrcp.f32 %v1407_v20 }
0x1454   :  { %1924 = vpow2.f32 %v1484_v27 }
0x145d   :  { %v1923_v28 = vpop.eup %1922 }
0x145e   :  { %v1925_v32 = vpop.eup %1924  ;;  %v1411_v30 = vmul.f32 %v1923_v28, %v1263_v52 }
0x145f   :  { %v1486_v14 = vadd.f32 1.0, %v1925_v32 }
0x1461   :  { %1926 = vrcp.f32 %v1486_v14 }
0x146b   :  { %v1927_v31 = vpop.eup %1926 }
0x146c   :  { %v1490_v42 = vmul.f32 %v1927_v31, %v1342_v57 }
0x14a7   :  { %v1414_v25 = vpop.permute.xlu0 %1413 }
0x14a8   :  { %v1416_v1 = vmul.f32 %v1923_v28, %v1414_v25 }
0x14aa   :  { %1418 = vrot.lane.b32.xlu0 %v1416_v1, %s1937_s3 }
0x14c2   :  { %v1493_v60 = vpop.permute.xlu1 %1492 }
0x14c3   :  { %v1495_v33 = vmul.f32 %v1927_v31, %v1493_v60 }
0x14c5   :  { %1497 = vrot.lane.b32.xlu1 %v1495_v33, %s1937_s3 }
0x151c   :  { %v1419_v37 = vpop.permute.xlu0 %1418 }
0x151d   :  { %v1421_v39 = vadd.f32 %v1419_v37, %v1411_v30 }
0x151f   :  { %1928 = vtanh.f32 %v1421_v39 }
0x1529   :  { %v1929_v41 = vpop.eup %1928 }
0x152a   :  { %1424 = vrot.lane.b32.xlu0 %v1929_v41, %s1936_s0 }
0x152e   :  { %303 = vrot.lane.b32.xlu0 %v2092_v36, %s1937_s3 }
0x1532   :  { %473 = vrot.lane.b32.xlu0 %v2130_v29, %s1937_s3 }
0x1536   :  { %635 = vrot.lane.b32.xlu0 %v2168_v24, %s1937_s3 }
0x1537   :  { %v1498_v38 = vpop.permute.xlu1 %1497 }
0x1538   :  { %v1500_v44 = vadd.f32 %v1498_v38, %v1490_v42 }
0x153a   :  { %1930 = vtanh.f32 %v1500_v44  ;;  %797 = vrot.lane.b32.xlu0 %v2206_v19, %s1937_s3 }
0x153e   :  { %958 = vrot.lane.b32.xlu0 %v2244_v62, %s1937_s3 }
0x1542   :  { %1116 = vrot.lane.b32.xlu0 %v2282_v6, %s1937_s3 }
0x1544   :  { %v1931_v36 = vpop.eup %1930 }
0x1545   :  { %1503 = vrot.lane.b32.xlu1 %v1931_v36, %s1936_s0 }
0x1546   :  { %1274 = vrot.lane.b32.xlu0 %v2314_v49, %s1937_s3 }
0x1549   :  { %391 = vrot.lane.b32.xlu1 %v2096_v40, %s1936_s0 }
0x154d   :  { %554 = vrot.lane.b32.xlu1 %v2134_v35, %s1936_s0 }
0x1551   :  { %716 = vrot.lane.b32.xlu1 %v2172_v26, %s1936_s0 }
0x1555   :  { %878 = vrot.lane.b32.xlu1 %v2210_v21, %s1936_s0 }
0x1559   :  { %1037 = vrot.lane.b32.xlu1 %v2248_v16, %s1936_s0 }
0x155d   :  { %1195 = vrot.lane.b32.xlu1 %v2286_v13, %s1936_s0 }
0x1561   :  { %1353 = vrot.lane.b32.xlu1 %v2318_v2, %s1936_s0 }
0x159c   :  { %v1425_v29 = vpop.permute.xlu0 %1424 }
0x159d   :  { %v1427_v40 = vmul.f32 %v1923_v28, %v1425_v29 }
0x159f   :  { %v1601_v24 = vpack.c.bf16 %v1427_v40, %v1427_v40 }
0x15a0   :  { %v304_v35 = vpop.permute.xlu0 %303 }
0x15a1   :  { %307 = vst.msk [vmem:[%s2430_s4] sm:$0xf] %vm306_vm3, %v304_v35  ;;  %1432 = vrot.lane.b32.xlu0 %v1601_v24, %s1937_s3 }
0x15a4   :  { %v474_v26 = vpop.permute.xlu0 %473 }
0x15a5   :  { %1548 = vst.msk [vmem:[%s2430_s4 + $0x4] sm:$0xf] %vm306_vm3, %v474_v26 }
0x15a8   :  { %v636_v19 = vpop.permute.xlu0 %635 }
0x15a9   :  { %1554 = vst.msk [vmem:[%s2430_s4 + $0x8] sm:$0xf] %vm306_vm3, %v636_v19 }
0x15ac   :  { %v798_v21 = vpop.permute.xlu0 %797 }
0x15ad   :  { %1560 = vst.msk [vmem:[%s2430_s4 + $0xc] sm:$0xf] %vm306_vm3, %v798_v21 }
0x15b0   :  { %v959_v62 = vpop.permute.xlu0 %958 }
0x15b4   :  { %v1117_v13 = vpop.permute.xlu0 %1116 }
0x15b7   :  { %v1504_v16 = vpop.permute.xlu1 %1503 }
0x15b8   :  { %v1506_v6 = vmul.f32 %v1927_v31, %v1504_v16  ;;  %v1275_v50 = vpop.permute.xlu0 %1274 }
0x15ba   :  { %v1602_v56 = vpack.c.bf16 %v1506_v6, %v1506_v6 }
0x15bb   :  { %v392_v46 = vpop.permute.xlu1 %391 }
0x15bc   :  { %1545 = vst.msk [vmem:[%s2430_s4 + $0x1c] sm:$0xf] %vm395_vm4, %v392_v46  ;;  %1511 = vrot.lane.b32.xlu1 %v1602_v56, %s1936_s0 }
0x15bf   :  { %v555_v48 = vpop.permute.xlu1 %554 }
0x15c0   :  { %1551 = vst.msk [vmem:[%s2430_s4 + $0x18] sm:$0xf] %vm395_vm4, %v555_v48 }
0x15c1   :  { %1578 = vst.msk [vmem:[%s2430_s4 + $0x18] sm:$0xf] %vm306_vm3, %v1275_v50 }
0x15c3   :  { %v717_v51 = vpop.permute.xlu1 %716 }
0x15c4   :  { %1557 = vst.msk [vmem:[%s2430_s4 + $0x14] sm:$0xf] %vm395_vm4, %v717_v51 }
0x15c5   :  { %1572 = vst.msk [vmem:[%s2430_s4 + $0x14] sm:$0xf] %vm306_vm3, %v1117_v13 }
0x15c7   :  { %v879_v52 = vpop.permute.xlu1 %878 }
0x15c8   :  { %1563 = vst.msk [vmem:[%s2430_s4 + $0x10] sm:$0xf] %vm395_vm4, %v879_v52 }
0x15c9   :  { %1566 = vst.msk [vmem:[%s2430_s4 + $0x10] sm:$0xf] %vm306_vm3, %v959_v62 }
0x15cb   :  { %v1038_v53 = vpop.permute.xlu1 %1037 }
0x15cc   :  { %1569 = vst.msk [vmem:[%s2430_s4 + $0xc] sm:$0xf] %vm395_vm4, %v1038_v53 }
0x15cf   :  { %v1196_v45 = vpop.permute.xlu1 %1195 }
0x15d0   :  { %1575 = vst.msk [vmem:[%s2430_s4 + $0x8] sm:$0xf] %vm395_vm4, %v1196_v45 }
0x15d3   :  { %v1354_v55 = vpop.permute.xlu1 %1353 }
0x15d4   :  { %1581 = vst.msk [vmem:[%s2430_s4 + $0x4] sm:$0xf] %vm395_vm4, %v1354_v55 }
0x1613   :  { %v1433_v57 = vpop.permute.xlu0 %1432 }
0x1614   :  { %1584 = vst.msk [vmem:[%s2430_s4 + $0x1c] sm:$0xf] %vm306_vm3, %v1433_v57 }
0x162e   :  { %v1512_v47 = vpop.permute.xlu1 %1511 }
0x162f   :  { %1514 = vst.msk [vmem:[%s2430_s4] sm:$0xf] %vm395_vm4, %v1512_v47 }

// kernel: attention_rnn_forward.5
= control target key start
LH: loop header
LB: loop body
LE: loop exit
PB: predicated region body
PF: predicated region fallthrough
CT: control target
= control target key end

     0   :  { %vm50_vm0 = vcmask 523264   ;;  %v2010_v0 = vmov 0.0   ;;  %vm2011_vm1 = vmmov 0   ;;  %vm395_vm2 = vcmask 64512   ;;  %s2407_s0 = inlined_call_operand.vmem [shape: bf16[8,8,64], index: 0, kind: input, shape index: {}]   ;;  %s2408_s2 = inlined_call_operand.vmem [shape: bf16[64,128], index: 2, kind: input, shape index: {}]   ;;  %s2409_s1 = inlined_call_operand.vmem [shape: bf16[64,128], index: 1, kind: input, shape index: {}]   ;;  %s2410_s6 = inlined_call_operand.vmem [shape: bf16[128,128], index: 6, kind: input, shape index: {}]   ;;  %s2411_s8 = inlined_call_operand.vmem [shape: bf16[128,128], index: 8, kind: input, shape index: {}]   ;;  %s2412_s3 = inlined_call_operand.vmem [shape: f32[1,128], index: 3, kind: input, shape index: {}]   ;;  %s2413_s4 = inlined_call_operand.vmem [shape: f32[8,128], index: 4, kind: input, shape index: {}]   ;;  %s2414_s5 = inlined_call_operand.vmem [shape: f32[8,128], index: 5, kind: input, shape index: {}]   ;;  %s2415_s10 = inlined_call_operand.vmem [shape: bf16[128,128], index: 10, kind: input, shape index: {}]   ;;  %s2416_s7 = inlined_call_operand.vmem [shape: f32[1,128], index: 7, kind: input, shape index: {}]   ;;  %s2417_s9 = inlined_call_operand.vmem [shape: f32[1,128], index: 9, kind: input, shape index: {}]   ;;  %s2418_s11 = inlined_call_operand.vmem [shape: f32[1,128], index: 11, kind: input, shape index: {}]   ;;  %s2419_s12 = inlined_call_operand.vmem [shape: f32[8,8,128], index: 12, kind: output, shape index: {}]  }
   0x1   :  { %1732 = vmatprep.subr.bf16.mxu0 %v2010_v0  ;;  %1738 = vmatprep.subr.bf16.mxu1 %v2010_v0  ;;  %v2082_v1 = vld [vmem:[%s2407_s0] sm:$0xf]  ;;  %v2087_v2 = vld [vmem:[%s2407_s0 + $0x4] sm:$0xf]  ;;  %v2102_v5 = vld [vmem:[%s2407_s0 + $0x8] sm:$0xf] }
   0x2   :  { %v52_v3 = vsel %vm50_vm0, %v2082_v1, 0  ;;  %v95_v4 = vsel %vm50_vm0, %v2087_v2, 0  ;;  %1734 = vmatprep.mubr.msk.bf16.mxu0 %vm2011_vm1, %v2010_v0  ;;  %1740 = vmatprep.mubr.msk.bf16.mxu1 %vm2011_vm1, %v2010_v0  ;;  %v2107_v6 = vld [vmem:[%s2407_s0 + $0xc] sm:$0xf]  ;;  %v138_v7 = vsel %vm50_vm0, %v2102_v5, 0  ;;  %vm495_vm3 = vcmask 1043456  }
   0x3   :  { %1733 = vmatpush3.bf16.xpose.msra.mxu0 %v52_v3  ;;  %1739 = vmatpush3.bf16.xpose.msra.mxu1 %v95_v4  ;;  %v181_v8 = vsel %vm50_vm0, %v2107_v6, 0  ;;  %v2126_v9 = vld [vmem:[%s2407_s0 + $0x10] sm:$0xf]  ;;  %v2131_v10 = vld [vmem:[%s2407_s0 + $0x14] sm:$0xf] }
   0x4   :  { %1744 = vmatprep.subr.bf16.mxu0 %v2010_v0  ;;  %1750 = vmatprep.subr.bf16.mxu1 %v2010_v0  ;;  %v224_v11 = vsel %vm50_vm0, %v2126_v9, 0  ;;  %v267_v12 = vsel %vm50_vm0, %v2131_v10, 0  ;;  %v2150_v13 = vld [vmem:[%s2407_s0 + $0x18] sm:$0xf]  ;;  %v2155_v14 = vld [vmem:[%s2407_s0 + $0x1c] sm:$0xf] }
   0x5   :  { %v310_v15 = vsel %vm50_vm0, %v2150_v13, 0  ;;  %v353_v16 = vsel %vm50_vm0, %v2155_v14, 0 }
   0xa   :  { %1735 = vmatmul.mubr.msk.bf16.vlgmr.msra.gmra.mrb[0].mxu0 %vm50_vm0, %v2082_v1  ;;  %1741 = vmatmul.mubr.msk.bf16.vlgmr.msra.gmra.mrb[0].mxu1 %vm50_vm0, %v2087_v2 }
   0xb   :  { %1745 = vmatpush3.bf16.xpose.msra.mxu0 %v138_v7  ;;  %1751 = vmatpush3.bf16.xpose.msra.mxu1 %v181_v8 }
   0xc   :  { %1746 = vmatprep.mubr.msk.bf16.mxu0 %vm2011_vm1, %v2010_v0  ;;  %1752 = vmatprep.mubr.msk.bf16.mxu1 %vm2011_vm1, %v2010_v0 }
   0xd   :  { %1756 = vmatprep.subr.bf16.mxu0 %v2010_v0  ;;  %1762 = vmatprep.subr.bf16.mxu1 %v2010_v0 }
  0x12   :  { %1747 = vmatmul.mubr.msk.bf16.vlgmr.msra.gmra.mrb[4].mxu0 %vm50_vm0, %v2102_v5  ;;  %1753 = vmatmul.mubr.msk.bf16.vlgmr.msra.gmra.mrb[4].mxu1 %vm50_vm0, %v2107_v6 }
  0x13   :  { %1757 = vmatpush3.bf16.xpose.msra.mxu0 %v224_v11  ;;  %1763 = vmatpush3.bf16.xpose.msra.mxu1 %v267_v12 }
  0x14   :  { %1758 = vmatprep.mubr.msk.bf16.mxu0 %vm2011_vm1, %v2010_v0  ;;  %1764 = vmatprep.mubr.msk.bf16.mxu1 %vm2011_vm1, %v2010_v0 }
  0x15   :  { %1768 = vmatprep.subr.bf16.mxu0 %v2010_v0  ;;  %1774 = vmatprep.subr.bf16.mxu1 %v2010_v0 }
  0x1a   :  { %1759 = vmatmul.mubr.msk.bf16.vlgmr.msra.gmra.mrb[8].mxu0 %vm50_vm0, %v2126_v9  ;;  %1765 = vmatmul.mubr.msk.bf16.vlgmr.msra.gmra.mrb[8].mxu1 %vm50_vm0, %v2131_v10 }
  0x1b   :  { %1769 = vmatpush3.bf16.xpose.msra.mxu0 %v310_v15  ;;  %1775 = vmatpush3.bf16.xpose.msra.mxu1 %v353_v16 }
  0x1c   :  { %1770 = vmatprep.mubr.msk.bf16.mxu0 %vm2011_vm1, %v2010_v0  ;;  %1776 = vmatprep.mubr.msk.bf16.mxu1 %vm2011_vm1, %v2010_v0 }
  0x1d   :  { %1780 = vmatprep.subr.bf16.mxu0 %v2010_v0  ;;  %1786 = vmatprep.subr.bf16.mxu1 %v2010_v0 }
  0x22   :  { %1771 = vmatmul.mubr.msk.bf16.vlgmr.msra.gmra.mrb[12].mxu0 %vm50_vm0, %v2150_v13  ;;  %1777 = vmatmul.mubr.msk.bf16.vlgmr.msra.gmra.mrb[12].mxu1 %vm50_vm0, %v2155_v14 }
  0x23   :  { %1782 = vmatprep.mubr.msk.bf16.mxu0 %vm2011_vm1, %v2010_v0  ;;  %1788 = vmatprep.mubr.msk.bf16.mxu1 %vm2011_vm1, %v2010_v0 }
  0xdd   :  { %v88_v17 = vpop.f32.mrb[0].mxu0  ;;  %v131_v18 = vpop.f32.mrb[0].mxu1 }
  0xde   :  { %v1736_v19 = vpop.f32.mrb[1].mxu0  ;;  %v396_v20 = vsel %vm395_vm2, %v88_v17, -inf  ;;  %v1742_v21 = vpop.f32.mrb[1].mxu1  ;;  %v399_v26 = vsel %vm395_vm2, %v131_v18, -inf }
  0xdf   :  { %397 = vmax.xlane.f32.xlu0 %v396_v20  ;;  %v91_v22 = vpop.f32.mrb[2].mxu0  ;;  %v134_v23 = vpop.f32.mrb[2].mxu1 }
  0xe0   :  { %v1737_v24 = vpop.f32.mrb[3].mxu0  ;;  %v1743_v25 = vpop.f32.mrb[3].mxu1 }
  0xe3   :  { %400 = vmax.xlane.f32.xlu0 %v399_v26 }
  0xe5   :  { %v174_v27 = vpop.f32.mrb[4].mxu0  ;;  %v217_v28 = vpop.f32.mrb[4].mxu1 }
  0xe6   :  { %v1748_v29 = vpop.f32.mrb[5].mxu0  ;;  %v402_v30 = vsel %vm395_vm2, %v174_v27, -inf  ;;  %v1754_v31 = vpop.f32.mrb[5].mxu1  ;;  %v405_v36 = vsel %vm395_vm2, %v217_v28, -inf }
  0xe7   :  { %403 = vmax.xlane.f32.xlu1 %v402_v30  ;;  %v177_v32 = vpop.f32.mrb[6].mxu0  ;;  %v220_v33 = vpop.f32.mrb[6].mxu1 }
  0xe8   :  { %v1749_v34 = vpop.f32.mrb[7].mxu0  ;;  %v1755_v35 = vpop.f32.mrb[7].mxu1 }
  0xeb   :  { %406 = vmax.xlane.f32.xlu1 %v405_v36 }
  0xed   :  { %v260_v37 = vpop.f32.mrb[8].mxu0  ;;  %v303_v38 = vpop.f32.mrb[8].mxu1 }
  0xee   :  { %v411_v39 = vsel %vm395_vm2, %v303_v38, -inf  ;;  %v408_v40 = vsel %vm395_vm2, %v260_v37, -inf  ;;  %v1760_v41 = vpop.f32.mrb[9].mxu0  ;;  %v1766_v42 = vpop.f32.mrb[9].mxu1 }
  0xef   :  { %412 = vmax.xlane.f32.xlu1 %v411_v39  ;;  %409 = vmax.xlane.f32.xlu0 %v408_v40  ;;  %v263_v43 = vpop.f32.mrb[10].mxu0  ;;  %v306_v44 = vpop.f32.mrb[10].mxu1  ;;  %v496_v42 = vsel %vm495_vm3, %v2082_v1, 0 }
  0xf0   :  { %v1761_v45 = vpop.f32.mrb[11].mxu0  ;;  %v1767_v46 = vpop.f32.mrb[11].mxu1  ;;  %1781 = vmatpush3.bf16.msra.mxu0 %v496_v42  ;;  %v541_v43 = vsel %vm495_vm3, %v2087_v2, 0 }
  0xf1   :  { %1792 = vmatprep.subr.bf16.mxu0 %v2010_v0  ;;  %1787 = vmatpush3.bf16.msra.mxu1 %v541_v43 }
  0xf2   :  { %1798 = vmatprep.subr.bf16.mxu1 %v2010_v0 }
  0xf5   :  { %v346_v47 = vpop.f32.mrb[12].mxu0  ;;  %v389_v48 = vpop.f32.mrb[12].mxu1 }
  0xf6   :  { %v417_v49 = vsel %vm395_vm2, %v389_v48, -inf  ;;  %v414_v50 = vsel %vm395_vm2, %v346_v47, -inf  ;;  %v1772_v51 = vpop.f32.mrb[13].mxu0  ;;  %v1778_v52 = vpop.f32.mrb[13].mxu1 }
  0xf7   :  { %418 = vmax.xlane.f32.xlu1 %v417_v49  ;;  %415 = vmax.xlane.f32.xlu0 %v414_v50  ;;  %v349_v53 = vpop.f32.mrb[14].mxu0  ;;  %v392_v54 = vpop.f32.mrb[14].mxu1  ;;  %v586_v51 = vsel %vm495_vm3, %v2102_v5, 0 }
  0xf8   :  { %v1773_v55 = vpop.f32.mrb[15].mxu0  ;;  %v1779_v56 = vpop.f32.mrb[15].mxu1 }
 0x16c   :  { %v398_v57 = vpop.xlane.xlu0 %397 }
 0x16d   :  { %v420_v58 = vsub.f32 %v88_v17, %v398_v57  ;;  %v631_v57 = vsel %vm495_vm3, %v2107_v6, 0 }
 0x16f   :  { %v428_v59 = vmul.f32 1.442695, %v420_v58 }
 0x170   :  { %v401_v60 = vpop.xlane.xlu0 %400 }
 0x171   :  { %1978 = vpow2.f32 %v428_v59  ;;  %v421_v61 = vsub.f32 %v131_v18, %v401_v60 }
 0x173   :  { %v430_v62 = vmul.f32 1.442695, %v421_v61  ;;  %v676_v61 = vsel %vm495_vm3, %v2126_v9, 0 }
 0x174   :  { %v404_v63 = vpop.xlane.xlu1 %403 }
 0x175   :  { %1980 = vpow2.f32 %v430_v62  ;;  %v422_v3 = vsub.f32 %v174_v27, %v404_v63 }
 0x177   :  { %v432_v4 = vmul.f32 1.442695, %v422_v3 }
 0x178   :  { %v407_v7 = vpop.xlane.xlu1 %406 }
 0x179   :  { %1982 = vpow2.f32 %v432_v4  ;;  %v423_v8 = vsub.f32 %v217_v28, %v407_v7 }
 0x17b   :  { %v1979_v11 = vpop.eup %1978  ;;  %v434_v12 = vmul.f32 1.442695, %v423_v8  ;;  %v721_v8 = vsel %vm495_vm3, %v2131_v10, 0 }
 0x17c   :  { %v413_v15 = vpop.xlane.xlu1 %412  ;;  %v410_v16 = vpop.xlane.xlu0 %409  ;;  %v444_v19 = vsel %vm395_vm2, %v1979_v11, 0.0 }
 0x17d   :  { %1984 = vpow2.f32 %v434_v12  ;;  %v425_v17 = vsub.f32 %v303_v38, %v413_v15  ;;  %v424_v20 = vsub.f32 %v260_v37, %v410_v16  ;;  %445 = vadd.xlane.f32.xlu0 %v444_v19 }
 0x17f   :  { %v1981_v21 = vpop.eup %1980  ;;  %v438_v18 = vmul.f32 1.442695, %v425_v17  ;;  %v436_v22 = vmul.f32 1.442695, %v424_v20  ;;  %v766_v17 = vsel %vm495_vm3, %v2150_v13, 0  ;;  %v1943_v20 = vld [vmem:[%s2408_s2] sm:$0xff]  }
 0x180   :  { %v447_v23 = vsel %vm395_vm2, %v1981_v21, 0.0 }
 0x181   :  { %1986 = vpow2.f32 %v438_v18  ;;  %448 = vadd.xlane.f32.xlu1 %v447_v23  ;;  %v811_v18 = vsel %vm495_vm3, %v2155_v14, 0 }
 0x182   :  { %1988 = vpow2.f32 %v436_v22 }
 0x183   :  { %v1983_v24 = vpop.eup %1982 }
 0x184   :  { %v419_v25 = vpop.xlane.xlu1 %418  ;;  %v416_v26 = vpop.xlane.xlu0 %415  ;;  %v450_v27 = vsel %vm395_vm2, %v1983_v24, 0.0 }
 0x185   :  { %v427_v28 = vsub.f32 %v389_v48, %v419_v25  ;;  %v426_v29 = vsub.f32 %v346_v47, %v416_v26  ;;  %451 = vadd.xlane.f32.xlu0 %v450_v27  ;;  %v1600_v26 = vcombine.low %v2082_v1, %v2087_v2  ;;  %v1946_v1 = vld [vmem:[%s2408_s2 + $0x18] sm:$0xff]   ;;  %v1948_v2 = vld [vmem:[%s2409_s1] sm:$0xff]  }
 0x187   :  { %v1985_v30 = vpop.eup %1984  ;;  %v442_v31 = vmul.f32 1.442695, %v427_v28  ;;  %v440_v32 = vmul.f32 1.442695, %v426_v29  ;;  %v1944_v28 = vld [vmem:[%s2408_s2 + $0x8] sm:$0xff]  }
 0x188   :  { %v453_v33 = vsel %vm395_vm2, %v1985_v30, 0.0 }
 0x189   :  { %1990 = vpow2.f32 %v442_v31  ;;  %454 = vadd.xlane.f32.xlu1 %v453_v33  ;;  %v1949_v31 = vld [vmem:[%s2409_s1 + $0x8] sm:$0xff]   ;;  %v1603_v33 = vcombine.low %v2150_v13, %v2155_v14  ;;  %v1956_v13 = vld [vmem:[%s2410_s6 + $0x10] sm:$0xff]   ;;  %v1957_v14 = vld [vmem:[%s2410_s6 + $0x18] sm:$0xff]  }
 0x18a   :  { %1992 = vpow2.f32 %v440_v32  ;;  %v1602_v32 = vcombine.low %v2126_v9, %v2131_v10  ;;  %v1954_v9 = vld [vmem:[%s2410_s6] sm:$0xff]   ;;  %v1955_v10 = vld [vmem:[%s2410_s6 + $0x8] sm:$0xff]  }
 0x18b   :  { %v2191_v34 = vpop.eup %1986 }
 0x18c   :  { %v2193_v35 = vpop.eup %1988  ;;  %v459_v36 = vsel %vm395_vm2, %v2191_v34, 0.0 }
 0x18d   :  { %460 = vadd.xlane.f32.xlu1 %v459_v36  ;;  %v456_v37 = vsel %vm395_vm2, %v2193_v35, 0.0 }
 0x18e   :  { %457 = vadd.xlane.f32.xlu0 %v456_v37 }
 0x193   :  { %v2199_v38 = vpop.eup %1990 }
 0x194   :  { %v2201_v39 = vpop.eup %1992  ;;  %v465_v40 = vsel %vm395_vm2, %v2199_v38, 0.0 }
 0x195   :  { %466 = vadd.xlane.f32.xlu1 %v465_v40  ;;  %v462_v41 = vsel %vm395_vm2, %v2201_v39, 0.0 }
 0x196   :  { %463 = vadd.xlane.f32.xlu0 %v462_v41 }
 0x20a   :  { %v446_v44 = vpop.xlane.xlu0 %445 }
 0x20b   :  { %1994 = vrcp.f32 %v446_v44 }
 0x20e   :  { %v449_v45 = vpop.xlane.xlu1 %448 }
 0x20f   :  { %1996 = vrcp.f32 %v449_v45 }
 0x212   :  { %v452_v46 = vpop.xlane.xlu0 %451 }
 0x213   :  { %1998 = vrcp.f32 %v452_v46 }
 0x215   :  { %v1995_v47 = vpop.eup %1994 }
 0x216   :  { %v476_v48 = vmul.f32 %v1995_v47, %v1979_v11  ;;  %v455_v49 = vpop.xlane.xlu1 %454 }
 0x217   :  { %2000 = vrcp.f32 %v455_v49 }
 0x218   :  { %v484_v50 = vpack.c.bf16 %v476_v48, %v476_v48 }
 0x219   :  { %v1997_v52 = vpop.eup %1996 }
 0x21a   :  { %v477_v53 = vmul.f32 %v1997_v52, %v1981_v21  ;;  %v461_v54 = vpop.xlane.xlu1 %460  ;;  %1783 = vmatmul.mubr.msk.bf16.vlgmr.msra.gmra.mrb[16].mxu0 %vm395_vm2, %v484_v50 }
 0x21b   :  { %2002 = vrcp.f32 %v461_v54  ;;  %v458_v55 = vpop.xlane.xlu0 %457  ;;  %1793 = vmatpush3.bf16.msra.mxu0 %v586_v51  ;;  %1794 = vmatprep.mubr.msk.bf16.mxu0 %vm2011_vm1, %v2010_v0 }
 0x21c   :  { %2004 = vrcp.f32 %v458_v55  ;;  %v485_v56 = vpack.c.bf16 %v477_v53, %v477_v53  ;;  %1804 = vmatprep.subr.bf16.mxu0 %v2010_v0 }
 0x21d   :  { %v1999_v58 = vpop.eup %1998 }
 0x21e   :  { %v478_v59 = vmul.f32 %v1999_v58, %v1983_v24  ;;  %1789 = vmatmul.mubr.msk.bf16.vlgmr.msra.gmra.mrb[16].mxu1 %vm395_vm2, %v485_v56 }
 0x21f   :  { %1799 = vmatpush3.bf16.msra.mxu1 %v631_v57  ;;  %1800 = vmatprep.mubr.msk.bf16.mxu1 %vm2011_vm1, %v2010_v0 }
 0x220   :  { %v486_v60 = vpack.c.bf16 %v478_v59, %v478_v59  ;;  %1810 = vmatprep.subr.bf16.mxu1 %v2010_v0 }
 0x221   :  { %v2001_v62 = vpop.eup %2000 }
 0x222   :  { %v479_v63 = vmul.f32 %v2001_v62, %v1985_v30  ;;  %v467_v3 = vpop.xlane.xlu1 %466  ;;  %1795 = vmatmul.mubr.msk.bf16.vlgmr.msra.gmra.mrb[20].mxu0 %vm395_vm2, %v486_v60  ;;  %v1601_v30 = vcombine.low %v2102_v5, %v2107_v6  ;;  %v1952_v5 = vld [vmem:[%s2409_s1 + $0x10] sm:$0xff]   ;;  %v1953_v6 = vld [vmem:[%s2409_s1 + $0x18] sm:$0xff]  }
 0x223   :  { %2006 = vrcp.f32 %v467_v3  ;;  %v464_v4 = vpop.xlane.xlu0 %463  ;;  %1805 = vmatpush3.bf16.msra.mxu0 %v676_v61  ;;  %1806 = vmatprep.mubr.msk.bf16.mxu0 %vm2011_vm1, %v2010_v0 }
 0x224   :  { %2008 = vrcp.f32 %v464_v4  ;;  %v487_v7 = vpack.c.bf16 %v479_v63, %v479_v63  ;;  %1816 = vmatprep.subr.bf16.mxu0 %v2010_v0 }
 0x225   :  { %v2003_v11 = vpop.eup %2002 }
 0x226   :  { %v2005_v12 = vpop.eup %2004  ;;  %1801 = vmatmul.mubr.msk.bf16.vlgmr.msra.gmra.mrb[20].mxu1 %vm395_vm2, %v487_v7  ;;  %v481_v16 = vmul.f32 %v2003_v11, %v2191_v34  ;;  %v1958_v34 = vld [vmem:[%s2410_s6 + $0x20] sm:$0xff]  }
 0x227   :  { %v480_v15 = vmul.f32 %v2005_v12, %v2193_v35  ;;  %1811 = vmatpush3.bf16.msra.mxu1 %v721_v8  ;;  %1812 = vmatprep.mubr.msk.bf16.mxu1 %vm2011_vm1, %v2010_v0 }
 0x228   :  { %1822 = vmatprep.subr.bf16.mxu1 %v2010_v0  ;;  %v489_v21 = vpack.c.bf16 %v481_v16, %v481_v16  ;;  %v1959_v16 = vld [vmem:[%s2410_s6 + $0x28] sm:$0xff]  }
 0x229   :  { %v488_v19 = vpack.c.bf16 %v480_v15, %v480_v15 }
 0x22b   :  { %1807 = vmatmul.mubr.msk.bf16.vlgmr.msra.gmra.mrb[24].mxu0 %vm395_vm2, %v488_v19  ;;  %v1960_v19 = vld [vmem:[%s2410_s6 + $0x30] sm:$0xff]  }
 0x22c   :  { %1817 = vmatpush3.bf16.msra.mxu0 %v766_v17  ;;  %1818 = vmatprep.mubr.msk.bf16.mxu0 %vm2011_vm1, %v2010_v0  ;;  %v1961_v17 = vld [vmem:[%s2410_s6 + $0x38] sm:$0xff]  }
 0x22d   :  { %v2007_v22 = vpop.eup %2006  ;;  %1828 = vmatprep.subr.bf16.mxu0 %v1943_v20 }
 0x22e   :  { %v2009_v23 = vpop.eup %2008  ;;  %1813 = vmatmul.mubr.msk.bf16.vlgmr.msra.gmra.mrb[24].mxu1 %vm395_vm2, %v489_v21  ;;  %v483_v25 = vmul.f32 %v2007_v22, %v2199_v38  ;;  %v1963_v21 = vld [vmem:[%s2411_s8 + $0x8] sm:$0xff]   ;;  %v1965_v22 = vld [vmem:[%s2411_s8 + $0x18] sm:$0xff]  }
 0x22f   :  { %v482_v24 = vmul.f32 %v2009_v23, %v2201_v39  ;;  %1823 = vmatpush3.bf16.msra.mxu1 %v811_v18  ;;  %1824 = vmatprep.mubr.msk.bf16.mxu1 %vm2011_vm1, %v2010_v0  ;;  %v1945_v0 = vld [vmem:[%s2408_s2 + $0x10] sm:$0xff]   ;;  %v1966_v23 = vld [vmem:[%s2411_s8 + $0x20] sm:$0xff]  }
 0x230   :  { %v491_v29 = vpack.c.bf16 %v483_v25, %v483_v25  ;;  %1860 = vmatprep.subr.bf16.mxu1 %v1954_v9  ;;  %v1964_v18 = vld [vmem:[%s2411_s8 + $0x10] sm:$0xff]   ;;  %v1620_v25 = vld [vmem:[%s2412_s3] ss:$0 sm:$0xff] }
 0x231   :  { %v490_v27 = vpack.c.bf16 %v482_v24, %v482_v24  ;;  %v1967_v24 = vld [vmem:[%s2411_s8 + $0x28] sm:$0xff]  }
 0x233   :  { %1819 = vmatmul.mubr.msk.bf16.vlgmr.msra.gmra.mrb[28].mxu0 %vm395_vm2, %v490_v27 }
 0x234   :  { %1829 = vmatpush3.bf16.msra.mxu0 %v1943_v20  ;;  %1836 = vmatprep.mubr.msk.bf16.mxu0 %vm50_vm0, %v1600_v26  ;;  %v1962_v20 = vld [vmem:[%s2411_s8] sm:$0xff]  }
 0x235   :  { %1830 = vmatprep.subr.bf16.mxu0 %v1944_v28 }
 0x236   :  { %1825 = vmatmul.mubr.msk.bf16.vlgmr.msra.gmra.mrb[28].mxu1 %vm395_vm2, %v491_v29  ;;  %v1118_v29 = vld [vmem:[%s2413_s4] sm:$0xff] }
 0x237   :  { %1861 = vmatpush3.bf16.msra.mxu1 %v1954_v9  ;;  %v1127_v9 = vld [vmem:[%s2414_s5] sm:$0xff] }
 0x238   :  { %1831 = vmatpush3.bf16.msra.mxu0 %v1944_v28  ;;  %1862 = vmatprep.subr.bf16.mxu1 %v1955_v10 }
 0x239   :  { %1832 = vmatprep.subr.bf16.mxu0 %v1945_v0 }
 0x23b   :  { %1863 = vmatpush3.bf16.msra.mxu1 %v1955_v10 }
 0x23c   :  { %1833 = vmatpush3.bf16.msra.mxu0 %v1945_v0  ;;  %1864 = vmatprep.subr.bf16.mxu1 %v1956_v13 }
 0x23d   :  { %1834 = vmatprep.subr.bf16.mxu0 %v1946_v1 }
 0x23f   :  { %1865 = vmatpush3.bf16.msra.mxu1 %v1956_v13 }
 0x240   :  { %1835 = vmatpush3.bf16.msra.mxu0 %v1946_v1  ;;  %1866 = vmatprep.subr.bf16.mxu1 %v1957_v14 }
 0x241   :  { %1844 = vmatprep.subr.bf16.mxu0 %v1948_v2 }
 0x243   :  { %1837 = vmatmul.mubr.msk.bf16.vlgmr.msra.gmra.mrb[32].mxu0 %vm50_vm0, %v1601_v30  ;;  %1867 = vmatpush3.bf16.msra.mxu1 %v1957_v14 }
 0x244   :  { %1845 = vmatpush3.bf16.msra.mxu0 %v1948_v2  ;;  %1840 = vmatprep.mubr.msk.bf16.mxu0 %vm50_vm0, %v1602_v32 }
 0x245   :  { %1846 = vmatprep.subr.bf16.mxu0 %v1949_v31  ;;  %1868 = vmatprep.subr.bf16.mxu1 %v1958_v34 }
 0x247   :  { %1869 = vmatpush3.bf16.msra.mxu1 %v1958_v34 }
 0x248   :  { %1847 = vmatpush3.bf16.msra.mxu0 %v1949_v31  ;;  %1870 = vmatprep.subr.bf16.mxu1 %v1959_v16 }
 0x249   :  { %1848 = vmatprep.subr.bf16.mxu0 %v1952_v5 }
 0x24b   :  { %1841 = vmatmul.mubr.msk.bf16.gmra.mrb[36].mxu0 %vm50_vm0, %v1603_v33  ;;  %1871 = vmatpush3.bf16.msra.mxu1 %v1959_v16  ;;  %v1621_v16 = vld [vmem:[%s2416_s7] ss:$0 sm:$0xff] }
 0x24c   :  { %1849 = vmatpush3.bf16.msra.mxu0 %v1952_v5  ;;  %1872 = vmatprep.subr.bf16.mxu1 %v1960_v19 }
 0x24d   :  { %1850 = vmatprep.subr.bf16.mxu0 %v1953_v6 }
 0x24f   :  { %1873 = vmatpush3.bf16.msra.mxu1 %v1960_v19 }
 0x250   :  { %1851 = vmatpush3.bf16.msra.mxu0 %v1953_v6  ;;  %1874 = vmatprep.subr.bf16.mxu1 %v1961_v17 }
 0x251   :  { %1884 = vmatprep.subr.bf16.mxu0 %v1962_v20 }
 0x253   :  { %1875 = vmatpush3.bf16.msra.mxu1 %v1961_v17 }
 0x2ed   :  { %v532_v35 = vpop.f32.mrb[16].mxu0 }
 0x2ee   :  { %v1784_v36 = vpop.f32.mrb[17].mxu0 }
 0x2ef   :  { %v535_v37 = vpop.f32.mrb[18].mxu0 }
 0x2f0   :  { %v1785_v38 = vpop.f32.mrb[19].mxu0 }
 0x2f1   :  { %v577_v39 = vpop.f32.mrb[16].mxu1 }
 0x2f2   :  { %v853_v40 = vpack.c.bf16 %v577_v39, %v532_v35  ;;  %v1790_v41 = vpop.f32.mrb[17].mxu1 }
 0x2f3   :  { %v580_v42 = vpop.f32.mrb[18].mxu1 }
 0x2f4   :  { %v1791_v43 = vpop.f32.mrb[19].mxu1  ;;  %1852 = vmatprep.mubr.msk.bf16.mxu0 %vm50_vm0, %v853_v40 }
 0x2f5   :  { %v622_v44 = vpop.f32.mrb[20].mxu0 }
 0x2f6   :  { %v1796_v45 = vpop.f32.mrb[21].mxu0 }
 0x2f7   :  { %v625_v46 = vpop.f32.mrb[22].mxu0 }
 0x2f8   :  { %v1797_v47 = vpop.f32.mrb[23].mxu0 }
 0x2f9   :  { %v667_v48 = vpop.f32.mrb[20].mxu1 }
 0x2fa   :  { %v854_v49 = vpack.c.bf16 %v667_v48, %v622_v44  ;;  %v1802_v50 = vpop.f32.mrb[21].mxu1 }
 0x2fb   :  { %v670_v51 = vpop.f32.mrb[22].mxu1 }
 0x2fc   :  { %v1803_v52 = vpop.f32.mrb[23].mxu1  ;;  %1853 = vmatmul.mubr.msk.bf16.vlgmr.msra.gmra.mrb[32].mxu0 %vm50_vm0, %v854_v49 }
 0x2fd   :  { %1885 = vmatpush3.bf16.msra.mxu0 %v1962_v20 }
 0x2fe   :  { %v712_v53 = vpop.f32.mrb[24].mxu0  ;;  %1886 = vmatprep.subr.bf16.mxu0 %v1963_v21 }
 0x2ff   :  { %v1808_v54 = vpop.f32.mrb[25].mxu0 }
 0x300   :  { %v715_v55 = vpop.f32.mrb[26].mxu0 }
 0x301   :  { %v1809_v56 = vpop.f32.mrb[27].mxu0  ;;  %v757_v57 = vpop.f32.mrb[24].mxu1  ;;  %1887 = vmatpush3.bf16.msra.mxu0 %v1963_v21 }
 0x302   :  { %v855_v58 = vpack.c.bf16 %v757_v57, %v712_v53  ;;  %v1814_v59 = vpop.f32.mrb[25].mxu1  ;;  %1888 = vmatprep.subr.bf16.mxu0 %v1964_v18 }
 0x303   :  { %v760_v60 = vpop.f32.mrb[26].mxu1 }
 0x304   :  { %v1815_v61 = vpop.f32.mrb[27].mxu1  ;;  %1856 = vmatprep.mubr.msk.bf16.mxu0 %vm50_vm0, %v855_v58 }
 0x305   :  { %1889 = vmatpush3.bf16.msra.mxu0 %v1964_v18 }
 0x306   :  { %v802_v62 = vpop.f32.mrb[28].mxu0  ;;  %1890 = vmatprep.subr.bf16.mxu0 %v1965_v22 }
 0x307   :  { %v1820_v63 = vpop.f32.mrb[29].mxu0 }
 0x308   :  { %v805_v3 = vpop.f32.mrb[30].mxu0  ;;  %v1968_v63 = vld [vmem:[%s2411_s8 + $0x30] sm:$0xff]  }
 0x309   :  { %v1821_v4 = vpop.f32.mrb[31].mxu0  ;;  %v847_v7 = vpop.f32.mrb[28].mxu1  ;;  %1891 = vmatpush3.bf16.msra.mxu0 %v1965_v22  ;;  %v1969_v3 = vld [vmem:[%s2411_s8 + $0x38] sm:$0xff]  }
 0x30a   :  { %v856_v8 = vpack.c.bf16 %v847_v7, %v802_v62  ;;  %v1826_v11 = vpop.f32.mrb[29].mxu1  ;;  %1892 = vmatprep.subr.bf16.mxu0 %v1966_v23  ;;  %v1970_v4 = vld [vmem:[%s2415_s10] sm:$0xff]   ;;  %v1971_v7 = vld [vmem:[%s2415_s10 + $0x8] sm:$0xff]  }
 0x30b   :  { %v850_v12 = vpop.f32.mrb[30].mxu1  ;;  %1908 = vmatprep.subr.bf16.mxu1 %v1970_v4  ;;  %v1973_v11 = vld [vmem:[%s2415_s10 + $0x18] sm:$0xff]  }
 0x30c   :  { %v1827_v15 = vpop.f32.mrb[31].mxu1  ;;  %1857 = vmatmul.mubr.msk.bf16.gmra.mrb[36].mxu0 %vm50_vm0, %v856_v8  ;;  %v1972_v8 = vld [vmem:[%s2415_s10 + $0x10] sm:$0xff]   ;;  %v1974_v12 = vld [vmem:[%s2415_s10 + $0x20] sm:$0xff]  }
 0x30d   :  { %1893 = vmatpush3.bf16.msra.mxu0 %v1966_v23  ;;  %v1975_v15 = vld [vmem:[%s2415_s10 + $0x28] sm:$0xff]  }
 0x30e   :  { %1894 = vmatprep.subr.bf16.mxu0 %v1967_v24 }
 0x311   :  { %1895 = vmatpush3.bf16.msra.mxu0 %v1967_v24 }
 0x312   :  { %1896 = vmatprep.subr.bf16.mxu0 %v1968_v63 }
 0x315   :  { %1897 = vmatpush3.bf16.msra.mxu0 %v1968_v63 }
 0x316   :  { %1898 = vmatprep.subr.bf16.mxu0 %v1969_v3 }
 0x319   :  { %1899 = vmatpush3.bf16.msra.mxu0 %v1969_v3 }
 0x3cf   :  { %v1854_v26 = vpop.f32.mrb[32].mxu0 }
 0x3d0   :  { %v1104_v27 = vadd.f32 %v1854_v26, %v1620_v25  ;;  %v1064_v28 = vpop.f32.mrb[33].mxu0 }
 0x3d1   :  { %v1102_v0 = vadd.f32 %v1620_v25, %v1064_v28  ;;  %v1855_v1 = vpop.f32.mrb[34].mxu0 }
 0x3d2   :  { %v1112_v2 = vmax.f32 %v1104_v27, 0.0  ;;  %v1105_v30 = vadd.f32 %v1855_v1, %v1620_v25  ;;  %v1067_v31 = vpop.f32.mrb[35].mxu0 }
 0x3d3   :  { %v1110_v32 = vmax.f32 %v1102_v0, 0.0  ;;  %v1103_v33 = vadd.f32 %v1620_v25, %v1067_v31 }
 0x3d4   :  { %v1121_v5 = vmul.f32 %v1118_v29, %v1112_v2  ;;  %v1113_v6 = vmax.f32 %v1105_v30, 0.0 }
 0x3d5   :  { %v1119_v10 = vmul.f32 %v1118_v29, %v1110_v32  ;;  %v1111_v13 = vmax.f32 %v1103_v33, 0.0 }
 0x3d6   :  { %v1122_v14 = vmul.f32 %v1118_v29, %v1113_v6  ;;  %v1130_v35 = vadd.f32 %v1127_v9, %v1121_v5 }
 0x3d7   :  { %v1120_v34 = vmul.f32 %v1118_v29, %v1111_v13  ;;  %v1128_v37 = vadd.f32 %v1127_v9, %v1119_v10 }
 0x3d8   :  { %v1131_v36 = vadd.f32 %v1127_v9, %v1122_v14 }
 0x3d9   :  { %v1129_v38 = vadd.f32 %v1127_v9, %v1120_v34 }
 0x3da   :  { %v1137_v39 = vpack.c.bf16 %v1131_v36, %v1130_v35  ;;  %v1976_v36 = vld [vmem:[%s2415_s10 + $0x30] sm:$0xff]  }
 0x3db   :  { %v1136_v40 = vpack.c.bf16 %v1129_v38, %v1128_v37  ;;  %v1977_v37 = vld [vmem:[%s2415_s10 + $0x38] sm:$0xff]   ;;  %v1630_v38 = vld [vmem:[%s2417_s9] ss:$0 sm:$0xff] }
 0x3dd   :  { %1876 = vmatprep.mubr.bf16.mxu1 %v1136_v40 }
 0x3de   :  { %1877 = vmatmul.mubr.bf16.vlgmr.msra.gmra.mrb[32].mxu1 %v1137_v39 }
 0x3df   :  { %v1858_v41 = vpop.f32.mrb[36].mxu0  ;;  %1909 = vmatpush3.bf16.msra.mxu1 %v1970_v4 }
 0x3e0   :  { %v1108_v42 = vadd.f32 %v1858_v41, %v1620_v25  ;;  %v1080_v43 = vpop.f32.mrb[37].mxu0  ;;  %1910 = vmatprep.subr.bf16.mxu1 %v1971_v7 }
 0x3e1   :  { %v1106_v44 = vadd.f32 %v1620_v25, %v1080_v43  ;;  %v1859_v45 = vpop.f32.mrb[38].mxu0 }
 0x3e2   :  { %v1116_v46 = vmax.f32 %v1108_v42, 0.0  ;;  %v1109_v47 = vadd.f32 %v1859_v45, %v1620_v25  ;;  %v1083_v48 = vpop.f32.mrb[39].mxu0 }
 0x3e3   :  { %v1114_v49 = vmax.f32 %v1106_v44, 0.0  ;;  %v1107_v50 = vadd.f32 %v1620_v25, %v1083_v48  ;;  %1911 = vmatpush3.bf16.msra.mxu1 %v1971_v7 }
 0x3e4   :  { %v1125_v51 = vmul.f32 %v1118_v29, %v1116_v46  ;;  %v1117_v52 = vmax.f32 %v1109_v47, 0.0  ;;  %1912 = vmatprep.subr.bf16.mxu1 %v1972_v8 }
 0x3e5   :  { %v1123_v53 = vmul.f32 %v1118_v29, %v1114_v49  ;;  %v1115_v54 = vmax.f32 %v1107_v50, 0.0 }
 0x3e6   :  { %v1126_v55 = vmul.f32 %v1118_v29, %v1117_v52  ;;  %v1134_v57 = vadd.f32 %v1127_v9, %v1125_v51 }
 0x3e7   :  { %v1124_v56 = vmul.f32 %v1118_v29, %v1115_v54  ;;  %v1132_v59 = vadd.f32 %v1127_v9, %v1123_v53  ;;  %1913 = vmatpush3.bf16.msra.mxu1 %v1972_v8  ;;  %v1639_v8 = vld [vmem:[%s2418_s11] ss:$0 sm:$0xff] }
 0x3e8   :  { %v1135_v58 = vadd.f32 %v1127_v9, %v1126_v55  ;;  %1914 = vmatprep.subr.bf16.mxu1 %v1973_v11 }
 0x3e9   :  { %v1133_v60 = vadd.f32 %v1127_v9, %v1124_v56 }
 0x3ea   :  { %v1139_v61 = vpack.c.bf16 %v1135_v58, %v1134_v57 }
 0x3eb   :  { %v1138_v62 = vpack.c.bf16 %v1133_v60, %v1132_v59  ;;  %1915 = vmatpush3.bf16.msra.mxu1 %v1973_v11 }
 0x3ec   :  { %1916 = vmatprep.subr.bf16.mxu1 %v1974_v12 }
 0x3ed   :  { %1880 = vmatprep.mubr.bf16.mxu1 %v1138_v62 }
 0x3ee   :  { %1881 = vmatmul.mubr.bf16.gmra.mrb[36].mxu1 %v1139_v61 }
 0x3ef   :  { %1917 = vmatpush3.bf16.msra.mxu1 %v1974_v12 }
 0x3f0   :  { %1918 = vmatprep.subr.bf16.mxu1 %v1975_v15 }
 0x3f3   :  { %1919 = vmatpush3.bf16.msra.mxu1 %v1975_v15 }
 0x3f4   :  { %1920 = vmatprep.subr.bf16.mxu1 %v1976_v36 }
 0x3f7   :  { %1921 = vmatpush3.bf16.msra.mxu1 %v1976_v36 }
 0x3f8   :  { %1922 = vmatprep.subr.bf16.mxu1 %v1977_v37 }
 0x3fb   :  { %1923 = vmatpush3.bf16.msra.mxu1 %v1977_v37 }
 0x4b1   :  { %v1878_v19 = vpop.f32.mrb[32].mxu1 }
 0x4b2   :  { %v1254_v17 = vadd.f32 %v1878_v19, %v1621_v16  ;;  %v1245_v20 = vpop.f32.mrb[33].mxu1 }
 0x4b3   :  { %v1246_v21 = vadd.f32 %v1621_v16, %v1245_v20  ;;  %v1879_v18 = vpop.f32.mrb[34].mxu1 }
 0x4b4   :  { %v1257_v22 = vadd.f32 %v1879_v18, %v1621_v16  ;;  %v1248_v23 = vpop.f32.mrb[35].mxu1  ;;  %v1278_v25 = vmax.f32 %v1254_v17, 0.0 }
 0x4b5   :  { %v1249_v24 = vadd.f32 %v1621_v16, %v1248_v23  ;;  %v1276_v27 = vmax.f32 %v1246_v21, 0.0 }
 0x4b6   :  { %v1279_v26 = vmax.f32 %v1257_v22, 0.0 }
 0x4b7   :  { %v1277_v28 = vmax.f32 %v1249_v24, 0.0 }
 0x4b8   :  { %v1285_v29 = vpack.c.bf16 %v1279_v26, %v1278_v25 }
 0x4b9   :  { %v1284_v0 = vpack.c.bf16 %v1277_v28, %v1276_v27 }
 0x4bb   :  { %1900 = vmatprep.mubr.bf16.mxu0 %v1284_v0 }
 0x4bc   :  { %1901 = vmatmul.mubr.bf16.vlgmr.msra.gmra.mrb[40].mxu0 %v1285_v29 }
 0x4c1   :  { %v1882_v1 = vpop.f32.mrb[36].mxu1 }
 0x4c2   :  { %v1270_v2 = vadd.f32 %v1882_v1, %v1621_v16  ;;  %v1261_v30 = vpop.f32.mrb[37].mxu1 }
 0x4c3   :  { %v1262_v31 = vadd.f32 %v1621_v16, %v1261_v30  ;;  %v1883_v32 = vpop.f32.mrb[38].mxu1 }
 0x4c4   :  { %v1273_v33 = vadd.f32 %v1883_v32, %v1621_v16  ;;  %v1264_v5 = vpop.f32.mrb[39].mxu1  ;;  %v1282_v9 = vmax.f32 %v1270_v2, 0.0 }
 0x4c5   :  { %v1265_v6 = vadd.f32 %v1621_v16, %v1264_v5  ;;  %v1280_v13 = vmax.f32 %v1262_v31, 0.0 }
 0x4c6   :  { %v1283_v10 = vmax.f32 %v1273_v33, 0.0 }
 0x4c7   :  { %v1281_v14 = vmax.f32 %v1265_v6, 0.0 }
 0x4c8   :  { %v1287_v34 = vpack.c.bf16 %v1283_v10, %v1282_v9 }
 0x4c9   :  { %v1286_v35 = vpack.c.bf16 %v1281_v14, %v1280_v13 }
 0x4cb   :  { %1904 = vmatprep.mubr.bf16.mxu0 %v1286_v35 }
 0x4cc   :  { %1905 = vmatmul.mubr.bf16.gmra.mrb[44].mxu0 %v1287_v34 }
 0x58f   :  { %v1902_v39 = vpop.f32.mrb[40].mxu0 }
 0x590   :  { %v1402_v40 = vadd.f32 %v1902_v39, %v1630_v38  ;;  %v1393_v41 = vpop.f32.mrb[41].mxu0 }
 0x591   :  { %v1394_v42 = vadd.f32 %v1630_v38, %v1393_v41  ;;  %v1903_v43 = vpop.f32.mrb[42].mxu0 }
 0x592   :  { %v1405_v44 = vadd.f32 %v1903_v43, %v1630_v38  ;;  %v1396_v45 = vpop.f32.mrb[43].mxu0  ;;  %v1426_v47 = vmax.f32 %v1402_v40, 0.0 }
 0x593   :  { %v1397_v46 = vadd.f32 %v1630_v38, %v1396_v45  ;;  %v1424_v49 = vmax.f32 %v1394_v42, 0.0 }
 0x594   :  { %v1427_v48 = vmax.f32 %v1405_v44, 0.0 }
 0x595   :  { %v1425_v50 = vmax.f32 %v1397_v46, 0.0 }
 0x596   :  { %v1433_v51 = vpack.c.bf16 %v1427_v48, %v1426_v47 }
 0x597   :  { %v1432_v52 = vpack.c.bf16 %v1425_v50, %v1424_v49 }
 0x599   :  { %1924 = vmatprep.mubr.bf16.mxu1 %v1432_v52 }
 0x59a   :  { %1925 = vmatmul.mubr.bf16.vlgmr.msra.gmra.mrb[40].mxu1 %v1433_v51 }
 0x59f   :  { %v1906_v53 = vpop.f32.mrb[44].mxu0 }
 0x5a0   :  { %v1418_v54 = vadd.f32 %v1906_v53, %v1630_v38  ;;  %v1409_v55 = vpop.f32.mrb[45].mxu0 }
 0x5a1   :  { %v1410_v56 = vadd.f32 %v1630_v38, %v1409_v55  ;;  %v1907_v57 = vpop.f32.mrb[46].mxu0 }
 0x5a2   :  { %v1421_v58 = vadd.f32 %v1907_v57, %v1630_v38  ;;  %v1412_v59 = vpop.f32.mrb[47].mxu0  ;;  %v1430_v61 = vmax.f32 %v1418_v54, 0.0 }
 0x5a3   :  { %v1413_v60 = vadd.f32 %v1630_v38, %v1412_v59  ;;  %v1428_v63 = vmax.f32 %v1410_v56, 0.0 }
 0x5a4   :  { %v1431_v62 = vmax.f32 %v1421_v58, 0.0 }
 0x5a5   :  { %v1429_v3 = vmax.f32 %v1413_v60, 0.0 }
 0x5a6   :  { %v1435_v4 = vpack.c.bf16 %v1431_v62, %v1430_v61 }
 0x5a7   :  { %v1434_v7 = vpack.c.bf16 %v1429_v3, %v1428_v63 }
 0x5a9   :  { %1928 = vmatprep.mubr.bf16.mxu1 %v1434_v7 }
 0x5aa   :  { %1929 = vmatmul.mubr.bf16.gmra.mrb[44].mxu1 %v1435_v4 }
 0x66d   :  { %v1926_v11 = vpop.f32.mrb[40].mxu1 }
 0x66e   :  { %v1550_v12 = vadd.f32 %v1926_v11, %v1639_v8  ;;  %v1541_v15 = vpop.f32.mrb[41].mxu1 }
 0x66f   :  { %v1542_v16 = vadd.f32 %v1639_v8, %v1541_v15  ;;  %v1927_v19 = vpop.f32.mrb[42].mxu1 }
 0x670   :  { %1574 = vst [vmem:[%s2419_s12 + $0x10] sm:$0xff] %v1550_v12  ;;  %v1553_v17 = vadd.f32 %v1927_v19, %v1639_v8  ;;  %v1544_v20 = vpop.f32.mrb[43].mxu1 }
 0x671   :  { %1572 = vst [vmem:[%s2419_s12] sm:$0xff] %v1542_v16  ;;  %v1545_v21 = vadd.f32 %v1639_v8, %v1544_v20 }
 0x672   :  { %1575 = vst [vmem:[%s2419_s12 + $0x18] sm:$0xff] %v1553_v17 }
 0x673   :  { %1573 = vst [vmem:[%s2419_s12 + $0x8] sm:$0xff] %v1545_v21 }
 0x67d   :  { %v1930_v18 = vpop.f32.mrb[44].mxu1 }
 0x67e   :  { %v1566_v22 = vadd.f32 %v1930_v18, %v1639_v8  ;;  %v1557_v23 = vpop.f32.mrb[45].mxu1 }
 0x67f   :  { %v1558_v24 = vadd.f32 %v1639_v8, %v1557_v23  ;;  %v1931_v25 = vpop.f32.mrb[46].mxu1 }
 0x680   :  { %1578 = vst [vmem:[%s2419_s12 + $0x30] sm:$0xff] %v1566_v22  ;;  %v1569_v26 = vadd.f32 %v1931_v25, %v1639_v8  ;;  %v1560_v27 = vpop.f32.mrb[47].mxu1 }
 0x681   :  { %1576 = vst [vmem:[%s2419_s12 + $0x20] sm:$0xff] %v1558_v24  ;;  %v1561_v28 = vadd.f32 %v1639_v8, %v1560_v27 }
 0x682   :  { %1579 = vst [vmem:[%s2419_s12 + $0x38] sm:$0xff] %v1569_v26 }
 0x683   :  { %1577 = vst [vmem:[%s2419_s12 + $0x28] sm:$0xff] %v1561_v28 }

</bundles_post_ra>
